<compile_context>
chip_gen: v5e
topology: v5e:2x2
jax: 0.10.0
libtpu: 0.0.40
codegen_flags: <defaults>
</compile_context>

<pallas_src>
import functools
import math

import jax
import jax.numpy as jnp
from jax.experimental import pallas as pl
from jax.experimental.pallas import tpu as pltpu

ACT_DTYPE = jnp.bfloat16      # activation / weight dtype fed to the MXU
ROW_TILE = 256                # M-tile (rows) — conservative so 2-deep buffering fits v7x VMEM


def _round_up(x, m):
    return (x + m - 1) // m * m


def _pad_rows(x, tm):
    M = x.shape[0]
    Mp = _round_up(M, tm)
    if Mp != M:
        x = jnp.pad(x, ((0, Mp - M), (0, 0)))
    return x, Mp


def _cparams():
    # 1-D parallel grid everywhere (row tiles / windows are independent);
    # explicit VMEM cap leaves headroom inside v7x's 64 MiB physical VMEM.
    return pltpu.CompilerParams(
        dimension_semantics=("parallel",),
        vmem_limit_bytes=48 * 1024 * 1024,
    )


def _gelu_tanh(x):
    # TODO(synk): PyTorch nn.GELU defaults to the exact erf form; tanh approximation
    # used here for a guaranteed Mosaic lowering (difference is ~1e-3 relative).
    c = math.sqrt(2.0 / math.pi)
    return 0.5 * x * (1.0 + jnp.tanh(c * (x + 0.044715 * x * x * x)))


def _layernorm_f32(x, g, b, eps):
    mu = jnp.mean(x, axis=-1, keepdims=True)
    xc = x - mu
    var = jnp.mean(xc * xc, axis=-1, keepdims=True)
    return (xc * jax.lax.rsqrt(var + eps)) * g + b


# ----------------------------- Pallas kernels -------------------------------

def _linear_kernel(*refs, has_bias, activation):
    if has_bias:
        x_ref, w_ref, bias_ref, o_ref = refs
    else:
        x_ref, w_ref, o_ref = refs
        bias_ref = None
    acc = jnp.dot(x_ref[...], w_ref[...], preferred_element_type=jnp.float32)
    if bias_ref is not None:
        acc = acc + bias_ref[...]
    if activation == "gelu":
        acc = _gelu_tanh(acc)
    o_ref[...] = acc.astype(o_ref.dtype)


def pallas_linear(x, w, b=None, activation="none", out_dtype=ACT_DTYPE, tm=ROW_TILE):
    """x: (M, K) -> (M, N); bf16 MXU inputs, f32 accumulate, row-tiled grid."""
    M, K = x.shape
    K2, N = w.shape
    assert K == K2
    tm = min(tm, _round_up(M, 8))
    xp, Mp = _pad_rows(x.astype(ACT_DTYPE), tm)
    arrays = [xp, w.astype(ACT_DTYPE)]
    in_specs = [pl.BlockSpec((tm, K), lambda i: (i, 0)),
                pl.BlockSpec((K, N), lambda i: (0, 0))]
    if b is not None:
        arrays.append(b.reshape(1, N).astype(jnp.float32))
        in_specs.append(pl.BlockSpec((1, N), lambda i: (0, 0)))
    out = pl.pallas_call(
        functools.partial(_linear_kernel, has_bias=b is not None,
                          activation=activation),
        out_shape=jax.ShapeDtypeStruct((Mp, N), out_dtype),
        grid=(Mp // tm,),
        in_specs=in_specs,
        out_specs=pl.BlockSpec((tm, N), lambda i: (i, 0)),
        compiler_params=_cparams(),
    )(*arrays)
    return out[:M]


def _layernorm_kernel(x_ref, g_ref, b_ref, o_ref, *, eps):
    x = x_ref[...].astype(jnp.float32)
    o_ref[...] = _layernorm_f32(x, g_ref[...], b_ref[...], eps).astype(o_ref.dtype)


def pallas_layernorm(x, gamma, beta, eps=1e-5, out_dtype=ACT_DTYPE, tm=ROW_TILE):
    shape = x.shape
    C = shape[-1]
    x2 = x.reshape(-1, C)
    M = x2.shape[0]
    tm = min(tm, _round_up(M, 8))
    xp, Mp = _pad_rows(x2, tm)
    out = pl.pallas_call(
        functools.partial(_layernorm_kernel, eps=eps),
        out_shape=jax.ShapeDtypeStruct((Mp, C), out_dtype),
        grid=(Mp // tm,),
        in_specs=[pl.BlockSpec((tm, C), lambda i: (i, 0)),
                  pl.BlockSpec((1, C), lambda i: (0, 0)),
                  pl.BlockSpec((1, C), lambda i: (0, 0))],
        out_specs=pl.BlockSpec((tm, C), lambda i: (i, 0)),
        compiler_params=_cparams(),
    )(xp, gamma.reshape(1, C).astype(jnp.float32),
      beta.reshape(1, C).astype(jnp.float32))
    return out[:M].reshape(shape[:-1] + (C,))


def _ln_linear_kernel(*refs, eps, has_bias, activation):
    if has_bias:
        x_ref, g_ref, bta_ref, w_ref, bias_ref, o_ref = refs
    else:
        x_ref, g_ref, bta_ref, w_ref, o_ref = refs
        bias_ref = None
    x = x_ref[...].astype(jnp.float32)
    y = _layernorm_f32(x, g_ref[...], bta_ref[...], eps)
    acc = jnp.dot(y.astype(ACT_DTYPE), w_ref[...],
                  preferred_element_type=jnp.float32)
    if bias_ref is not None:
        acc = acc + bias_ref[...]
    if activation == "gelu":
        acc = _gelu_tanh(acc)
    o_ref[...] = acc.astype(o_ref.dtype)


def pallas_ln_linear(x, gamma, beta, w, b=None, activation="none", eps=1e-5,
                     out_dtype=ACT_DTYPE, tm=ROW_TILE):
    """Fused LayerNorm + Linear (+ optional bias / GELU). x: (M, C) -> (M, N)."""
    M, C = x.shape
    C2, N = w.shape
    assert C == C2
    tm = min(tm, _round_up(M, 8))
    xp, Mp = _pad_rows(x, tm)
    arrays = [xp,
              gamma.reshape(1, C).astype(jnp.float32),
              beta.reshape(1, C).astype(jnp.float32),
              w.astype(ACT_DTYPE)]
    in_specs = [pl.BlockSpec((tm, C), lambda i: (i, 0)),
                pl.BlockSpec((1, C), lambda i: (0, 0)),
                pl.BlockSpec((1, C), lambda i: (0, 0)),
                pl.BlockSpec((C, N), lambda i: (0, 0))]
    if b is not None:
        arrays.append(b.reshape(1, N).astype(jnp.float32))
        in_specs.append(pl.BlockSpec((1, N), lambda i: (0, 0)))
    out = pl.pallas_call(
        functools.partial(_ln_linear_kernel, eps=eps, has_bias=b is not None,
                          activation=activation),
        out_shape=jax.ShapeDtypeStruct((Mp, N), out_dtype),
        grid=(Mp // tm,),
        in_specs=in_specs,
        out_specs=pl.BlockSpec((tm, N), lambda i: (i, 0)),
        compiler_params=_cparams(),
    )(*arrays)
    return out[:M]


def _ln_mlp_kernel(x_ref, g_ref, bta_ref, w1_ref, b1_ref, w2_ref, b2_ref,
                   o_ref, *, eps):
    x = x_ref[...].astype(jnp.float32)
    y = _layernorm_f32(x, g_ref[...], bta_ref[...], eps)
    h = jnp.dot(y.astype(ACT_DTYPE), w1_ref[...], preferred_element_type=jnp.float32)
    h = _gelu_tanh(h + b1_ref[...])
    out = jnp.dot(h.astype(ACT_DTYPE), w2_ref[...], preferred_element_type=jnp.float32)
    out = out + b2_ref[...]
    o_ref[...] = (x + out).astype(o_ref.dtype)   # fused residual add


def pallas_ln_mlp(x, gamma, beta, w1, b1, w2, b2, eps=1e-5,
                  out_dtype=ACT_DTYPE, tm=ROW_TILE):
    """Fused LN2 + FC1 (GELU) + FC2 + residual. x: (M, C) -> (M, C)."""
    M, C = x.shape
    Ch = w1.shape[1]
    tm = min(tm, _round_up(M, 8))
    xp, Mp = _pad_rows(x, tm)
    out = pl.pallas_call(
        functools.partial(_ln_mlp_kernel, eps=eps),
        out_shape=jax.ShapeDtypeStruct((Mp, C), out_dtype),
        grid=(Mp // tm,),
        in_specs=[pl.BlockSpec((tm, C), lambda i: (i, 0)),
                  pl.BlockSpec((1, C), lambda i: (0, 0)),
                  pl.BlockSpec((1, C), lambda i: (0, 0)),
                  pl.BlockSpec((C, Ch), lambda i: (0, 0)),
                  pl.BlockSpec((1, Ch), lambda i: (0, 0)),
                  pl.BlockSpec((Ch, C), lambda i: (0, 0)),
                  pl.BlockSpec((1, C), lambda i: (0, 0))],
        out_specs=pl.BlockSpec((tm, C), lambda i: (i, 0)),
        compiler_params=_cparams(),
    )(xp,
      gamma.reshape(1, C).astype(jnp.float32),
      beta.reshape(1, C).astype(jnp.float32),
      w1.astype(ACT_DTYPE), b1.reshape(1, Ch).astype(jnp.float32),
      w2.astype(ACT_DTYPE), b2.reshape(1, C).astype(jnp.float32))
    return out[:M]


def _window_attn_proj_kernel(qkv_ref, m_ref, pw_ref, pb_ref, o_ref,
                             *, heads, head_dim):
    """One window per grid step; all heads + output projection fused.

    qkv columns are laid out [q | k | v], each section as heads x head_dim
    (the q columns are pre-scaled by head_dim**-0.5 in the weights)."""
    qkv = qkv_ref[0]                      # (T, 3C) bf16
    m = m_ref[0]                          # (T, T)  f32 additive mask
    C = heads * head_dim
    outs = []
    for h in range(heads):                # static unroll over heads (2-4)
        q = qkv[:, h * head_dim:(h + 1) * head_dim]
        k = qkv[:, C + h * head_dim:C + (h + 1) * head_dim]
        v = qkv[:, 2 * C + h * head_dim:2 * C + (h + 1) * head_dim]
        s = jnp.dot(q, k.T, preferred_element_type=jnp.float32) + m
        s = s - jnp.max(s, axis=-1, keepdims=True)
        p = jnp.exp(s)
        p = p * pl.reciprocal(jnp.sum(p, axis=-1, keepdims=True), approx=True)
        outs.append(jnp.dot(p.astype(ACT_DTYPE), v,
                            preferred_element_type=jnp.float32))
    o = jnp.concatenate(outs, axis=-1).astype(ACT_DTYPE)   # (T, C) lane-dense
    proj = jnp.dot(o, pw_ref[...], preferred_element_type=jnp.float32) + pb_ref[...]
    o_ref[0] = proj.astype(o_ref.dtype)


def pallas_window_attention_proj(qkv, attn_mask, proj_w, proj_b, heads):
    """qkv: (BW, T, 3C); attn_mask: (nW, T, T) additive -> (BW, T, C)."""
    BW, T, threeC = qkv.shape
    C = threeC // 3
    Dh = C // heads
    nW = attn_mask.shape[0]
    return pl.pallas_call(
        functools.partial(_window_attn_proj_kernel, heads=heads, head_dim=Dh),
        out_shape=jax.ShapeDtypeStruct((BW, T, C), ACT_DTYPE),
        grid=(BW,),
        in_specs=[pl.BlockSpec((1, T, threeC), lambda i: (i, 0, 0)),
                  pl.BlockSpec((1, T, T), lambda i: (i % nW, 0, 0)),
                  pl.BlockSpec((C, C), lambda i: (0, 0)),
                  pl.BlockSpec((1, C), lambda i: (0, 0))],
        out_specs=pl.BlockSpec((1, T, C), lambda i: (i, 0, 0)),
        compiler_params=_cparams(),
    )(qkv, attn_mask.astype(jnp.float32), proj_w.astype(ACT_DTYPE),
      proj_b.reshape(1, C).astype(jnp.float32))


# ------------------------------ model glue -----------------------------------

def window_partition(x, ws):
    B, H, W, C = x.shape
    x = x.reshape(B, H // ws, ws, W // ws, ws, C)
    x = jnp.transpose(x, (0, 1, 3, 2, 4, 5))
    return x.reshape(B * (H // ws) * (W // ws), ws * ws, C)


def window_reverse(xw, ws, B, H, W, C):
    x = xw.reshape(B, H // ws, W // ws, ws, ws, C)
    x = jnp.transpose(x, (0, 1, 3, 2, 4, 5))
    return x.reshape(B, H, W, C)


def patch_embed(x_nchw, p_pe, patch_size, eps, patch_norm=True):
    B, Cin, H, W = x_nchw.shape
    p = patch_size
    Hp, Wp = H // p, W // p
    # conv(kernel=stride=p) == matmul over extracted (Cin*p*p) patches
    x = x_nchw.reshape(B, Cin, Hp, p, Wp, p)
    x = jnp.transpose(x, (0, 2, 4, 1, 3, 5)).reshape(B * Hp * Wp, Cin * p * p)
    out = pallas_linear(x, p_pe["w"], p_pe["b"])
    if patch_norm:
        out = pallas_layernorm(out, p_pe["ln_g"], p_pe["ln_b"], eps)
    return out.reshape(B, Hp, Wp, -1)


def swin_block(x, blk, heads, ws, shift, attn_mask, eps):
    B, H, W, C = x.shape
    shortcut = x
    # LN is per-pixel so it commutes with roll/window_partition: shuffle first,
    # then fuse LN1 with the QKV projection inside one kernel.
    xs = x if shift == 0 else jnp.roll(x, shift=(-shift, -shift), axis=(1, 2))
    xw = window_partition(xs, ws)                         # (BW, T, C)
    BW, T, _ = xw.shape
    qkv = pallas_ln_linear(xw.reshape(BW * T, C), blk["ln1_g"], blk["ln1_b"],
                           blk["qkv_w"], blk["qkv_b"], eps=eps)
    qkv = qkv.reshape(BW, T, 3 * C)
    o = pallas_window_attention_proj(qkv, attn_mask, blk["proj_w"],
                                     blk["proj_b"], heads)   # (BW, T, C)
    xr = window_reverse(o, ws, B, H, W, C)
    if shift > 0:
        xr = jnp.roll(xr, shift=(shift, shift), axis=(1, 2))
    x = shortcut + xr              # drop_path / dropout are identity at eval
    y = pallas_ln_mlp(x.reshape(B * H * W, C), blk["ln2_g"], blk["ln2_b"],
                      blk["fc1_w"], blk["fc1_b"], blk["fc2_w"], blk["fc2_b"],
                      eps=eps)
    return y.reshape(B, H, W, C)


def patch_merging(x, pds, eps):
    B, H, W, C = x.shape
    x0 = x[:, 0::2, 0::2, :]
    x1 = x[:, 1::2, 0::2, :]
    x2 = x[:, 0::2, 1::2, :]
    x3 = x[:, 1::2, 1::2, :]
    xc = jnp.concatenate([x0, x1, x2, x3], axis=-1)       # (B, H/2, W/2, 4C)
    out = pallas_ln_linear(xc.reshape(-1, 4 * C), pds["ln_g"], pds["ln_b"],
                           pds["red_w"], None, eps=eps)    # reduction has no bias
    return out.reshape(B, H // 2, W // 2, 2 * C)


def atmo_encoder_forward(params, cfg, x, lead_time, all_land_mask_pad,
                         all_land_mask_pad_shifted, mask=None):
    # TODO(synk): lead_time conditioning / use_mask_token path of SwinEncoderStage /
    # PatchEmbed are not in the provided source; dropout & drop_path are identity (eval).
    eps = cfg["eps"]
    ws = cfg["window_size"]
    x = patch_embed(x, params["patch_embed"], cfg["patch_size"], eps, cfg["patch_norm"])
    for i, stage in enumerate(params["stages"]):
        B, H, W, C = x.shape
        for j, blk in enumerate(stage["blocks"]):
            shift = 0 if (min(H, W) <= ws or j % 2 == 0) else ws // 2
            am = all_land_mask_pad[i] if shift == 0 else all_land_mask_pad_shifted[i]
            x = swin_block(x, blk, cfg["enc_heads"][i], ws, shift, am, eps)
        # x_before_downsample is dropped by AtmoEncoder.forward
        if stage["downsample"] is not None:
            x = patch_merging(x, stage["downsample"], eps)
    B, H, W, C = x.shape
    # fused final LayerNorm + AtmoEncoder.proj
    out = pallas_ln_linear(x.reshape(-1, C), params["norm_g"], params["norm_b"],
                           params["proj_w"], params["proj_b"], eps=eps,
                           out_dtype=jnp.float32)
    return out.reshape(B, H, W, -1)


# --------------------------- deterministic params ----------------------------

def init_params(key, cfg):
    keys = iter(jax.random.split(key, 512))
    nk = lambda: next(keys)
    w32 = lambda shape: (0.02 * jax.random.normal(nk(), shape, jnp.float32))
    wmx = lambda shape: w32(shape).astype(ACT_DTYPE)        # matmul weights in bf16
    ed, cin, ps = cfg["embed_dim"], cfg["atmo_dims"], cfg["patch_size"]
    params = {}
    params["patch_embed"] = dict(
        w=w32((ed, cin, ps, ps)).reshape(ed, cin * ps * ps).T.astype(ACT_DTYPE),
        b=w32((ed,)),
        ln_g=jnp.ones((ed,), jnp.float32),
        ln_b=jnp.zeros((ed,), jnp.float32),
    )
    stages = []
    ns = len(cfg["enc_depths"])
    for i in range(ns):
        dim = ed * 2 ** i
        heads = cfg["enc_heads"][i]
        scale = (dim // heads) ** -0.5
        blocks = []
        for _ in range(cfg["enc_depths"][i]):
            qkv_w = w32((dim, 3 * dim))
            qkv_b = w32((3 * dim,))
            # fold the attention q*scale into the q columns (zero runtime cost)
            qkv_w = qkv_w.at[:, :dim].multiply(scale)
            qkv_b = qkv_b.at[:dim].multiply(scale)
            blocks.append(dict(
                ln1_g=jnp.ones((dim,), jnp.float32), ln1_b=jnp.zeros((dim,), jnp.float32),
                qkv_w=qkv_w.astype(ACT_DTYPE), qkv_b=qkv_b,
                proj_w=wmx((dim, dim)), proj_b=w32((dim,)),
                ln2_g=jnp.ones((dim,), jnp.float32), ln2_b=jnp.zeros((dim,), jnp.float32),
                fc1_w=wmx((dim, 4 * dim)), fc1_b=w32((4 * dim,)),
                fc2_w=wmx((4 * dim, dim)), fc2_b=w32((dim,)),
            ))
        ds = None
        if i < ns - 1:
            ds = dict(ln_g=jnp.ones((4 * dim,), jnp.float32),
                      ln_b=jnp.zeros((4 * dim,), jnp.float32),
                      red_w=wmx((4 * dim, 2 * dim)))     # PatchMerging reduction, no bias
        stages.append(dict(blocks=blocks, downsample=ds))
    params["stages"] = stages
    nf = ed * 2 ** (ns - 1)
    params["norm_g"] = jnp.ones((nf,), jnp.float32)
    params["norm_b"] = jnp.zeros((nf,), jnp.float32)
    params["proj_w"] = wmx((nf, cfg["lg_hidden_dim"]))
    params["proj_b"] = w32((cfg["lg_hidden_dim"],))
    return params


# ---------------------------------- main --------------------------------------

if __name__ == "__main__":
    cfg = dict(
        atmo_dims=4,
        input_shape=(16, 16),
        patch_size=2,
        embed_dim=32,
        enc_depths=(2, 2),
        enc_heads=(2, 4),
        window_size=4,
        lg_hidden_dim=48,
        eps=1e-5,
        patch_norm=True,
    )
    key = jax.random.PRNGKey(0)
    kp, kx, km0, km1, km2, km3 = jax.random.split(key, 6)
    params = init_params(kp, cfg)

    x = jax.random.normal(kx, (2, cfg["atmo_dims"], 16, 16), jnp.float32)
    lead_time = jnp.zeros((2,), jnp.float32)

    T = cfg["window_size"] ** 2
    def mk_mask(k, n_windows):
        bits = jax.random.bernoulli(k, 0.1, (n_windows, T, T))
        return jnp.where(bits, -100.0, 0.0).astype(jnp.float32)

    # stage 0: 8x8 feature map, 4x4 windows -> 4 windows; stage 1: 4x4 -> 1 window
    all_land_mask_pad = [mk_mask(km0, 4), mk_mask(km1, 1)]
    all_land_mask_pad_shifted = [mk_mask(km2, 4), mk_mask(km3, 1)]

    fwd = jax.jit(lambda p, xx, m0, m1: atmo_encoder_forward(
        p, cfg, xx, lead_time, m0, m1))
    out = fwd(params, x, all_land_mask_pad, all_land_mask_pad_shifted)
    out = jax.block_until_ready(out)
    assert out.shape == (2, 4, 4, cfg["lg_hidden_dim"]), out.shape
    assert bool(jnp.all(jnp.isfinite(out)))
    print("KERNEL_OK")
</pallas_src>

<mosaic_0001>
module attributes {stable_mosaic.version = 11 : i64} {
  func.func @_linear_kernel(%arg0: i32, %arg1: memref<128x16xbf16, #tpu.memory_space<vmem>>, %arg2: memref<16x32xbf16, #tpu.memory_space<vmem>>, %arg3: memref<1x32xf32, #tpu.memory_space<vmem>>, %arg4: memref<128x32xbf16, #tpu.memory_space<vmem>>) attributes {dimension_semantics = [#tpu.dimension_semantics<parallel>], iteration_bounds = array<i64: 1>, scalar_prefetch = 0 : i64, scratch_operands = 0 : i64, tpu.core_type = #tpu.core_type<tc>, window_params = [{transform_indices = @transform_0, window_bounds = array<i64: 128, 16>}, {pipeline_mode = #tpu.pipeline_mode<synchronous>, transform_indices = @transform_1, window_bounds = array<i64: 16, 32>}, {pipeline_mode = #tpu.pipeline_mode<synchronous>, transform_indices = @transform_2, window_bounds = array<i64: 1, 32>}, {transform_indices = @transform_3, window_bounds = array<i64: 128, 32>}]} {
    %c0 = arith.constant 0 : index
    %c0_0 = arith.constant 0 : index
    %0 = vector.load %arg1[%c0, %c0_0] : memref<128x16xbf16, #tpu.memory_space<vmem>>, vector<128x16xbf16>
    %c0_1 = arith.constant 0 : index
    %c0_2 = arith.constant 0 : index
    %1 = vector.load %arg2[%c0_1, %c0_2] : memref<16x32xbf16, #tpu.memory_space<vmem>>, vector<16x32xbf16>
    %cst = arith.constant dense<0.000000e+00> : vector<128x32xf32>
    %2 = tpu.matmul %0, %1, %cst {dimension_numbers = #tpu.dot_dimension_numbers<[1], [0], [0], [1], [0, 0, 1, 1], [], []>} : vector<128x16xbf16>, vector<16x32xbf16>, vector<128x32xf32> -> vector<128x32xf32>
    %c0_3 = arith.constant 0 : index
    %c0_4 = arith.constant 0 : index
    %3 = vector.load %arg3[%c0_3, %c0_4] : memref<1x32xf32, #tpu.memory_space<vmem>>, vector<1x32xf32>
    %4 = vector.broadcast %3 : vector<1x32xf32> to vector<128x32xf32>
    %5 = arith.addf %2, %4 : vector<128x32xf32>
    %6 = arith.truncf %5 : vector<128x32xf32> to vector<128x32xbf16>
    %c0_5 = arith.constant 0 : index
    %c0_6 = arith.constant 0 : index
    %7 = vector.load %arg4[%c0_5, %c0_6] : memref<128x32xbf16, #tpu.memory_space<vmem>>, vector<128x32xbf16>
    tpu.vector_store %arg4[%c0_5, %c0_6], %6 {strides = array<i32>} : memref<128x32xbf16, #tpu.memory_space<vmem>>, vector<128x32xbf16>,
    return
  }
  func.func @transform_0(%arg0: i32) -> (i32, i32) {
    %c0_i32 = arith.constant 0 : i32
    %c0_i32_0 = arith.constant 0 : i32
    return %arg0, %c0_i32 : i32, i32
  }
  func.func @transform_1(%arg0: i32) -> (i32, i32) {
    %c0_i32 = arith.constant 0 : i32
    %c0_i32_0 = arith.constant 0 : i32
    %c0_i32_1 = arith.constant 0 : i32
    return %c0_i32, %c0_i32_0 : i32, i32
  }
  func.func @transform_2(%arg0: i32) -> (i32, i32) {
    %c0_i32 = arith.constant 0 : i32
    %c0_i32_0 = arith.constant 0 : i32
    %c0_i32_1 = arith.constant 0 : i32
    return %c0_i32, %c0_i32_0 : i32, i32
  }
  func.func @transform_3(%arg0: i32) -> (i32, i32) {
    %c0_i32 = arith.constant 0 : i32
    %c0_i32_0 = arith.constant 0 : i32
    return %arg0, %c0_i32 : i32, i32
  }
}

module attributes {stable_mosaic.version = 11 : i64} {
  func.func @_layernorm_kernel(%arg0: i32, %arg1: memref<128x32xbf16, #tpu.memory_space<vmem>>, %arg2: memref<1x32xf32, #tpu.memory_space<vmem>>, %arg3: memref<1x32xf32, #tpu.memory_space<vmem>>, %arg4: memref<128x32xbf16, #tpu.memory_space<vmem>>) attributes {dimension_semantics = [#tpu.dimension_semantics<parallel>], iteration_bounds = array<i64: 1>, scalar_prefetch = 0 : i64, scratch_operands = 0 : i64, tpu.core_type = #tpu.core_type<tc>, window_params = [{transform_indices = @transform_0, window_bounds = array<i64: 128, 32>}, {pipeline_mode = #tpu.pipeline_mode<synchronous>, transform_indices = @transform_1, window_bounds = array<i64: 1, 32>}, {pipeline_mode = #tpu.pipeline_mode<synchronous>, transform_indices = @transform_2, window_bounds = array<i64: 1, 32>}, {transform_indices = @transform_3, window_bounds = array<i64: 128, 32>}]} {
    %c0 = arith.constant 0 : index
    %c0_0 = arith.constant 0 : index
    %0 = vector.load %arg1[%c0, %c0_0] : memref<128x32xbf16, #tpu.memory_space<vmem>>, vector<128x32xbf16>
    %1 = arith.extf %0 : vector<128x32xbf16> to vector<128x32xf32>
    %c0_1 = arith.constant 0 : index
    %c0_2 = arith.constant 0 : index
    %2 = vector.load %arg2[%c0_1, %c0_2] : memref<1x32xf32, #tpu.memory_space<vmem>>, vector<1x32xf32>
    %c0_3 = arith.constant 0 : index
    %c0_4 = arith.constant 0 : index
    %3 = vector.load %arg3[%c0_3, %c0_4] : memref<1x32xf32, #tpu.memory_space<vmem>>, vector<1x32xf32>
    %cst = arith.constant dense<0.000000e+00> : vector<128xf32>
    %4 = vector.multi_reduction <add>, %1, %cst [1] : vector<128x32xf32> to vector<128xf32>
    %5 = vector.shape_cast %4 : vector<128xf32> to vector<128x1xf32>
    %cst_5 = arith.constant 3.200000e+01 : f32
    %6 = vector.broadcast %cst_5 : f32 to vector<128x1xf32>
    %7 = arith.divf %5, %6 : vector<128x1xf32>
    %8 = vector.broadcast %7 : vector<128x1xf32> to vector<128x32xf32>
    %9 = arith.subf %1, %8 : vector<128x32xf32>
    %10 = arith.mulf %9, %9 : vector<128x32xf32>
    %cst_6 = arith.constant dense<0.000000e+00> : vector<128xf32>
    %11 = vector.multi_reduction <add>, %10, %cst_6 [1] : vector<128x32xf32> to vector<128xf32>
    %12 = vector.shape_cast %11 : vector<128xf32> to vector<128x1xf32>
    %cst_7 = arith.constant 3.200000e+01 : f32
    %13 = vector.broadcast %cst_7 : f32 to vector<128x1xf32>
    %14 = arith.divf %12, %13 : vector<128x1xf32>
    %cst_8 = arith.constant 9.99999974E-6 : f32
    %15 = vector.broadcast %cst_8 : f32 to vector<128x1xf32>
    %16 = arith.addf %14, %15 : vector<128x1xf32>
    %17 = math.rsqrt %16 : vector<128x1xf32>
    %18 = vector.broadcast %17 : vector<128x1xf32> to vector<128x32xf32>
    %19 = arith.mulf %9, %18 : vector<128x32xf32>
    %20 = vector.broadcast %2 : vector<1x32xf32> to vector<128x32xf32>
    %21 = arith.mulf %19, %20 : vector<128x32xf32>
    %22 = vector.broadcast %3 : vector<1x32xf32> to vector<128x32xf32>
    %23 = arith.addf %21, %22 : vector<128x32xf32>
    %24 = arith.truncf %23 : vector<128x32xf32> to vector<128x32xbf16>
    %c0_9 = arith.constant 0 : index
    %c0_10 = arith.constant 0 : index
    %25 = vector.load %arg4[%c0_9, %c0_10] : memref<128x32xbf16, #tpu.memory_space<vmem>>, vector<128x32xbf16>
    tpu.vector_store %arg4[%c0_9, %c0_10], %24 {strides = array<i32>} : memref<128x32xbf16, #tpu.memory_space<vmem>>, vector<128x32xbf16>,
    return
  }
  func.func @transform_0(%arg0: i32) -> (i32, i32) {
    %c0_i32 = arith.constant 0 : i32
    %c0_i32_0 = arith.constant 0 : i32
    return %arg0, %c0_i32 : i32, i32
  }
  func.func @transform_1(%arg0: i32) -> (i32, i32) {
    %c0_i32 = arith.constant 0 : i32
    %c0_i32_0 = arith.constant 0 : i32
    %c0_i32_1 = arith.constant 0 : i32
    return %c0_i32, %c0_i32_0 : i32, i32
  }
  func.func @transform_2(%arg0: i32) -> (i32, i32) {
    %c0_i32 = arith.constant 0 : i32
    %c0_i32_0 = arith.constant 0 : i32
    %c0_i32_1 = arith.constant 0 : i32
    return %c0_i32, %c0_i32_0 : i32, i32
  }
  func.func @transform_3(%arg0: i32) -> (i32, i32) {
    %c0_i32 = arith.constant 0 : i32
    %c0_i32_0 = arith.constant 0 : i32
    return %arg0, %c0_i32 : i32, i32
  }
}

module attributes {stable_mosaic.version = 11 : i64} {
  func.func @_ln_linear_kernel(%arg0: i32, %arg1: memref<128x32xbf16, #tpu.memory_space<vmem>>, %arg2: memref<1x32xf32, #tpu.memory_space<vmem>>, %arg3: memref<1x32xf32, #tpu.memory_space<vmem>>, %arg4: memref<32x96xbf16, #tpu.memory_space<vmem>>, %arg5: memref<1x96xf32, #tpu.memory_space<vmem>>, %arg6: memref<128x96xbf16, #tpu.memory_space<vmem>>) attributes {dimension_semantics = [#tpu.dimension_semantics<parallel>], iteration_bounds = array<i64: 1>, scalar_prefetch = 0 : i64, scratch_operands = 0 : i64, tpu.core_type = #tpu.core_type<tc>, window_params = [{transform_indices = @transform_0, window_bounds = array<i64: 128, 32>}, {pipeline_mode = #tpu.pipeline_mode<synchronous>, transform_indices = @transform_1, window_bounds = array<i64: 1, 32>}, {pipeline_mode = #tpu.pipeline_mode<synchronous>, transform_indices = @transform_2, window_bounds = array<i64: 1, 32>}, {pipeline_mode = #tpu.pipeline_mode<synchronous>, transform_indices = @transform_3, window_bounds = array<i64: 32, 96>}, {pipeline_mode = #tpu.pipeline_mode<synchronous>, transform_indices = @transform_4, window_bounds = array<i64: 1, 96>}, {transform_indices = @transform_5, window_bounds = array<i64: 128, 96>}]} {
    %c0 = arith.constant 0 : index
    %c0_0 = arith.constant 0 : index
    %0 = vector.load %arg1[%c0, %c0_0] : memref<128x32xbf16, #tpu.memory_space<vmem>>, vector<128x32xbf16>
    %1 = arith.extf %0 : vector<128x32xbf16> to vector<128x32xf32>
    %c0_1 = arith.constant 0 : index
    %c0_2 = arith.constant 0 : index
    %2 = vector.load %arg2[%c0_1, %c0_2] : memref<1x32xf32, #tpu.memory_space<vmem>>, vector<1x32xf32>
    %c0_3 = arith.constant 0 : index
    %c0_4 = arith.constant 0 : index
    %3 = vector.load %arg3[%c0_3, %c0_4] : memref<1x32xf32, #tpu.memory_space<vmem>>, vector<1x32xf32>
    %cst = arith.constant dense<0.000000e+00> : vector<128xf32>
    %4 = vector.multi_reduction <add>, %1, %cst [1] : vector<128x32xf32> to vector<128xf32>
    %5 = vector.shape_cast %4 : vector<128xf32> to vector<128x1xf32>
    %cst_5 = arith.constant 3.200000e+01 : f32
    %6 = vector.broadcast %cst_5 : f32 to vector<128x1xf32>
    %7 = arith.divf %5, %6 : vector<128x1xf32>
    %8 = vector.broadcast %7 : vector<128x1xf32> to vector<128x32xf32>
    %9 = arith.subf %1, %8 : vector<128x32xf32>
    %10 = arith.mulf %9, %9 : vector<128x32xf32>
    %cst_6 = arith.constant dense<0.000000e+00> : vector<128xf32>
    %11 = vector.multi_reduction <add>, %10, %cst_6 [1] : vector<128x32xf32> to vector<128xf32>
    %12 = vector.shape_cast %11 : vector<128xf32> to vector<128x1xf32>
    %cst_7 = arith.constant 3.200000e+01 : f32
    %13 = vector.broadcast %cst_7 : f32 to vector<128x1xf32>
    %14 = arith.divf %12, %13 : vector<128x1xf32>
    %cst_8 = arith.constant 9.99999974E-6 : f32
    %15 = vector.broadcast %cst_8 : f32 to vector<128x1xf32>
    %16 = arith.addf %14, %15 : vector<128x1xf32>
    %17 = math.rsqrt %16 : vector<128x1xf32>
    %18 = vector.broadcast %17 : vector<128x1xf32> to vector<128x32xf32>
    %19 = arith.mulf %9, %18 : vector<128x32xf32>
    %20 = vector.broadcast %2 : vector<1x32xf32> to vector<128x32xf32>
    %21 = arith.mulf %19, %20 : vector<128x32xf32>
    %22 = vector.broadcast %3 : vector<1x32xf32> to vector<128x32xf32>
    %23 = arith.addf %21, %22 : vector<128x32xf32>
    %24 = arith.truncf %23 : vector<128x32xf32> to vector<128x32xbf16>
    %c0_9 = arith.constant 0 : index
    %c0_10 = arith.constant 0 : index
    %25 = vector.load %arg4[%c0_9, %c0_10] : memref<32x96xbf16, #tpu.memory_space<vmem>>, vector<32x96xbf16>
    %cst_11 = arith.constant dense<0.000000e+00> : vector<128x96xf32>
    %26 = tpu.matmul %24, %25, %cst_11 {dimension_numbers = #tpu.dot_dimension_numbers<[1], [0], [0], [1], [0, 0, 1, 1], [], []>} : vector<128x32xbf16>, vector<32x96xbf16>, vector<128x96xf32> -> vector<128x96xf32>
    %c0_12 = arith.constant 0 : index
    %c0_13 = arith.constant 0 : index
    %27 = vector.load %arg5[%c0_12, %c0_13] : memref<1x96xf32, #tpu.memory_space<vmem>>, vector<1x96xf32>
    %28 = vector.broadcast %27 : vector<1x96xf32> to vector<128x96xf32>
    %29 = arith.addf %26, %28 : vector<128x96xf32>
    %30 = arith.truncf %29 : vector<128x96xf32> to vector<128x96xbf16>
    %c0_14 = arith.constant 0 : index
    %c0_15 = arith.constant 0 : index
    %31 = vector.load %arg6[%c0_14, %c0_15] : memref<128x96xbf16, #tpu.memory_space<vmem>>, vector<128x96xbf16>
    tpu.vector_store %arg6[%c0_14, %c0_15], %30 {strides = array<i32>} : memref<128x96xbf16, #tpu.memory_space<vmem>>, vector<128x96xbf16>,
    return
  }
  func.func @transform_0(%arg0: i32) -> (i32, i32) {
    %c0_i32 = arith.constant 0 : i32
    %c0_i32_0 = arith.constant 0 : i32
    return %arg0, %c0_i32 : i32, i32
  }
  func.func @transform_1(%arg0: i32) -> (i32, i32) {
    %c0_i32 = arith.constant 0 : i32
    %c0_i32_0 = arith.constant 0 : i32
    %c0_i32_1 = arith.constant 0 : i32
    return %c0_i32, %c0_i32_0 : i32, i32
  }
  func.func @transform_2(%arg0: i32) -> (i32, i32) {
    %c0_i32 = arith.constant 0 : i32
    %c0_i32_0 = arith.constant 0 : i32
    %c0_i32_1 = arith.constant 0 : i32
    return %c0_i32, %c0_i32_0 : i32, i32
  }
  func.func @transform_3(%arg0: i32) -> (i32, i32) {
    %c0_i32 = arith.constant 0 : i32
    %c0_i32_0 = arith.constant 0 : i32
    %c0_i32_1 = arith.constant 0 : i32
    return %c0_i32, %c0_i32_0 : i32, i32
  }
  func.func @transform_4(%arg0: i32) -> (i32, i32) {
    %c0_i32 = arith.constant 0 : i32
    %c0_i32_0 = arith.constant 0 : i32
    %c0_i32_1 = arith.constant 0 : i32
    return %c0_i32, %c0_i32_0 : i32, i32
  }
  func.func @transform_5(%arg0: i32) -> (i32, i32) {
    %c0_i32 = arith.constant 0 : i32
    %c0_i32_0 = arith.constant 0 : i32
    return %arg0, %c0_i32 : i32, i32
  }
}

module attributes {stable_mosaic.version = 11 : i64} {
  func.func @_window_attn_proj_kernel(%arg0: i32, %arg1: memref<1x16x96xbf16, #tpu.memory_space<vmem>>, %arg2: memref<1x16x16xf32, #tpu.memory_space<vmem>>, %arg3: memref<32x32xbf16, #tpu.memory_space<vmem>>, %arg4: memref<1x32xf32, #tpu.memory_space<vmem>>, %arg5: memref<1x16x32xbf16, #tpu.memory_space<vmem>>) attributes {dimension_semantics = [#tpu.dimension_semantics<parallel>], iteration_bounds = array<i64: 8>, scalar_prefetch = 0 : i64, scratch_operands = 0 : i64, tpu.core_type = #tpu.core_type<tc>, window_params = [{transform_indices = @transform_0, window_bounds = array<i64: 1, 16, 96>}, {transform_indices = @transform_1, window_bounds = array<i64: 1, 16, 16>}, {pipeline_mode = #tpu.pipeline_mode<synchronous>, transform_indices = @transform_2, window_bounds = array<i64: 32, 32>}, {pipeline_mode = #tpu.pipeline_mode<synchronous>, transform_indices = @transform_3, window_bounds = array<i64: 1, 32>}, {transform_indices = @transform_4, window_bounds = array<i64: 1, 16, 32>}]} {
    %c0 = arith.constant 0 : index
    %c0_0 = arith.constant 0 : index
    %c0_1 = arith.constant 0 : index
    %0 = vector.load %arg1[%c0, %c0_0, %c0_1] : memref<1x16x96xbf16, #tpu.memory_space<vmem>>, vector<1x16x96xbf16>
    %1 = vector.shape_cast %0 : vector<1x16x96xbf16> to vector<16x96xbf16>
    %c0_2 = arith.constant 0 : index
    %c0_3 = arith.constant 0 : index
    %c0_4 = arith.constant 0 : index
    %2 = vector.load %arg2[%c0_2, %c0_3, %c0_4] : memref<1x16x16xf32, #tpu.memory_space<vmem>>, vector<1x16x16xf32>
    %3 = vector.shape_cast %2 : vector<1x16x16xf32> to vector<16x16xf32>
    %4 = vector.extract_strided_slice %1 {offsets = [0, 0], sizes = [16, 16], strides = [1, 1]} : vector<16x96xbf16> to vector<16x16xbf16>
    %5 = vector.extract_strided_slice %1 {offsets = [0, 32], sizes = [16, 16], strides = [1, 1]} : vector<16x96xbf16> to vector<16x16xbf16>
    %6 = vector.extract_strided_slice %1 {offsets = [0, 64], sizes = [16, 16], strides = [1, 1]} : vector<16x96xbf16> to vector<16x16xbf16>
    %7 = tpu.transpose %5, [1, 0] : vector<16x16xbf16> -> vector<16x16xbf16>
    %cst = arith.constant dense<0.000000e+00> : vector<16x16xf32>
    %8 = tpu.matmul %4, %7, %cst {dimension_numbers = #tpu.dot_dimension_numbers<[1], [0], [0], [1], [0, 0, 1, 1], [], []>} : vector<16x16xbf16>, vector<16x16xbf16>, vector<16x16xf32> -> vector<16x16xf32>
    %9 = arith.addf %8, %3 : vector<16x16xf32>
    %cst_5 = arith.constant dense<0xFF800000> : vector<16xf32>
    %10 = vector.multi_reduction <maximumf>, %9, %cst_5 [1] : vector<16x16xf32> to vector<16xf32>
    %11 = vector.shape_cast %10 : vector<16xf32> to vector<16x1xf32>
    %12 = vector.broadcast %11 : vector<16x1xf32> to vector<16x16xf32>
    %13 = arith.subf %9, %12 : vector<16x16xf32>
    %14 = math.exp %13 : vector<16x16xf32>
    %cst_6 = arith.constant dense<0.000000e+00> : vector<16xf32>
    %15 = vector.multi_reduction <add>, %14, %cst_6 [1] : vector<16x16xf32> to vector<16xf32>
    %16 = vector.shape_cast %15 : vector<16xf32> to vector<16x1xf32>
    %17 = tpu.reciprocal %16 {approx = true} : vector<16x1xf32> -> vector<16x1xf32>
    %18 = vector.broadcast %17 : vector<16x1xf32> to vector<16x16xf32>
    %19 = arith.mulf %14, %18 : vector<16x16xf32>
    %20 = arith.truncf %19 : vector<16x16xf32> to vector<16x16xbf16>
    %cst_7 = arith.constant dense<0.000000e+00> : vector<16x16xf32>
    %21 = tpu.matmul %20, %6, %cst_7 {dimension_numbers = #tpu.dot_dimension_numbers<[1], [0], [0], [1], [0, 0, 1, 1], [], []>} : vector<16x16xbf16>, vector<16x16xbf16>, vector<16x16xf32> -> vector<16x16xf32>
    %22 = vector.extract_strided_slice %1 {offsets = [0, 16], sizes = [16, 16], strides = [1, 1]} : vector<16x96xbf16> to vector<16x16xbf16>
    %23 = vector.extract_strided_slice %1 {offsets = [0, 48], sizes = [16, 16], strides = [1, 1]} : vector<16x96xbf16> to vector<16x16xbf16>
    %24 = vector.extract_strided_slice %1 {offsets = [0, 80], sizes = [16, 16], strides = [1, 1]} : vector<16x96xbf16> to vector<16x16xbf16>
    %25 = tpu.transpose %23, [1, 0] : vector<16x16xbf16> -> vector<16x16xbf16>
    %cst_8 = arith.constant dense<0.000000e+00> : vector<16x16xf32>
    %26 = tpu.matmul %22, %25, %cst_8 {dimension_numbers = #tpu.dot_dimension_numbers<[1], [0], [0], [1], [0, 0, 1, 1], [], []>} : vector<16x16xbf16>, vector<16x16xbf16>, vector<16x16xf32> -> vector<16x16xf32>
    %27 = arith.addf %26, %3 : vector<16x16xf32>
    %cst_9 = arith.constant dense<0xFF800000> : vector<16xf32>
    %28 = vector.multi_reduction <maximumf>, %27, %cst_9 [1] : vector<16x16xf32> to vector<16xf32>
    %29 = vector.shape_cast %28 : vector<16xf32> to vector<16x1xf32>
    %30 = vector.broadcast %29 : vector<16x1xf32> to vector<16x16xf32>
    %31 = arith.subf %27, %30 : vector<16x16xf32>
    %32 = math.exp %31 : vector<16x16xf32>
    %cst_10 = arith.constant dense<0.000000e+00> : vector<16xf32>
    %33 = vector.multi_reduction <add>, %32, %cst_10 [1] : vector<16x16xf32> to vector<16xf32>
    %34 = vector.shape_cast %33 : vector<16xf32> to vector<16x1xf32>
    %35 = tpu.reciprocal %34 {approx = true} : vector<16x1xf32> -> vector<16x1xf32>
    %36 = vector.broadcast %35 : vector<16x1xf32> to vector<16x16xf32>
    %37 = arith.mulf %32, %36 : vector<16x16xf32>
    %38 = arith.truncf %37 : vector<16x16xf32> to vector<16x16xbf16>
    %cst_11 = arith.constant dense<0.000000e+00> : vector<16x16xf32>
    %39 = tpu.matmul %38, %24, %cst_11 {dimension_numbers = #tpu.dot_dimension_numbers<[1], [0], [0], [1], [0, 0, 1, 1], [], []>} : vector<16x16xbf16>, vector<16x16xbf16>, vector<16x16xf32> -> vector<16x16xf32>
    %40 = tpu.concatenate %21, %39 in 1 : vector<16x16xf32>, vector<16x16xf32> -> vector<16x32xf32>
    %41 = arith.truncf %40 : vector<16x32xf32> to vector<16x32xbf16>
    %c0_12 = arith.constant 0 : index
    %c0_13 = arith.constant 0 : index
    %42 = vector.load %arg3[%c0_12, %c0_13] : memref<32x32xbf16, #tpu.memory_space<vmem>>, vector<32x32xbf16>
    %cst_14 = arith.constant dense<0.000000e+00> : vector<16x32xf32>
    %43 = tpu.matmul %41, %42, %cst_14 {dimension_numbers = #tpu.dot_dimension_numbers<[1], [0], [0], [1], [0, 0, 1, 1], [], []>} : vector<16x32xbf16>, vector<32x32xbf16>, vector<16x32xf32> -> vector<16x32xf32>
    %c0_15 = arith.constant 0 : index
    %c0_16 = arith.constant 0 : index
    %44 = vector.load %arg4[%c0_15, %c0_16] : memref<1x32xf32, #tpu.memory_space<vmem>>, vector<1x32xf32>
    %45 = vector.broadcast %44 : vector<1x32xf32> to vector<16x32xf32>
    %46 = arith.addf %43, %45 : vector<16x32xf32>
    %47 = arith.truncf %46 : vector<16x32xf32> to vector<16x32xbf16>
    %c0_17 = arith.constant 0 : index
    %c0_18 = arith.constant 0 : index
    %c0_19 = arith.constant 0 : index
    %48 = vector.load %arg5[%c0_17, %c0_18, %c0_19] : memref<1x16x32xbf16, #tpu.memory_space<vmem>>, vector<1x16x32xbf16>
    %49 = vector.shape_cast %48 : vector<1x16x32xbf16> to vector<16x32xbf16>
    %50 = vector.shape_cast %47 : vector<16x32xbf16> to vector<1x16x32xbf16>
    tpu.vector_store %arg5[%c0_17, %c0_18, %c0_19], %50 {strides = array<i32>} : memref<1x16x32xbf16, #tpu.memory_space<vmem>>, vector<1x16x32xbf16>,
    return
  }
  func.func @transform_0(%arg0: i32) -> (i32, i32, i32) {
    %c0_i32 = arith.constant 0 : i32
    %c0_i32_0 = arith.constant 0 : i32
    %c0_i32_1 = arith.constant 0 : i32
    return %arg0, %c0_i32, %c0_i32_0 : i32, i32, i32
  }
  func.func @transform_1(%arg0: i32) -> (i32, i32, i32) {
    %c4_i32 = arith.constant 4 : i32
    %c0_i32 = arith.constant 0 : i32
    %0 = arith.cmpi eq, %c4_i32, %c0_i32 : i32
    %c1_i32 = arith.constant 1 : i32
    %1 = arith.select %0, %c1_i32, %c4_i32 : i32
    %2 = arith.remsi %arg0, %1 : i32
    %c0_i32_0 = arith.constant 0 : i32
    %3 = arith.cmpi ne, %2, %c0_i32_0 : i32
    %c0_i32_1 = arith.constant 0 : i32
    %4 = arith.cmpi slt, %2, %c0_i32_1 : i32
    %c0_i32_2 = arith.constant 0 : i32
    %5 = arith.cmpi slt, %1, %c0_i32_2 : i32
    %6 = arith.xori %4, %5 : i1
    %7 = arith.andi %6, %3 : i1
    %8 = arith.addi %2, %1 : i32
    %9 = arith.select %7, %8, %2 : i32
    %c0_i32_3 = arith.constant 0 : i32
    %c0_i32_4 = arith.constant 0 : i32
    %c0_i32_5 = arith.constant 0 : i32
    return %9, %c0_i32_3, %c0_i32_4 : i32, i32, i32
  }
  func.func @transform_2(%arg0: i32) -> (i32, i32) {
    %c0_i32 = arith.constant 0 : i32
    %c0_i32_0 = arith.constant 0 : i32
    %c0_i32_1 = arith.constant 0 : i32
    return %c0_i32, %c0_i32_0 : i32, i32
  }
  func.func @transform_3(%arg0: i32) -> (i32, i32) {
    %c0_i32 = arith.constant 0 : i32
    %c0_i32_0 = arith.constant 0 : i32
    %c0_i32_1 = arith.constant 0 : i32
    return %c0_i32, %c0_i32_0 : i32, i32
  }
  func.func @transform_4(%arg0: i32) -> (i32, i32, i32) {
    %c0_i32 = arith.constant 0 : i32
    %c0_i32_0 = arith.constant 0 : i32
    %c0_i32_1 = arith.constant 0 : i32
    return %arg0, %c0_i32, %c0_i32_0 : i32, i32, i32
  }
}

module attributes {stable_mosaic.version = 11 : i64} {
  func.func @_ln_mlp_kernel(%arg0: i32, %arg1: memref<128x32xbf16, #tpu.memory_space<vmem>>, %arg2: memref<1x32xf32, #tpu.memory_space<vmem>>, %arg3: memref<1x32xf32, #tpu.memory_space<vmem>>, %arg4: memref<32x128xbf16, #tpu.memory_space<vmem>>, %arg5: memref<1x128xf32, #tpu.memory_space<vmem>>, %arg6: memref<128x32xbf16, #tpu.memory_space<vmem>>, %arg7: memref<1x32xf32, #tpu.memory_space<vmem>>, %arg8: memref<128x32xbf16, #tpu.memory_space<vmem>>) attributes {dimension_semantics = [#tpu.dimension_semantics<parallel>], iteration_bounds = array<i64: 1>, scalar_prefetch = 0 : i64, scratch_operands = 0 : i64, tpu.core_type = #tpu.core_type<tc>, window_params = [{transform_indices = @transform_0, window_bounds = array<i64: 128, 32>}, {pipeline_mode = #tpu.pipeline_mode<synchronous>, transform_indices = @transform_1, window_bounds = array<i64: 1, 32>}, {pipeline_mode = #tpu.pipeline_mode<synchronous>, transform_indices = @transform_2, window_bounds = array<i64: 1, 32>}, {pipeline_mode = #tpu.pipeline_mode<synchronous>, transform_indices = @transform_3, window_bounds = array<i64: 32, 128>}, {pipeline_mode = #tpu.pipeline_mode<synchronous>, transform_indices = @transform_4, window_bounds = array<i64: 1, 128>}, {pipeline_mode = #tpu.pipeline_mode<synchronous>, transform_indices = @transform_5, window_bounds = array<i64: 128, 32>}, {pipeline_mode = #tpu.pipeline_mode<synchronous>, transform_indices = @transform_6, window_bounds = array<i64: 1, 32>}, {transform_indices = @transform_7, window_bounds = array<i64: 128, 32>}]} {
    %c0 = arith.constant 0 : index
    %c0_0 = arith.constant 0 : index
    %0 = vector.load %arg1[%c0, %c0_0] : memref<128x32xbf16, #tpu.memory_space<vmem>>, vector<128x32xbf16>
    %1 = arith.extf %0 : vector<128x32xbf16> to vector<128x32xf32>
    %c0_1 = arith.constant 0 : index
    %c0_2 = arith.constant 0 : index
    %2 = vector.load %arg2[%c0_1, %c0_2] : memref<1x32xf32, #tpu.memory_space<vmem>>, vector<1x32xf32>
    %c0_3 = arith.constant 0 : index
    %c0_4 = arith.constant 0 : index
    %3 = vector.load %arg3[%c0_3, %c0_4] : memref<1x32xf32, #tpu.memory_space<vmem>>, vector<1x32xf32>
    %cst = arith.constant dense<0.000000e+00> : vector<128xf32>
    %4 = vector.multi_reduction <add>, %1, %cst [1] : vector<128x32xf32> to vector<128xf32>
    %5 = vector.shape_cast %4 : vector<128xf32> to vector<128x1xf32>
    %cst_5 = arith.constant 3.200000e+01 : f32
    %6 = vector.broadcast %cst_5 : f32 to vector<128x1xf32>
    %7 = arith.divf %5, %6 : vector<128x1xf32>
    %8 = vector.broadcast %7 : vector<128x1xf32> to vector<128x32xf32>
    %9 = arith.subf %1, %8 : vector<128x32xf32>
    %10 = arith.mulf %9, %9 : vector<128x32xf32>
    %cst_6 = arith.constant dense<0.000000e+00> : vector<128xf32>
    %11 = vector.multi_reduction <add>, %10, %cst_6 [1] : vector<128x32xf32> to vector<128xf32>
    %12 = vector.shape_cast %11 : vector<128xf32> to vector<128x1xf32>
    %cst_7 = arith.constant 3.200000e+01 : f32
    %13 = vector.broadcast %cst_7 : f32 to vector<128x1xf32>
    %14 = arith.divf %12, %13 : vector<128x1xf32>
    %cst_8 = arith.constant 9.99999974E-6 : f32
    %15 = vector.broadcast %cst_8 : f32 to vector<128x1xf32>
    %16 = arith.addf %14, %15 : vector<128x1xf32>
    %17 = math.rsqrt %16 : vector<128x1xf32>
    %18 = vector.broadcast %17 : vector<128x1xf32> to vector<128x32xf32>
    %19 = arith.mulf %9, %18 : vector<128x32xf32>
    %20 = vector.broadcast %2 : vector<1x32xf32> to vector<128x32xf32>
    %21 = arith.mulf %19, %20 : vector<128x32xf32>
    %22 = vector.broadcast %3 : vector<1x32xf32> to vector<128x32xf32>
    %23 = arith.addf %21, %22 : vector<128x32xf32>
    %24 = arith.truncf %23 : vector<128x32xf32> to vector<128x32xbf16>
    %c0_9 = arith.constant 0 : index
    %c0_10 = arith.constant 0 : index
    %25 = vector.load %arg4[%c0_9, %c0_10] : memref<32x128xbf16, #tpu.memory_space<vmem>>, vector<32x128xbf16>
    %cst_11 = arith.constant dense<0.000000e+00> : vector<128x128xf32>
    %26 = tpu.matmul %24, %25, %cst_11 {dimension_numbers = #tpu.dot_dimension_numbers<[1], [0], [0], [1], [0, 0, 1, 1], [], []>} : vector<128x32xbf16>, vector<32x128xbf16>, vector<128x128xf32> -> vector<128x128xf32>
    %c0_12 = arith.constant 0 : index
    %c0_13 = arith.constant 0 : index
    %27 = vector.load %arg5[%c0_12, %c0_13] : memref<1x128xf32, #tpu.memory_space<vmem>>, vector<1x128xf32>
    %28 = vector.broadcast %27 : vector<1x128xf32> to vector<128x128xf32>
    %29 = arith.addf %26, %28 : vector<128x128xf32>
    %cst_14 = arith.constant 5.000000e-01 : f32
    %30 = vector.broadcast %cst_14 : f32 to vector<128x128xf32>
    %31 = arith.mulf %30, %29 : vector<128x128xf32>
    %cst_15 = arith.constant 4.471500e-02 : f32
    %32 = vector.broadcast %cst_15 : f32 to vector<128x128xf32>
    %33 = arith.mulf %32, %29 : vector<128x128xf32>
    %34 = arith.mulf %33, %29 : vector<128x128xf32>
    %35 = arith.mulf %34, %29 : vector<128x128xf32>
    %36 = arith.addf %29, %35 : vector<128x128xf32>
    %cst_16 = arith.constant 0.797884583 : f32
    %37 = vector.broadcast %cst_16 : f32 to vector<128x128xf32>
    %38 = arith.mulf %37, %36 : vector<128x128xf32>
    %39 = math.tanh %38 : vector<128x128xf32>
    %cst_17 = arith.constant 1.000000e+00 : f32
    %40 = vector.broadcast %cst_17 : f32 to vector<128x128xf32>
    %41 = arith.addf %40, %39 : vector<128x128xf32>
    %42 = arith.mulf %31, %41 : vector<128x128xf32>
    %43 = arith.truncf %42 : vector<128x128xf32> to vector<128x128xbf16>
    %c0_18 = arith.constant 0 : index
    %c0_19 = arith.constant 0 : index
    %44 = vector.load %arg6[%c0_18, %c0_19] : memref<128x32xbf16, #tpu.memory_space<vmem>>, vector<128x32xbf16>
    %cst_20 = arith.constant dense<0.000000e+00> : vector<128x32xf32>
    %45 = tpu.matmul %43, %44, %cst_20 {dimension_numbers = #tpu.dot_dimension_numbers<[1], [0], [0], [1], [0, 0, 1, 1], [], []>} : vector<128x128xbf16>, vector<128x32xbf16>, vector<128x32xf32> -> vector<128x32xf32>
    %c0_21 = arith.constant 0 : index
    %c0_22 = arith.constant 0 : index
    %46 = vector.load %arg7[%c0_21, %c0_22] : memref<1x32xf32, #tpu.memory_space<vmem>>, vector<1x32xf32>
    %47 = vector.broadcast %46 : vector<1x32xf32> to vector<128x32xf32>
    %48 = arith.addf %45, %47 : vector<128x32xf32>
    %49 = arith.addf %1, %48 : vector<128x32xf32>
    %50 = arith.truncf %49 : vector<128x32xf32> to vector<128x32xbf16>
    %c0_23 = arith.constant 0 : index
    %c0_24 = arith.constant 0 : index
    %51 = vector.load %arg8[%c0_23, %c0_24] : memref<128x32xbf16, #tpu.memory_space<vmem>>, vector<128x32xbf16>
    tpu.vector_store %arg8[%c0_23, %c0_24], %50 {strides = array<i32>} : memref<128x32xbf16, #tpu.memory_space<vmem>>, vector<128x32xbf16>,
    return
  }
  func.func @transform_0(%arg0: i32) -> (i32, i32) {
    %c0_i32 = arith.constant 0 : i32
    %c0_i32_0 = arith.constant 0 : i32
    return %arg0, %c0_i32 : i32, i32
  }
  func.func @transform_1(%arg0: i32) -> (i32, i32) {
    %c0_i32 = arith.constant 0 : i32
    %c0_i32_0 = arith.constant 0 : i32
    %c0_i32_1 = arith.constant 0 : i32
    return %c0_i32, %c0_i32_0 : i32, i32
  }
  func.func @transform_2(%arg0: i32) -> (i32, i32) {
    %c0_i32 = arith.constant 0 : i32
    %c0_i32_0 = arith.constant 0 : i32
    %c0_i32_1 = arith.constant 0 : i32
    return %c0_i32, %c0_i32_0 : i32, i32
  }
  func.func @transform_3(%arg0: i32) -> (i32, i32) {
    %c0_i32 = arith.constant 0 : i32
    %c0_i32_0 = arith.constant 0 : i32
    %c0_i32_1 = arith.constant 0 : i32
    return %c0_i32, %c0_i32_0 : i32, i32
  }
  func.func @transform_4(%arg0: i32) -> (i32, i32) {
    %c0_i32 = arith.constant 0 : i32
    %c0_i32_0 = arith.constant 0 : i32
    %c0_i32_1 = arith.constant 0 : i32
    return %c0_i32, %c0_i32_0 : i32, i32
  }
  func.func @transform_5(%arg0: i32) -> (i32, i32) {
    %c0_i32 = arith.constant 0 : i32
    %c0_i32_0 = arith.constant 0 : i32
    %c0_i32_1 = arith.constant 0 : i32
    return %c0_i32, %c0_i32_0 : i32, i32
  }
  func.func @transform_6(%arg0: i32) -> (i32, i32) {
    %c0_i32 = arith.constant 0 : i32
    %c0_i32_0 = arith.constant 0 : i32
    %c0_i32_1 = arith.constant 0 : i32
    return %c0_i32, %c0_i32_0 : i32, i32
  }
  func.func @transform_7(%arg0: i32) -> (i32, i32) {
    %c0_i32 = arith.constant 0 : i32
    %c0_i32_0 = arith.constant 0 : i32
    return %arg0, %c0_i32 : i32, i32
  }
}

module attributes {stable_mosaic.version = 11 : i64} {
  func.func @_ln_linear_kernel(%arg0: i32, %arg1: memref<32x128xbf16, #tpu.memory_space<vmem>>, %arg2: memref<1x128xf32, #tpu.memory_space<vmem>>, %arg3: memref<1x128xf32, #tpu.memory_space<vmem>>, %arg4: memref<128x64xbf16, #tpu.memory_space<vmem>>, %arg5: memref<32x64xbf16, #tpu.memory_space<vmem>>) attributes {dimension_semantics = [#tpu.dimension_semantics<parallel>], iteration_bounds = array<i64: 1>, scalar_prefetch = 0 : i64, scratch_operands = 0 : i64, tpu.core_type = #tpu.core_type<tc>, window_params = [{transform_indices = @transform_0, window_bounds = array<i64: 32, 128>}, {pipeline_mode = #tpu.pipeline_mode<synchronous>, transform_indices = @transform_1, window_bounds = array<i64: 1, 128>}, {pipeline_mode = #tpu.pipeline_mode<synchronous>, transform_indices = @transform_2, window_bounds = array<i64: 1, 128>}, {pipeline_mode = #tpu.pipeline_mode<synchronous>, transform_indices = @transform_3, window_bounds = array<i64: 128, 64>}, {transform_indices = @transform_4, window_bounds = array<i64: 32, 64>}]} {
    %c0 = arith.constant 0 : index
    %c0_0 = arith.constant 0 : index
    %0 = vector.load %arg1[%c0, %c0_0] : memref<32x128xbf16, #tpu.memory_space<vmem>>, vector<32x128xbf16>
    %1 = arith.extf %0 : vector<32x128xbf16> to vector<32x128xf32>
    %c0_1 = arith.constant 0 : index
    %c0_2 = arith.constant 0 : index
    %2 = vector.load %arg2[%c0_1, %c0_2] : memref<1x128xf32, #tpu.memory_space<vmem>>, vector<1x128xf32>
    %c0_3 = arith.constant 0 : index
    %c0_4 = arith.constant 0 : index
    %3 = vector.load %arg3[%c0_3, %c0_4] : memref<1x128xf32, #tpu.memory_space<vmem>>, vector<1x128xf32>
    %cst = arith.constant dense<0.000000e+00> : vector<32xf32>
    %4 = vector.multi_reduction <add>, %1, %cst [1] : vector<32x128xf32> to vector<32xf32>
    %5 = vector.shape_cast %4 : vector<32xf32> to vector<32x1xf32>
    %cst_5 = arith.constant 1.280000e+02 : f32
    %6 = vector.broadcast %cst_5 : f32 to vector<32x1xf32>
    %7 = arith.divf %5, %6 : vector<32x1xf32>
    %8 = vector.broadcast %7 : vector<32x1xf32> to vector<32x128xf32>
    %9 = arith.subf %1, %8 : vector<32x128xf32>
    %10 = arith.mulf %9, %9 : vector<32x128xf32>
    %cst_6 = arith.constant dense<0.000000e+00> : vector<32xf32>
    %11 = vector.multi_reduction <add>, %10, %cst_6 [1] : vector<32x128xf32> to vector<32xf32>
    %12 = vector.shape_cast %11 : vector<32xf32> to vector<32x1xf32>
    %cst_7 = arith.constant 1.280000e+02 : f32
    %13 = vector.broadcast %cst_7 : f32 to vector<32x1xf32>
    %14 = arith.divf %12, %13 : vector<32x1xf32>
    %cst_8 = arith.constant 9.99999974E-6 : f32
    %15 = vector.broadcast %cst_8 : f32 to vector<32x1xf32>
    %16 = arith.addf %14, %15 : vector<32x1xf32>
    %17 = math.rsqrt %16 : vector<32x1xf32>
    %18 = vector.broadcast %17 : vector<32x1xf32> to vector<32x128xf32>
    %19 = arith.mulf %9, %18 : vector<32x128xf32>
    %20 = vector.broadcast %2 : vector<1x128xf32> to vector<32x128xf32>
    %21 = arith.mulf %19, %20 : vector<32x128xf32>
    %22 = vector.broadcast %3 : vector<1x128xf32> to vector<32x128xf32>
    %23 = arith.addf %21, %22 : vector<32x128xf32>
    %24 = arith.truncf %23 : vector<32x128xf32> to vector<32x128xbf16>
    %c0_9 = arith.constant 0 : index
    %c0_10 = arith.constant 0 : index
    %25 = vector.load %arg4[%c0_9, %c0_10] : memref<128x64xbf16, #tpu.memory_space<vmem>>, vector<128x64xbf16>
    %cst_11 = arith.constant dense<0.000000e+00> : vector<32x64xf32>
    %26 = tpu.matmul %24, %25, %cst_11 {dimension_numbers = #tpu.dot_dimension_numbers<[1], [0], [0], [1], [0, 0, 1, 1], [], []>} : vector<32x128xbf16>, vector<128x64xbf16>, vector<32x64xf32> -> vector<32x64xf32>
    %27 = arith.truncf %26 : vector<32x64xf32> to vector<32x64xbf16>
    %c0_12 = arith.constant 0 : index
    %c0_13 = arith.constant 0 : index
    %28 = vector.load %arg5[%c0_12, %c0_13] : memref<32x64xbf16, #tpu.memory_space<vmem>>, vector<32x64xbf16>
    tpu.vector_store %arg5[%c0_12, %c0_13], %27 {strides = array<i32>} : memref<32x64xbf16, #tpu.memory_space<vmem>>, vector<32x64xbf16>,
    return
  }
  func.func @transform_0(%arg0: i32) -> (i32, i32) {
    %c0_i32 = arith.constant 0 : i32
    %c0_i32_0 = arith.constant 0 : i32
    return %arg0, %c0_i32 : i32, i32
  }
  func.func @transform_1(%arg0: i32) -> (i32, i32) {
    %c0_i32 = arith.constant 0 : i32
    %c0_i32_0 = arith.constant 0 : i32
    %c0_i32_1 = arith.constant 0 : i32
    return %c0_i32, %c0_i32_0 : i32, i32
  }
  func.func @transform_2(%arg0: i32) -> (i32, i32) {
    %c0_i32 = arith.constant 0 : i32
    %c0_i32_0 = arith.constant 0 : i32
    %c0_i32_1 = arith.constant 0 : i32
    return %c0_i32, %c0_i32_0 : i32, i32
  }
  func.func @transform_3(%arg0: i32) -> (i32, i32) {
    %c0_i32 = arith.constant 0 : i32
    %c0_i32_0 = arith.constant 0 : i32
    %c0_i32_1 = arith.constant 0 : i32
    return %c0_i32, %c0_i32_0 : i32, i32
  }
  func.func @transform_4(%arg0: i32) -> (i32, i32) {
    %c0_i32 = arith.constant 0 : i32
    %c0_i32_0 = arith.constant 0 : i32
    return %arg0, %c0_i32 : i32, i32
  }
}

module attributes {stable_mosaic.version = 11 : i64} {
  func.func @_window_attn_proj_kernel(%arg0: i32, %arg1: memref<1x16x192xbf16, #tpu.memory_space<vmem>>, %arg2: memref<1x16x16xf32, #tpu.memory_space<vmem>>, %arg3: memref<64x64xbf16, #tpu.memory_space<vmem>>, %arg4: memref<1x64xf32, #tpu.memory_space<vmem>>, %arg5: memref<1x16x64xbf16, #tpu.memory_space<vmem>>) attributes {dimension_semantics = [#tpu.dimension_semantics<parallel>], iteration_bounds = array<i64: 2>, scalar_prefetch = 0 : i64, scratch_operands = 0 : i64, tpu.core_type = #tpu.core_type<tc>, window_params = [{transform_indices = @transform_0, window_bounds = array<i64: 1, 16, 192>}, {transform_indices = @transform_1, window_bounds = array<i64: 1, 16, 16>}, {pipeline_mode = #tpu.pipeline_mode<synchronous>, transform_indices = @transform_2, window_bounds = array<i64: 64, 64>}, {pipeline_mode = #tpu.pipeline_mode<synchronous>, transform_indices = @transform_3, window_bounds = array<i64: 1, 64>}, {transform_indices = @transform_4, window_bounds = array<i64: 1, 16, 64>}]} {
    %c0 = arith.constant 0 : index
    %c0_0 = arith.constant 0 : index
    %c0_1 = arith.constant 0 : index
    %0 = vector.load %arg1[%c0, %c0_0, %c0_1] : memref<1x16x192xbf16, #tpu.memory_space<vmem>>, vector<1x16x192xbf16>
    %1 = vector.shape_cast %0 : vector<1x16x192xbf16> to vector<16x192xbf16>
    %c0_2 = arith.constant 0 : index
    %c0_3 = arith.constant 0 : index
    %c0_4 = arith.constant 0 : index
    %2 = vector.load %arg2[%c0_2, %c0_3, %c0_4] : memref<1x16x16xf32, #tpu.memory_space<vmem>>, vector<1x16x16xf32>
    %3 = vector.shape_cast %2 : vector<1x16x16xf32> to vector<16x16xf32>
    %4 = vector.extract_strided_slice %1 {offsets = [0, 0], sizes = [16, 16], strides = [1, 1]} : vector<16x192xbf16> to vector<16x16xbf16>
    %5 = vector.extract_strided_slice %1 {offsets = [0, 64], sizes = [16, 16], strides = [1, 1]} : vector<16x192xbf16> to vector<16x16xbf16>
    %6 = vector.extract_strided_slice %1 {offsets = [0, 128], sizes = [16, 16], strides = [1, 1]} : vector<16x192xbf16> to vector<16x16xbf16>
    %7 = tpu.transpose %5, [1, 0] : vector<16x16xbf16> -> vector<16x16xbf16>
    %cst = arith.constant dense<0.000000e+00> : vector<16x16xf32>
    %8 = tpu.matmul %4, %7, %cst {dimension_numbers = #tpu.dot_dimension_numbers<[1], [0], [0], [1], [0, 0, 1, 1], [], []>} : vector<16x16xbf16>, vector<16x16xbf16>, vector<16x16xf32> -> vector<16x16xf32>
    %9 = arith.addf %8, %3 : vector<16x16xf32>
    %cst_5 = arith.constant dense<0xFF800000> : vector<16xf32>
    %10 = vector.multi_reduction <maximumf>, %9, %cst_5 [1] : vector<16x16xf32> to vector<16xf32>
    %11 = vector.shape_cast %10 : vector<16xf32> to vector<16x1xf32>
    %12 = vector.broadcast %11 : vector<16x1xf32> to vector<16x16xf32>
    %13 = arith.subf %9, %12 : vector<16x16xf32>
    %14 = math.exp %13 : vector<16x16xf32>
    %cst_6 = arith.constant dense<0.000000e+00> : vector<16xf32>
    %15 = vector.multi_reduction <add>, %14, %cst_6 [1] : vector<16x16xf32> to vector<16xf32>
    %16 = vector.shape_cast %15 : vector<16xf32> to vector<16x1xf32>
    %17 = tpu.reciprocal %16 {approx = true} : vector<16x1xf32> -> vector<16x1xf32>
    %18 = vector.broadcast %17 : vector<16x1xf32> to vector<16x16xf32>
    %19 = arith.mulf %14, %18 : vector<16x16xf32>
    %20 = arith.truncf %19 : vector<16x16xf32> to vector<16x16xbf16>
    %cst_7 = arith.constant dense<0.000000e+00> : vector<16x16xf32>
    %21 = tpu.matmul %20, %6, %cst_7 {dimension_numbers = #tpu.dot_dimension_numbers<[1], [0], [0], [1], [0, 0, 1, 1], [], []>} : vector<16x16xbf16>, vector<16x16xbf16>, vector<16x16xf32> -> vector<16x16xf32>
    %22 = vector.extract_strided_slice %1 {offsets = [0, 16], sizes = [16, 16], strides = [1, 1]} : vector<16x192xbf16> to vector<16x16xbf16>
    %23 = vector.extract_strided_slice %1 {offsets = [0, 80], sizes = [16, 16], strides = [1, 1]} : vector<16x192xbf16> to vector<16x16xbf16>
    %24 = vector.extract_strided_slice %1 {offsets = [0, 144], sizes = [16, 16], strides = [1, 1]} : vector<16x192xbf16> to vector<16x16xbf16>
    %25 = tpu.transpose %23, [1, 0] : vector<16x16xbf16> -> vector<16x16xbf16>
    %cst_8 = arith.constant dense<0.000000e+00> : vector<16x16xf32>
    %26 = tpu.matmul %22, %25, %cst_8 {dimension_numbers = #tpu.dot_dimension_numbers<[1], [0], [0], [1], [0, 0, 1, 1], [], []>} : vector<16x16xbf16>, vector<16x16xbf16>, vector<16x16xf32> -> vector<16x16xf32>
    %27 = arith.addf %26, %3 : vector<16x16xf32>
    %cst_9 = arith.constant dense<0xFF800000> : vector<16xf32>
    %28 = vector.multi_reduction <maximumf>, %27, %cst_9 [1] : vector<16x16xf32> to vector<16xf32>
    %29 = vector.shape_cast %28 : vector<16xf32> to vector<16x1xf32>
    %30 = vector.broadcast %29 : vector<16x1xf32> to vector<16x16xf32>
    %31 = arith.subf %27, %30 : vector<16x16xf32>
    %32 = math.exp %31 : vector<16x16xf32>
    %cst_10 = arith.constant dense<0.000000e+00> : vector<16xf32>
    %33 = vector.multi_reduction <add>, %32, %cst_10 [1] : vector<16x16xf32> to vector<16xf32>
    %34 = vector.shape_cast %33 : vector<16xf32> to vector<16x1xf32>
    %35 = tpu.reciprocal %34 {approx = true} : vector<16x1xf32> -> vector<16x1xf32>
    %36 = vector.broadcast %35 : vector<16x1xf32> to vector<16x16xf32>
    %37 = arith.mulf %32, %36 : vector<16x16xf32>
    %38 = arith.truncf %37 : vector<16x16xf32> to vector<16x16xbf16>
    %cst_11 = arith.constant dense<0.000000e+00> : vector<16x16xf32>
    %39 = tpu.matmul %38, %24, %cst_11 {dimension_numbers = #tpu.dot_dimension_numbers<[1], [0], [0], [1], [0, 0, 1, 1], [], []>} : vector<16x16xbf16>, vector<16x16xbf16>, vector<16x16xf32> -> vector<16x16xf32>
    %40 = vector.extract_strided_slice %1 {offsets = [0, 32], sizes = [16, 16], strides = [1, 1]} : vector<16x192xbf16> to vector<16x16xbf16>
    %41 = vector.extract_strided_slice %1 {offsets = [0, 96], sizes = [16, 16], strides = [1, 1]} : vector<16x192xbf16> to vector<16x16xbf16>
    %42 = vector.extract_strided_slice %1 {offsets = [0, 160], sizes = [16, 16], strides = [1, 1]} : vector<16x192xbf16> to vector<16x16xbf16>
    %43 = tpu.transpose %41, [1, 0] : vector<16x16xbf16> -> vector<16x16xbf16>
    %cst_12 = arith.constant dense<0.000000e+00> : vector<16x16xf32>
    %44 = tpu.matmul %40, %43, %cst_12 {dimension_numbers = #tpu.dot_dimension_numbers<[1], [0], [0], [1], [0, 0, 1, 1], [], []>} : vector<16x16xbf16>, vector<16x16xbf16>, vector<16x16xf32> -> vector<16x16xf32>
    %45 = arith.addf %44, %3 : vector<16x16xf32>
    %cst_13 = arith.constant dense<0xFF800000> : vector<16xf32>
    %46 = vector.multi_reduction <maximumf>, %45, %cst_13 [1] : vector<16x16xf32> to vector<16xf32>
    %47 = vector.shape_cast %46 : vector<16xf32> to vector<16x1xf32>
    %48 = vector.broadcast %47 : vector<16x1xf32> to vector<16x16xf32>
    %49 = arith.subf %45, %48 : vector<16x16xf32>
    %50 = math.exp %49 : vector<16x16xf32>
    %cst_14 = arith.constant dense<0.000000e+00> : vector<16xf32>
    %51 = vector.multi_reduction <add>, %50, %cst_14 [1] : vector<16x16xf32> to vector<16xf32>
    %52 = vector.shape_cast %51 : vector<16xf32> to vector<16x1xf32>
    %53 = tpu.reciprocal %52 {approx = true} : vector<16x1xf32> -> vector<16x1xf32>
    %54 = vector.broadcast %53 : vector<16x1xf32> to vector<16x16xf32>
    %55 = arith.mulf %50, %54 : vector<16x16xf32>
    %56 = arith.truncf %55 : vector<16x16xf32> to vector<16x16xbf16>
    %cst_15 = arith.constant dense<0.000000e+00> : vector<16x16xf32>
    %57 = tpu.matmul %56, %42, %cst_15 {dimension_numbers = #tpu.dot_dimension_numbers<[1], [0], [0], [1], [0, 0, 1, 1], [], []>} : vector<16x16xbf16>, vector<16x16xbf16>, vector<16x16xf32> -> vector<16x16xf32>
    %58 = vector.extract_strided_slice %1 {offsets = [0, 48], sizes = [16, 16], strides = [1, 1]} : vector<16x192xbf16> to vector<16x16xbf16>
    %59 = vector.extract_strided_slice %1 {offsets = [0, 112], sizes = [16, 16], strides = [1, 1]} : vector<16x192xbf16> to vector<16x16xbf16>
    %60 = vector.extract_strided_slice %1 {offsets = [0, 176], sizes = [16, 16], strides = [1, 1]} : vector<16x192xbf16> to vector<16x16xbf16>
    %61 = tpu.transpose %59, [1, 0] : vector<16x16xbf16> -> vector<16x16xbf16>
    %cst_16 = arith.constant dense<0.000000e+00> : vector<16x16xf32>
    %62 = tpu.matmul %58, %61, %cst_16 {dimension_numbers = #tpu.dot_dimension_numbers<[1], [0], [0], [1], [0, 0, 1, 1], [], []>} : vector<16x16xbf16>, vector<16x16xbf16>, vector<16x16xf32> -> vector<16x16xf32>
    %63 = arith.addf %62, %3 : vector<16x16xf32>
    %cst_17 = arith.constant dense<0xFF800000> : vector<16xf32>
    %64 = vector.multi_reduction <maximumf>, %63, %cst_17 [1] : vector<16x16xf32> to vector<16xf32>
    %65 = vector.shape_cast %64 : vector<16xf32> to vector<16x1xf32>
    %66 = vector.broadcast %65 : vector<16x1xf32> to vector<16x16xf32>
    %67 = arith.subf %63, %66 : vector<16x16xf32>
    %68 = math.exp %67 : vector<16x16xf32>
    %cst_18 = arith.constant dense<0.000000e+00> : vector<16xf32>
    %69 = vector.multi_reduction <add>, %68, %cst_18 [1] : vector<16x16xf32> to vector<16xf32>
    %70 = vector.shape_cast %69 : vector<16xf32> to vector<16x1xf32>
    %71 = tpu.reciprocal %70 {approx = true} : vector<16x1xf32> -> vector<16x1xf32>
    %72 = vector.broadcast %71 : vector<16x1xf32> to vector<16x16xf32>
    %73 = arith.mulf %68, %72 : vector<16x16xf32>
    %74 = arith.truncf %73 : vector<16x16xf32> to vector<16x16xbf16>
    %cst_19 = arith.constant dense<0.000000e+00> : vector<16x16xf32>
    %75 = tpu.matmul %74, %60, %cst_19 {dimension_numbers = #tpu.dot_dimension_numbers<[1], [0], [0], [1], [0, 0, 1, 1], [], []>} : vector<16x16xbf16>, vector<16x16xbf16>, vector<16x16xf32> -> vector<16x16xf32>
    %76 = tpu.concatenate %21, %39, %57, %75 in 1 : vector<16x16xf32>, vector<16x16xf32>, vector<16x16xf32>, vector<16x16xf32> -> vector<16x64xf32>
    %77 = arith.truncf %76 : vector<16x64xf32> to vector<16x64xbf16>
    %c0_20 = arith.constant 0 : index
    %c0_21 = arith.constant 0 : index
    %78 = vector.load %arg3[%c0_20, %c0_21] : memref<64x64xbf16, #tpu.memory_space<vmem>>, vector<64x64xbf16>
    %cst_22 = arith.constant dense<0.000000e+00> : vector<16x64xf32>
    %79 = tpu.matmul %77, %78, %cst_22 {dimension_numbers = #tpu.dot_dimension_numbers<[1], [0], [0], [1], [0, 0, 1, 1], [], []>} : vector<16x64xbf16>, vector<64x64xbf16>, vector<16x64xf32> -> vector<16x64xf32>
    %c0_23 = arith.constant 0 : index
    %c0_24 = arith.constant 0 : index
    %80 = vector.load %arg4[%c0_23, %c0_24] : memref<1x64xf32, #tpu.memory_space<vmem>>, vector<1x64xf32>
    %81 = vector.broadcast %80 : vector<1x64xf32> to vector<16x64xf32>
    %82 = arith.addf %79, %81 : vector<16x64xf32>
    %83 = arith.truncf %82 : vector<16x64xf32> to vector<16x64xbf16>
    %c0_25 = arith.constant 0 : index
    %c0_26 = arith.constant 0 : index
    %c0_27 = arith.constant 0 : index
    %84 = vector.load %arg5[%c0_25, %c0_26, %c0_27] : memref<1x16x64xbf16, #tpu.memory_space<vmem>>, vector<1x16x64xbf16>
    %85 = vector.shape_cast %84 : vector<1x16x64xbf16> to vector<16x64xbf16>
    %86 = vector.shape_cast %83 : vector<16x64xbf16> to vector<1x16x64xbf16>
    tpu.vector_store %arg5[%c0_25, %c0_26, %c0_27], %86 {strides = array<i32>} : memref<1x16x64xbf16, #tpu.memory_space<vmem>>, vector<1x16x64xbf16>,
    return
  }
  func.func @transform_0(%arg0: i32) -> (i32, i32, i32) {
    %c0_i32 = arith.constant 0 : i32
    %c0_i32_0 = arith.constant 0 : i32
    %c0_i32_1 = arith.constant 0 : i32
    return %arg0, %c0_i32, %c0_i32_0 : i32, i32, i32
  }
  func.func @transform_1(%arg0: i32) -> (i32, i32, i32) {
    %c1_i32 = arith.constant 1 : i32
    %c0_i32 = arith.constant 0 : i32
    %0 = arith.cmpi eq, %c1_i32, %c0_i32 : i32
    %c1_i32_0 = arith.constant 1 : i32
    %1 = arith.select %0, %c1_i32_0, %c1_i32 : i32
    %2 = arith.remsi %arg0, %1 : i32
    %c0_i32_1 = arith.constant 0 : i32
    %3 = arith.cmpi ne, %2, %c0_i32_1 : i32
    %c0_i32_2 = arith.constant 0 : i32
    %4 = arith.cmpi slt, %2, %c0_i32_2 : i32
    %c0_i32_3 = arith.constant 0 : i32
    %5 = arith.cmpi slt, %1, %c0_i32_3 : i32
    %6 = arith.xori %4, %5 : i1
    %7 = arith.andi %6, %3 : i1
    %8 = arith.addi %2, %1 : i32
    %9 = arith.select %7, %8, %2 : i32
    %c0_i32_4 = arith.constant 0 : i32
    %c0_i32_5 = arith.constant 0 : i32
    %c0_i32_6 = arith.constant 0 : i32
    return %9, %c0_i32_4, %c0_i32_5 : i32, i32, i32
  }
  func.func @transform_2(%arg0: i32) -> (i32, i32) {
    %c0_i32 = arith.constant 0 : i32
    %c0_i32_0 = arith.constant 0 : i32
    %c0_i32_1 = arith.constant 0 : i32
    return %c0_i32, %c0_i32_0 : i32, i32
  }
  func.func @transform_3(%arg0: i32) -> (i32, i32) {
    %c0_i32 = arith.constant 0 : i32
    %c0_i32_0 = arith.constant 0 : i32
    %c0_i32_1 = arith.constant 0 : i32
    return %c0_i32, %c0_i32_0 : i32, i32
  }
  func.func @transform_4(%arg0: i32) -> (i32, i32, i32) {
    %c0_i32 = arith.constant 0 : i32
    %c0_i32_0 = arith.constant 0 : i32
    %c0_i32_1 = arith.constant 0 : i32
    return %arg0, %c0_i32, %c0_i32_0 : i32, i32, i32
  }
}

module attributes {stable_mosaic.version = 11 : i64} {
  func.func @_ln_linear_kernel(%arg0: i32, %arg1: memref<32x64xbf16, #tpu.memory_space<vmem>>, %arg2: memref<1x64xf32, #tpu.memory_space<vmem>>, %arg3: memref<1x64xf32, #tpu.memory_space<vmem>>, %arg4: memref<64x192xbf16, #tpu.memory_space<vmem>>, %arg5: memref<1x192xf32, #tpu.memory_space<vmem>>, %arg6: memref<32x192xbf16, #tpu.memory_space<vmem>>) attributes {dimension_semantics = [#tpu.dimension_semantics<parallel>], iteration_bounds = array<i64: 1>, scalar_prefetch = 0 : i64, scratch_operands = 0 : i64, tpu.core_type = #tpu.core_type<tc>, window_params = [{transform_indices = @transform_0, window_bounds = array<i64: 32, 64>}, {pipeline_mode = #tpu.pipeline_mode<synchronous>, transform_indices = @transform_1, window_bounds = array<i64: 1, 64>}, {pipeline_mode = #tpu.pipeline_mode<synchronous>, transform_indices = @transform_2, window_bounds = array<i64: 1, 64>}, {pipeline_mode = #tpu.pipeline_mode<synchronous>, transform_indices = @transform_3, window_bounds = array<i64: 64, 192>}, {pipeline_mode = #tpu.pipeline_mode<synchronous>, transform_indices = @transform_4, window_bounds = array<i64: 1, 192>}, {transform_indices = @transform_5, window_bounds = array<i64: 32, 192>}]} {
    %c0 = arith.constant 0 : index
    %c0_0 = arith.constant 0 : index
    %0 = vector.load %arg1[%c0, %c0_0] : memref<32x64xbf16, #tpu.memory_space<vmem>>, vector<32x64xbf16>
    %1 = arith.extf %0 : vector<32x64xbf16> to vector<32x64xf32>
    %c0_1 = arith.constant 0 : index
    %c0_2 = arith.constant 0 : index
    %2 = vector.load %arg2[%c0_1, %c0_2] : memref<1x64xf32, #tpu.memory_space<vmem>>, vector<1x64xf32>
    %c0_3 = arith.constant 0 : index
    %c0_4 = arith.constant 0 : index
    %3 = vector.load %arg3[%c0_3, %c0_4] : memref<1x64xf32, #tpu.memory_space<vmem>>, vector<1x64xf32>
    %cst = arith.constant dense<0.000000e+00> : vector<32xf32>
    %4 = vector.multi_reduction <add>, %1, %cst [1] : vector<32x64xf32> to vector<32xf32>
    %5 = vector.shape_cast %4 : vector<32xf32> to vector<32x1xf32>
    %cst_5 = arith.constant 6.400000e+01 : f32
    %6 = vector.broadcast %cst_5 : f32 to vector<32x1xf32>
    %7 = arith.divf %5, %6 : vector<32x1xf32>
    %8 = vector.broadcast %7 : vector<32x1xf32> to vector<32x64xf32>
    %9 = arith.subf %1, %8 : vector<32x64xf32>
    %10 = arith.mulf %9, %9 : vector<32x64xf32>
    %cst_6 = arith.constant dense<0.000000e+00> : vector<32xf32>
    %11 = vector.multi_reduction <add>, %10, %cst_6 [1] : vector<32x64xf32> to vector<32xf32>
    %12 = vector.shape_cast %11 : vector<32xf32> to vector<32x1xf32>
    %cst_7 = arith.constant 6.400000e+01 : f32
    %13 = vector.broadcast %cst_7 : f32 to vector<32x1xf32>
    %14 = arith.divf %12, %13 : vector<32x1xf32>
    %cst_8 = arith.constant 9.99999974E-6 : f32
    %15 = vector.broadcast %cst_8 : f32 to vector<32x1xf32>
    %16 = arith.addf %14, %15 : vector<32x1xf32>
    %17 = math.rsqrt %16 : vector<32x1xf32>
    %18 = vector.broadcast %17 : vector<32x1xf32> to vector<32x64xf32>
    %19 = arith.mulf %9, %18 : vector<32x64xf32>
    %20 = vector.broadcast %2 : vector<1x64xf32> to vector<32x64xf32>
    %21 = arith.mulf %19, %20 : vector<32x64xf32>
    %22 = vector.broadcast %3 : vector<1x64xf32> to vector<32x64xf32>
    %23 = arith.addf %21, %22 : vector<32x64xf32>
    %24 = arith.truncf %23 : vector<32x64xf32> to vector<32x64xbf16>
    %c0_9 = arith.constant 0 : index
    %c0_10 = arith.constant 0 : index
    %25 = vector.load %arg4[%c0_9, %c0_10] : memref<64x192xbf16, #tpu.memory_space<vmem>>, vector<64x192xbf16>
    %cst_11 = arith.constant dense<0.000000e+00> : vector<32x192xf32>
    %26 = tpu.matmul %24, %25, %cst_11 {dimension_numbers = #tpu.dot_dimension_numbers<[1], [0], [0], [1], [0, 0, 1, 1], [], []>} : vector<32x64xbf16>, vector<64x192xbf16>, vector<32x192xf32> -> vector<32x192xf32>
    %c0_12 = arith.constant 0 : index
    %c0_13 = arith.constant 0 : index
    %27 = vector.load %arg5[%c0_12, %c0_13] : memref<1x192xf32, #tpu.memory_space<vmem>>, vector<1x192xf32>
    %28 = vector.broadcast %27 : vector<1x192xf32> to vector<32x192xf32>
    %29 = arith.addf %26, %28 : vector<32x192xf32>
    %30 = arith.truncf %29 : vector<32x192xf32> to vector<32x192xbf16>
    %c0_14 = arith.constant 0 : index
    %c0_15 = arith.constant 0 : index
    %31 = vector.load %arg6[%c0_14, %c0_15] : memref<32x192xbf16, #tpu.memory_space<vmem>>, vector<32x192xbf16>
    tpu.vector_store %arg6[%c0_14, %c0_15], %30 {strides = array<i32>} : memref<32x192xbf16, #tpu.memory_space<vmem>>, vector<32x192xbf16>,
    return
  }
  func.func @transform_0(%arg0: i32) -> (i32, i32) {
    %c0_i32 = arith.constant 0 : i32
    %c0_i32_0 = arith.constant 0 : i32
    return %arg0, %c0_i32 : i32, i32
  }
  func.func @transform_1(%arg0: i32) -> (i32, i32) {
    %c0_i32 = arith.constant 0 : i32
    %c0_i32_0 = arith.constant 0 : i32
    %c0_i32_1 = arith.constant 0 : i32
    return %c0_i32, %c0_i32_0 : i32, i32
  }
  func.func @transform_2(%arg0: i32) -> (i32, i32) {
    %c0_i32 = arith.constant 0 : i32
    %c0_i32_0 = arith.constant 0 : i32
    %c0_i32_1 = arith.constant 0 : i32
    return %c0_i32, %c0_i32_0 : i32, i32
  }
  func.func @transform_3(%arg0: i32) -> (i32, i32) {
    %c0_i32 = arith.constant 0 : i32
    %c0_i32_0 = arith.constant 0 : i32
    %c0_i32_1 = arith.constant 0 : i32
    return %c0_i32, %c0_i32_0 : i32, i32
  }
  func.func @transform_4(%arg0: i32) -> (i32, i32) {
    %c0_i32 = arith.constant 0 : i32
    %c0_i32_0 = arith.constant 0 : i32
    %c0_i32_1 = arith.constant 0 : i32
    return %c0_i32, %c0_i32_0 : i32, i32
  }
  func.func @transform_5(%arg0: i32) -> (i32, i32) {
    %c0_i32 = arith.constant 0 : i32
    %c0_i32_0 = arith.constant 0 : i32
    return %arg0, %c0_i32 : i32, i32
  }
}

module attributes {stable_mosaic.version = 11 : i64} {
  func.func @_ln_mlp_kernel(%arg0: i32, %arg1: memref<32x64xbf16, #tpu.memory_space<vmem>>, %arg2: memref<1x64xf32, #tpu.memory_space<vmem>>, %arg3: memref<1x64xf32, #tpu.memory_space<vmem>>, %arg4: memref<64x256xbf16, #tpu.memory_space<vmem>>, %arg5: memref<1x256xf32, #tpu.memory_space<vmem>>, %arg6: memref<256x64xbf16, #tpu.memory_space<vmem>>, %arg7: memref<1x64xf32, #tpu.memory_space<vmem>>, %arg8: memref<32x64xbf16, #tpu.memory_space<vmem>>) attributes {dimension_semantics = [#tpu.dimension_semantics<parallel>], iteration_bounds = array<i64: 1>, scalar_prefetch = 0 : i64, scratch_operands = 0 : i64, tpu.core_type = #tpu.core_type<tc>, window_params = [{transform_indices = @transform_0, window_bounds = array<i64: 32, 64>}, {pipeline_mode = #tpu.pipeline_mode<synchronous>, transform_indices = @transform_1, window_bounds = array<i64: 1, 64>}, {pipeline_mode = #tpu.pipeline_mode<synchronous>, transform_indices = @transform_2, window_bounds = array<i64: 1, 64>}, {pipeline_mode = #tpu.pipeline_mode<synchronous>, transform_indices = @transform_3, window_bounds = array<i64: 64, 256>}, {pipeline_mode = #tpu.pipeline_mode<synchronous>, transform_indices = @transform_4, window_bounds = array<i64: 1, 256>}, {pipeline_mode = #tpu.pipeline_mode<synchronous>, transform_indices = @transform_5, window_bounds = array<i64: 256, 64>}, {pipeline_mode = #tpu.pipeline_mode<synchronous>, transform_indices = @transform_6, window_bounds = array<i64: 1, 64>}, {transform_indices = @transform_7, window_bounds = array<i64: 32, 64>}]} {
    %c0 = arith.constant 0 : index
    %c0_0 = arith.constant 0 : index
    %0 = vector.load %arg1[%c0, %c0_0] : memref<32x64xbf16, #tpu.memory_space<vmem>>, vector<32x64xbf16>
    %1 = arith.extf %0 : vector<32x64xbf16> to vector<32x64xf32>
    %c0_1 = arith.constant 0 : index
    %c0_2 = arith.constant 0 : index
    %2 = vector.load %arg2[%c0_1, %c0_2] : memref<1x64xf32, #tpu.memory_space<vmem>>, vector<1x64xf32>
    %c0_3 = arith.constant 0 : index
    %c0_4 = arith.constant 0 : index
    %3 = vector.load %arg3[%c0_3, %c0_4] : memref<1x64xf32, #tpu.memory_space<vmem>>, vector<1x64xf32>
    %cst = arith.constant dense<0.000000e+00> : vector<32xf32>
    %4 = vector.multi_reduction <add>, %1, %cst [1] : vector<32x64xf32> to vector<32xf32>
    %5 = vector.shape_cast %4 : vector<32xf32> to vector<32x1xf32>
    %cst_5 = arith.constant 6.400000e+01 : f32
    %6 = vector.broadcast %cst_5 : f32 to vector<32x1xf32>
    %7 = arith.divf %5, %6 : vector<32x1xf32>
    %8 = vector.broadcast %7 : vector<32x1xf32> to vector<32x64xf32>
    %9 = arith.subf %1, %8 : vector<32x64xf32>
    %10 = arith.mulf %9, %9 : vector<32x64xf32>
    %cst_6 = arith.constant dense<0.000000e+00> : vector<32xf32>
    %11 = vector.multi_reduction <add>, %10, %cst_6 [1] : vector<32x64xf32> to vector<32xf32>
    %12 = vector.shape_cast %11 : vector<32xf32> to vector<32x1xf32>
    %cst_7 = arith.constant 6.400000e+01 : f32
    %13 = vector.broadcast %cst_7 : f32 to vector<32x1xf32>
    %14 = arith.divf %12, %13 : vector<32x1xf32>
    %cst_8 = arith.constant 9.99999974E-6 : f32
    %15 = vector.broadcast %cst_8 : f32 to vector<32x1xf32>
    %16 = arith.addf %14, %15 : vector<32x1xf32>
    %17 = math.rsqrt %16 : vector<32x1xf32>
    %18 = vector.broadcast %17 : vector<32x1xf32> to vector<32x64xf32>
    %19 = arith.mulf %9, %18 : vector<32x64xf32>
    %20 = vector.broadcast %2 : vector<1x64xf32> to vector<32x64xf32>
    %21 = arith.mulf %19, %20 : vector<32x64xf32>
    %22 = vector.broadcast %3 : vector<1x64xf32> to vector<32x64xf32>
    %23 = arith.addf %21, %22 : vector<32x64xf32>
    %24 = arith.truncf %23 : vector<32x64xf32> to vector<32x64xbf16>
    %c0_9 = arith.constant 0 : index
    %c0_10 = arith.constant 0 : index
    %25 = vector.load %arg4[%c0_9, %c0_10] : memref<64x256xbf16, #tpu.memory_space<vmem>>, vector<64x256xbf16>
    %cst_11 = arith.constant dense<0.000000e+00> : vector<32x256xf32>
    %26 = tpu.matmul %24, %25, %cst_11 {dimension_numbers = #tpu.dot_dimension_numbers<[1], [0], [0], [1], [0, 0, 1, 1], [], []>} : vector<32x64xbf16>, vector<64x256xbf16>, vector<32x256xf32> -> vector<32x256xf32>
    %c0_12 = arith.constant 0 : index
    %c0_13 = arith.constant 0 : index
    %27 = vector.load %arg5[%c0_12, %c0_13] : memref<1x256xf32, #tpu.memory_space<vmem>>, vector<1x256xf32>
    %28 = vector.broadcast %27 : vector<1x256xf32> to vector<32x256xf32>
    %29 = arith.addf %26, %28 : vector<32x256xf32>
    %cst_14 = arith.constant 5.000000e-01 : f32
    %30 = vector.broadcast %cst_14 : f32 to vector<32x256xf32>
    %31 = arith.mulf %30, %29 : vector<32x256xf32>
    %cst_15 = arith.constant 4.471500e-02 : f32
    %32 = vector.broadcast %cst_15 : f32 to vector<32x256xf32>
    %33 = arith.mulf %32, %29 : vector<32x256xf32>
    %34 = arith.mulf %33, %29 : vector<32x256xf32>
    %35 = arith.mulf %34, %29 : vector<32x256xf32>
    %36 = arith.addf %29, %35 : vector<32x256xf32>
    %cst_16 = arith.constant 0.797884583 : f32
    %37 = vector.broadcast %cst_16 : f32 to vector<32x256xf32>
    %38 = arith.mulf %37, %36 : vector<32x256xf32>
    %39 = math.tanh %38 : vector<32x256xf32>
    %cst_17 = arith.constant 1.000000e+00 : f32
    %40 = vector.broadcast %cst_17 : f32 to vector<32x256xf32>
    %41 = arith.addf %40, %39 : vector<32x256xf32>
    %42 = arith.mulf %31, %41 : vector<32x256xf32>
    %43 = arith.truncf %42 : vector<32x256xf32> to vector<32x256xbf16>
    %c0_18 = arith.constant 0 : index
    %c0_19 = arith.constant 0 : index
    %44 = vector.load %arg6[%c0_18, %c0_19] : memref<256x64xbf16, #tpu.memory_space<vmem>>, vector<256x64xbf16>
    %cst_20 = arith.constant dense<0.000000e+00> : vector<32x64xf32>
    %45 = tpu.matmul %43, %44, %cst_20 {dimension_numbers = #tpu.dot_dimension_numbers<[1], [0], [0], [1], [0, 0, 1, 1], [], []>} : vector<32x256xbf16>, vector<256x64xbf16>, vector<32x64xf32> -> vector<32x64xf32>
    %c0_21 = arith.constant 0 : index
    %c0_22 = arith.constant 0 : index
    %46 = vector.load %arg7[%c0_21, %c0_22] : memref<1x64xf32, #tpu.memory_space<vmem>>, vector<1x64xf32>
    %47 = vector.broadcast %46 : vector<1x64xf32> to vector<32x64xf32>
    %48 = arith.addf %45, %47 : vector<32x64xf32>
    %49 = arith.addf %1, %48 : vector<32x64xf32>
    %50 = arith.truncf %49 : vector<32x64xf32> to vector<32x64xbf16>
    %c0_23 = arith.constant 0 : index
    %c0_24 = arith.constant 0 : index
    %51 = vector.load %arg8[%c0_23, %c0_24] : memref<32x64xbf16, #tpu.memory_space<vmem>>, vector<32x64xbf16>
    tpu.vector_store %arg8[%c0_23, %c0_24], %50 {strides = array<i32>} : memref<32x64xbf16, #tpu.memory_space<vmem>>, vector<32x64xbf16>,
    return
  }
  func.func @transform_0(%arg0: i32) -> (i32, i32) {
    %c0_i32 = arith.constant 0 : i32
    %c0_i32_0 = arith.constant 0 : i32
    return %arg0, %c0_i32 : i32, i32
  }
  func.func @transform_1(%arg0: i32) -> (i32, i32) {
    %c0_i32 = arith.constant 0 : i32
    %c0_i32_0 = arith.constant 0 : i32
    %c0_i32_1 = arith.constant 0 : i32
    return %c0_i32, %c0_i32_0 : i32, i32
  }
  func.func @transform_2(%arg0: i32) -> (i32, i32) {
    %c0_i32 = arith.constant 0 : i32
    %c0_i32_0 = arith.constant 0 : i32
    %c0_i32_1 = arith.constant 0 : i32
    return %c0_i32, %c0_i32_0 : i32, i32
  }
  func.func @transform_3(%arg0: i32) -> (i32, i32) {
    %c0_i32 = arith.constant 0 : i32
    %c0_i32_0 = arith.constant 0 : i32
    %c0_i32_1 = arith.constant 0 : i32
    return %c0_i32, %c0_i32_0 : i32, i32
  }
  func.func @transform_4(%arg0: i32) -> (i32, i32) {
    %c0_i32 = arith.constant 0 : i32
    %c0_i32_0 = arith.constant 0 : i32
    %c0_i32_1 = arith.constant 0 : i32
    return %c0_i32, %c0_i32_0 : i32, i32
  }
  func.func @transform_5(%arg0: i32) -> (i32, i32) {
    %c0_i32 = arith.constant 0 : i32
    %c0_i32_0 = arith.constant 0 : i32
    %c0_i32_1 = arith.constant 0 : i32
    return %c0_i32, %c0_i32_0 : i32, i32
  }
  func.func @transform_6(%arg0: i32) -> (i32, i32) {
    %c0_i32 = arith.constant 0 : i32
    %c0_i32_0 = arith.constant 0 : i32
    %c0_i32_1 = arith.constant 0 : i32
    return %c0_i32, %c0_i32_0 : i32, i32
  }
  func.func @transform_7(%arg0: i32) -> (i32, i32) {
    %c0_i32 = arith.constant 0 : i32
    %c0_i32_0 = arith.constant 0 : i32
    return %arg0, %c0_i32 : i32, i32
  }
}

module attributes {stable_mosaic.version = 11 : i64} {
  func.func @_ln_linear_kernel(%arg0: i32, %arg1: memref<32x64xbf16, #tpu.memory_space<vmem>>, %arg2: memref<1x64xf32, #tpu.memory_space<vmem>>, %arg3: memref<1x64xf32, #tpu.memory_space<vmem>>, %arg4: memref<64x48xbf16, #tpu.memory_space<vmem>>, %arg5: memref<1x48xf32, #tpu.memory_space<vmem>>, %arg6: memref<32x48xf32, #tpu.memory_space<vmem>>) attributes {dimension_semantics = [#tpu.dimension_semantics<parallel>], iteration_bounds = array<i64: 1>, scalar_prefetch = 0 : i64, scratch_operands = 0 : i64, tpu.core_type = #tpu.core_type<tc>, window_params = [{transform_indices = @transform_0, window_bounds = array<i64: 32, 64>}, {pipeline_mode = #tpu.pipeline_mode<synchronous>, transform_indices = @transform_1, window_bounds = array<i64: 1, 64>}, {pipeline_mode = #tpu.pipeline_mode<synchronous>, transform_indices = @transform_2, window_bounds = array<i64: 1, 64>}, {pipeline_mode = #tpu.pipeline_mode<synchronous>, transform_indices = @transform_3, window_bounds = array<i64: 64, 48>}, {pipeline_mode = #tpu.pipeline_mode<synchronous>, transform_indices = @transform_4, window_bounds = array<i64: 1, 48>}, {transform_indices = @transform_5, window_bounds = array<i64: 32, 48>}]} {
    %c0 = arith.constant 0 : index
    %c0_0 = arith.constant 0 : index
    %0 = vector.load %arg1[%c0, %c0_0] : memref<32x64xbf16, #tpu.memory_space<vmem>>, vector<32x64xbf16>
    %1 = arith.extf %0 : vector<32x64xbf16> to vector<32x64xf32>
    %c0_1 = arith.constant 0 : index
    %c0_2 = arith.constant 0 : index
    %2 = vector.load %arg2[%c0_1, %c0_2] : memref<1x64xf32, #tpu.memory_space<vmem>>, vector<1x64xf32>
    %c0_3 = arith.constant 0 : index
    %c0_4 = arith.constant 0 : index
    %3 = vector.load %arg3[%c0_3, %c0_4] : memref<1x64xf32, #tpu.memory_space<vmem>>, vector<1x64xf32>
    %cst = arith.constant dense<0.000000e+00> : vector<32xf32>
    %4 = vector.multi_reduction <add>, %1, %cst [1] : vector<32x64xf32> to vector<32xf32>
    %5 = vector.shape_cast %4 : vector<32xf32> to vector<32x1xf32>
    %cst_5 = arith.constant 6.400000e+01 : f32
    %6 = vector.broadcast %cst_5 : f32 to vector<32x1xf32>
    %7 = arith.divf %5, %6 : vector<32x1xf32>
    %8 = vector.broadcast %7 : vector<32x1xf32> to vector<32x64xf32>
    %9 = arith.subf %1, %8 : vector<32x64xf32>
    %10 = arith.mulf %9, %9 : vector<32x64xf32>
    %cst_6 = arith.constant dense<0.000000e+00> : vector<32xf32>
    %11 = vector.multi_reduction <add>, %10, %cst_6 [1] : vector<32x64xf32> to vector<32xf32>
    %12 = vector.shape_cast %11 : vector<32xf32> to vector<32x1xf32>
    %cst_7 = arith.constant 6.400000e+01 : f32
    %13 = vector.broadcast %cst_7 : f32 to vector<32x1xf32>
    %14 = arith.divf %12, %13 : vector<32x1xf32>
    %cst_8 = arith.constant 9.99999974E-6 : f32
    %15 = vector.broadcast %cst_8 : f32 to vector<32x1xf32>
    %16 = arith.addf %14, %15 : vector<32x1xf32>
    %17 = math.rsqrt %16 : vector<32x1xf32>
    %18 = vector.broadcast %17 : vector<32x1xf32> to vector<32x64xf32>
    %19 = arith.mulf %9, %18 : vector<32x64xf32>
    %20 = vector.broadcast %2 : vector<1x64xf32> to vector<32x64xf32>
    %21 = arith.mulf %19, %20 : vector<32x64xf32>
    %22 = vector.broadcast %3 : vector<1x64xf32> to vector<32x64xf32>
    %23 = arith.addf %21, %22 : vector<32x64xf32>
    %24 = arith.truncf %23 : vector<32x64xf32> to vector<32x64xbf16>
    %c0_9 = arith.constant 0 : index
    %c0_10 = arith.constant 0 : index
    %25 = vector.load %arg4[%c0_9, %c0_10] : memref<64x48xbf16, #tpu.memory_space<vmem>>, vector<64x48xbf16>
    %cst_11 = arith.constant dense<0.000000e+00> : vector<32x48xf32>
    %26 = tpu.matmul %24, %25, %cst_11 {dimension_numbers = #tpu.dot_dimension_numbers<[1], [0], [0], [1], [0, 0, 1, 1], [], []>} : vector<32x64xbf16>, vector<64x48xbf16>, vector<32x48xf32> -> vector<32x48xf32>
    %c0_12 = arith.constant 0 : index
    %c0_13 = arith.constant 0 : index
    %27 = vector.load %arg5[%c0_12, %c0_13] : memref<1x48xf32, #tpu.memory_space<vmem>>, vector<1x48xf32>
    %28 = vector.broadcast %27 : vector<1x48xf32> to vector<32x48xf32>
    %29 = arith.addf %26, %28 : vector<32x48xf32>
    %c0_14 = arith.constant 0 : index
    %c0_15 = arith.constant 0 : index
    %30 = vector.load %arg6[%c0_14, %c0_15] : memref<32x48xf32, #tpu.memory_space<vmem>>, vector<32x48xf32>
    tpu.vector_store %arg6[%c0_14, %c0_15], %29 {strides = array<i32>} : memref<32x48xf32, #tpu.memory_space<vmem>>, vector<32x48xf32>,
    return
  }
  func.func @transform_0(%arg0: i32) -> (i32, i32) {
    %c0_i32 = arith.constant 0 : i32
    %c0_i32_0 = arith.constant 0 : i32
    return %arg0, %c0_i32 : i32, i32
  }
  func.func @transform_1(%arg0: i32) -> (i32, i32) {
    %c0_i32 = arith.constant 0 : i32
    %c0_i32_0 = arith.constant 0 : i32
    %c0_i32_1 = arith.constant 0 : i32
    return %c0_i32, %c0_i32_0 : i32, i32
  }
  func.func @transform_2(%arg0: i32) -> (i32, i32) {
    %c0_i32 = arith.constant 0 : i32
    %c0_i32_0 = arith.constant 0 : i32
    %c0_i32_1 = arith.constant 0 : i32
    return %c0_i32, %c0_i32_0 : i32, i32
  }
  func.func @transform_3(%arg0: i32) -> (i32, i32) {
    %c0_i32 = arith.constant 0 : i32
    %c0_i32_0 = arith.constant 0 : i32
    %c0_i32_1 = arith.constant 0 : i32
    return %c0_i32, %c0_i32_0 : i32, i32
  }
  func.func @transform_4(%arg0: i32) -> (i32, i32) {
    %c0_i32 = arith.constant 0 : i32
    %c0_i32_0 = arith.constant 0 : i32
    %c0_i32_1 = arith.constant 0 : i32
    return %c0_i32, %c0_i32_0 : i32, i32
  }
  func.func @transform_5(%arg0: i32) -> (i32, i32) {
    %c0_i32 = arith.constant 0 : i32
    %c0_i32_0 = arith.constant 0 : i32
    return %arg0, %c0_i32 : i32, i32
  }
}

</mosaic_0001>

<bundles_post_ra>
// kernel: _lambda_.17
= control target key start
LH: loop header
LB: loop body
LE: loop exit
PB: predicated region body
PF: predicated region fallthrough
CT: control target
= control target key end

     0   :  { %vm48_vm0 = vcmask 261120   ;;  %v559_v40 = vmov 32.0   ;;  %vm462_vm5 = vcmask 257024   ;;  %s1104_s0 = inlined_call_operand.vmem [shape: bf16[128,32], index: 0, kind: input, shape index: {}]   ;;  %s1105_s1 = inlined_call_operand.vmem [shape: f32[1,32], index: 1, kind: input, shape index: {}]   ;;  %s1106_s2 = inlined_call_operand.vmem [shape: f32[1,32], index: 2, kind: input, shape index: {}]   ;;  %s1107_s3 = inlined_call_operand.vmem [shape: bf16[128,32], index: 3, kind: output, shape index: {}]  }
   0x1   :  { %v583_v0 = vld [vmem:[%s1104_s0 + $0x10] sm:$0xff]   ;;  %v588_v1 = vld [vmem:[%s1104_s0 + $0x8] sm:$0xff]   ;;  %v593_v2 = vld [vmem:[%s1104_s0] sm:$0xff]   ;;  %525 = vrcp.f32 %v559_v40 }
   0x2   :  { %v493_v3 = vunpack.c.l.bf16 %v583_v0  ;;  %v489_v4 = vunpack.c.l.bf16 %v588_v1  ;;  %v485_v5 = vunpack.c.l.bf16 %v593_v2  ;;  %v494_v9 = vunpack.c.h.bf16 %v583_v0  ;;  %v622_v15 = vld [vmem:[%s1104_s0 + $0x20] sm:$0xff]   ;;  %v627_v16 = vld [vmem:[%s1104_s0 + $0x18] sm:$0xff]   ;;  %v644_v23 = vld [vmem:[%s1104_s0 + $0x28] sm:$0xff]  }
   0x3   :  { %v490_v10 = vunpack.c.h.bf16 %v588_v1  ;;  %v486_v11 = vunpack.c.h.bf16 %v593_v2  ;;  %v501_v17 = vunpack.c.l.bf16 %v622_v15  ;;  %v498_v18 = vunpack.c.h.bf16 %v627_v16  ;;  %v661_v30 = vld [vmem:[%s1104_s0 + $0x38] sm:$0xff]   ;;  %v666_v31 = vld [vmem:[%s1104_s0 + $0x30] sm:$0xff]  }
   0x4   :  { %v61_v6 = vsel %vm48_vm0, %v493_v3, 0.0  ;;  %v55_v7 = vsel %vm48_vm0, %v489_v4, 0.0  ;;  %v49_v8 = vsel %vm48_vm0, %v485_v5, 0.0  ;;  %v64_v12 = vsel %vm48_vm0, %v494_v9, 0.0 }
   0x5   :  { %62 = vadd.xlane.f32.xlu2 %v61_v6  ;;  %56 = vadd.xlane.f32.xlu1 %v55_v7  ;;  %v58_v13 = vsel %vm48_vm0, %v490_v10, 0.0  ;;  %v52_v14 = vsel %vm48_vm0, %v486_v11, 0.0  ;;  %v497_v19 = vunpack.c.l.bf16 %v627_v16  ;;  %v73_v20 = vsel %vm48_vm0, %v501_v17, 0.0 }
   0x6   :  { %50 = vadd.xlane.f32.xlu0 %v49_v8  ;;  %v70_v21 = vsel %vm48_vm0, %v498_v18, 0.0  ;;  %v506_v24 = vunpack.c.h.bf16 %v644_v23  ;;  %v505_v25 = vunpack.c.l.bf16 %v644_v23  ;;  %v502_v26 = vunpack.c.h.bf16 %v622_v15 }
   0x7   :  { %v67_v22 = vsel %vm48_vm0, %v497_v19, 0.0  ;;  %v513_v32 = vunpack.c.l.bf16 %v661_v30  ;;  %v510_v33 = vunpack.c.h.bf16 %v666_v31  ;;  %v509_v34 = vunpack.c.l.bf16 %v666_v31  ;;  %v526_v41 = vpop.eup %525 }
   0x8   :  { %v82_v27 = vsel %vm48_vm0, %v506_v24, 0.0  ;;  %v79_v28 = vsel %vm48_vm0, %v505_v25, 0.0  ;;  %v76_v29 = vsel %vm48_vm0, %v502_v26, 0.0  ;;  %v514_v38 = vunpack.c.h.bf16 %v661_v30 }
   0x9   :  { %v91_v35 = vsel %vm48_vm0, %v513_v32, 0.0  ;;  %v88_v36 = vsel %vm48_vm0, %v510_v33, 0.0  ;;  %v85_v37 = vsel %vm48_vm0, %v509_v34, 0.0  ;;  %v98_v42 = vmul.f32 32.0, %v526_v41 }
   0xa   :  { %v94_v39 = vsel %vm48_vm0, %v514_v38, 0.0  ;;  %vm102_vm1 = vweird.f32 %v526_v41 }
   0xb   :  { %v99_v43 = vsub.f32 1.0, %v98_v42 }
   0xd   :  { %65 = vadd.xlane.f32.xlu2 %v64_v12  ;;  %59 = vadd.xlane.f32.xlu1 %v58_v13  ;;  %v100_v44 = vmul.f32 %v526_v41, %v99_v43 }
   0xe   :  { %53 = vadd.xlane.f32.xlu0 %v52_v14 }
   0xf   :  { %v101_v45 = vadd.f32 %v526_v41, %v100_v44 }
  0x11   :  { %v684_v46 = vsel %vm102_vm1, %v526_v41, %v101_v45 }
  0x15   :  { %74 = vadd.xlane.f32.xlu2 %v73_v20  ;;  %71 = vadd.xlane.f32.xlu1 %v70_v21 }
  0x16   :  { %68 = vadd.xlane.f32.xlu0 %v67_v22 }
  0x1d   :  { %83 = vadd.xlane.f32.xlu2 %v82_v27  ;;  %80 = vadd.xlane.f32.xlu1 %v79_v28 }
  0x1e   :  { %77 = vadd.xlane.f32.xlu0 %v76_v29 }
  0x25   :  { %92 = vadd.xlane.f32.xlu2 %v91_v35  ;;  %89 = vadd.xlane.f32.xlu1 %v88_v36 }
  0x26   :  { %86 = vadd.xlane.f32.xlu0 %v85_v37 }
  0x2e   :  { %95 = vadd.xlane.f32.xlu0 %v94_v39 }
  0x78   :  { %v63_v47 = vpop.xlane.xlu2 %62  ;;  %v57_v48 = vpop.xlane.xlu1 %56 }
  0x79   :  { %v106_v49 = vmul.f32 %v684_v46, %v57_v48  ;;  %v51_v50 = vpop.xlane.xlu0 %50  ;;  %v108_v6 = vmul.f32 %v684_v46, %v63_v47 }
  0x7a   :  { %v104_v51 = vmul.f32 %v684_v46, %v51_v50 }
  0x7b   :  { %v690_v52 = vsub.f32 %v489_v4, %v106_v49 }
  0x7c   :  { %v694_v53 = vsub.f32 %v485_v5, %v104_v51 }
  0x7d   :  { %v138_v54 = vmul.f32 %v690_v52, %v690_v52 }
  0x7e   :  { %v136_v55 = vmul.f32 %v694_v53, %v694_v53 }
  0x7f   :  { %v158_v56 = vsel %vm48_vm0, %v138_v54, 0.0 }
  0x80   :  { %v66_v57 = vpop.xlane.xlu2 %65  ;;  %v60_v58 = vpop.xlane.xlu1 %59  ;;  %159 = vadd.xlane.f32.xlu0 %v158_v56  ;;  %v152_v59 = vsel %vm48_vm0, %v136_v55, 0.0 }
  0x81   :  { %v109_v60 = vmul.f32 %v684_v46, %v66_v57  ;;  %v107_v61 = vmul.f32 %v684_v46, %v60_v58  ;;  %153 = vadd.xlane.f32.xlu1 %v152_v59  ;;  %v54_v62 = vpop.xlane.xlu0 %53 }
  0x82   :  { %v105_v63 = vmul.f32 %v684_v46, %v54_v62 }
  0x83   :  { %v707_v4 = vsub.f32 %v494_v9, %v109_v60  ;;  %v711_v5 = vsub.f32 %v490_v10, %v107_v61  ;;  %v728_v10 = vsub.f32 %v493_v3, %v108_v6 }
  0x84   :  { %v716_v7 = vsub.f32 %v486_v11, %v105_v63 }
  0x85   :  { %v141_v8 = vmul.f32 %v707_v4, %v707_v4  ;;  %v139_v12 = vmul.f32 %v711_v5, %v711_v5  ;;  %v140_v3 = vmul.f32 %v728_v10, %v728_v10 }
  0x86   :  { %v137_v9 = vmul.f32 %v716_v7, %v716_v7 }
  0x87   :  { %v167_v13 = vsel %vm48_vm0, %v141_v8, 0.0  ;;  %v161_v1 = vsel %vm48_vm0, %v139_v12, 0.0 }
  0x88   :  { %v75_v2 = vpop.xlane.xlu2 %74  ;;  %168 = vadd.xlane.f32.xlu0 %v167_v13  ;;  %v155_v11 = vsel %vm48_vm0, %v137_v9, 0.0  ;;  %v72_v14 = vpop.xlane.xlu1 %71 }
  0x89   :  { %v112_v20 = vmul.f32 %v684_v46, %v75_v2  ;;  %162 = vadd.xlane.f32.xlu1 %v161_v1  ;;  %156 = vadd.xlane.f32.xlu2 %v155_v11  ;;  %v69_v21 = vpop.xlane.xlu0 %68  ;;  %v111_v27 = vmul.f32 %v684_v46, %v72_v14 }
  0x8a   :  { %v110_v22 = vmul.f32 %v684_v46, %v69_v21 }
  0x8b   :  { %v736_v28 = vsub.f32 %v501_v17, %v112_v20  ;;  %v748_v35 = vsub.f32 %v498_v18, %v111_v27 }
  0x8c   :  { %v740_v0 = vsub.f32 %v497_v19, %v110_v22  ;;  %v164_v19 = vsel %vm48_vm0, %v140_v3, 0.0 }
  0x8d   :  { %v144_v29 = vmul.f32 %v736_v28, %v736_v28  ;;  %v143_v43 = vmul.f32 %v748_v35, %v748_v35 }
  0x8e   :  { %v142_v36 = vmul.f32 %v740_v0, %v740_v0 }
  0x8f   :  { %v176_v17 = vsel %vm48_vm0, %v144_v29, 0.0  ;;  %v173_v49 = vsel %vm48_vm0, %v143_v43, 0.0 }
  0x90   :  { %v84_v37 = vpop.xlane.xlu2 %83  ;;  %177 = vadd.xlane.f32.xlu0 %v176_v17  ;;  %v170_v39 = vsel %vm48_vm0, %v142_v36, 0.0  ;;  %v81_v40 = vpop.xlane.xlu1 %80 }
  0x91   :  { %v115_v41 = vmul.f32 %v684_v46, %v84_v37  ;;  %165 = vadd.xlane.f32.xlu2 %v164_v19  ;;  %171 = vadd.xlane.f32.xlu1 %v170_v39  ;;  %v78_v42 = vpop.xlane.xlu0 %77  ;;  %v114_v18 = vmul.f32 %v684_v46, %v81_v40 }
  0x92   :  { %v113_v16 = vmul.f32 %v684_v46, %v78_v42 }
  0x93   :  { %v762_v44 = vsub.f32 %v506_v24, %v115_v41  ;;  %v772_v48 = vsub.f32 %v505_v25, %v114_v18 }
  0x94   :  { %v766_v45 = vsub.f32 %v502_v26, %v113_v16 }
  0x95   :  { %v147_v47 = vmul.f32 %v762_v44, %v762_v44  ;;  %v146_v56 = vmul.f32 %v772_v48, %v772_v48 }
  0x96   :  { %v145_v50 = vmul.f32 %v766_v45, %v766_v45 }
  0x97   :  { %v185_v51 = vsel %vm48_vm0, %v147_v47, 0.0  ;;  %v182_v61 = vsel %vm48_vm0, %v146_v56, 0.0 }
  0x98   :  { %v93_v24 = vpop.xlane.xlu2 %92  ;;  %186 = vadd.xlane.f32.xlu0 %v185_v51  ;;  %v179_v15 = vsel %vm48_vm0, %v145_v50, 0.0  ;;  %v90_v26 = vpop.xlane.xlu1 %89 }
  0x99   :  { %v118_v54 = vmul.f32 %v684_v46, %v93_v24  ;;  %174 = vadd.xlane.f32.xlu2 %v173_v49  ;;  %180 = vadd.xlane.f32.xlu1 %v179_v15  ;;  %v87_v55 = vpop.xlane.xlu0 %86  ;;  %v117_v25 = vmul.f32 %v684_v46, %v90_v26 }
  0x9a   :  { %v116_v23 = vmul.f32 %v684_v46, %v87_v55 }
  0x9b   :  { %v786_v57 = vsub.f32 %v513_v32, %v118_v54  ;;  %v796_v60 = vsub.f32 %v510_v33, %v117_v25 }
  0x9c   :  { %v790_v58 = vsub.f32 %v509_v34, %v116_v23 }
  0x9d   :  { %v150_v59 = vmul.f32 %v786_v57, %v786_v57  ;;  %v149_v31 = vmul.f32 %v796_v60, %v796_v60 }
  0x9e   :  { %v148_v62 = vmul.f32 %v790_v58, %v790_v58 }
  0x9f   :  { %v194_v63 = vsel %vm48_vm0, %v150_v59, 0.0  ;;  %v191_v8 = vsel %vm48_vm0, %v149_v31, 0.0 }
  0xa0   :  { %195 = vadd.xlane.f32.xlu0 %v194_v63  ;;  %v188_v32 = vsel %vm48_vm0, %v148_v62, 0.0 }
  0xa1   :  { %183 = vadd.xlane.f32.xlu2 %v182_v61  ;;  %189 = vadd.xlane.f32.xlu1 %v188_v32  ;;  %v96_v34 = vpop.xlane.xlu0 %95  ;;  %v844_v61 = vld [vmem:[%s1105_s1] ss:$0 sm:$0xff] }
  0xa2   :  { %v119_v6 = vmul.f32 %v684_v46, %v96_v34 }
  0xa4   :  { %v808_v33 = vsub.f32 %v514_v38, %v119_v6 }
  0xa6   :  { %v151_v12 = vmul.f32 %v808_v33, %v808_v33 }
  0xa8   :  { %v197_v9 = vsel %vm48_vm0, %v151_v12, 0.0  ;;  %v861_v12 = vld [vmem:[%s1106_s2] ss:$0 sm:$0xff] }
  0xa9   :  { %192 = vadd.xlane.f32.xlu2 %v191_v8  ;;  %198 = vadd.xlane.f32.xlu1 %v197_v9 }
  0xf3   :  { %v160_v13 = vpop.xlane.xlu0 %159 }
  0xf4   :  { %v154_v1 = vpop.xlane.xlu1 %153  ;;  %v202_v2 = vmul.f32 %v160_v13, %v684_v46 }
  0xf5   :  { %v200_v11 = vmul.f32 %v154_v1, %v684_v46 }
  0xf6   :  { %v218_v14 = vadd.f32 1e-05, %v202_v2 }
  0xf7   :  { %v216_v20 = vadd.f32 1e-05, %v200_v11 }
  0xf8   :  { %527 = vrsqrt.f32 %v218_v14  ;;  %vm258_vm4 = vweird.f32 %v218_v14 }
  0xf9   :  { %529 = vrsqrt.f32 %v216_v20  ;;  %vm238_vm6 = vweird.f32 %v216_v20 }
  0xfb   :  { %v169_v30 = vpop.xlane.xlu0 %168 }
  0xfc   :  { %v163_v38 = vpop.xlane.xlu1 %162  ;;  %v157_v21 = vpop.xlane.xlu2 %156  ;;  %v205_v22 = vmul.f32 %v169_v30, %v684_v46 }
  0xfd   :  { %v203_v27 = vmul.f32 %v163_v38, %v684_v46  ;;  %v201_v3 = vmul.f32 %v157_v21, %v684_v46 }
  0xfe   :  { %v528_v29 = vpop.eup %527  ;;  %v819_v36 = vadd.f32 1e-05, %v205_v22 }
  0xff   :  { %v530_v17 = vpop.eup %529  ;;  %v253_v37 = vmul.f32 %v528_v29, %v218_v14  ;;  %v821_v19 = vadd.f32 1e-05, %v203_v27  ;;  %v823_v39 = vadd.f32 1e-05, %v201_v3  ;;  %vm259_vm2 = vweird.f32 %v528_v29 }
 0x100   :  { %v233_v40 = vmul.f32 %v530_v17, %v216_v20  ;;  %531 = vrsqrt.f32 %v819_v36  ;;  %vm239_vm3 = vweird.f32 %v530_v17  ;;  %vm260_vm7 = vmor %vm258_vm4, %vm259_vm2  ;;  %vm288_vm8 = vweird.f32 %v819_v36 }
 0x101   :  { %v254_v41 = vmul.f32 %v528_v29, %v253_v37  ;;  %533 = vrsqrt.f32 %v821_v19  ;;  %vm240_vm9 = vmor %vm238_vm6, %vm239_vm3  ;;  %vm268_vm10 = vweird.f32 %v821_v19  ;;  %vm248_vm14 = vweird.f32 %v823_v39 }
 0x102   :  { %v234_v42 = vmul.f32 %v530_v17, %v233_v40  ;;  %535 = vrsqrt.f32 %v823_v39 }
 0x103   :  { %v255_v16 = vmul.f32 0.5, %v254_v41  ;;  %v178_v18 = vpop.xlane.xlu0 %177 }
 0x104   :  { %v235_v43 = vmul.f32 0.5, %v234_v42  ;;  %v166_v47 = vpop.xlane.xlu2 %165  ;;  %v172_v49 = vpop.xlane.xlu1 %171  ;;  %v208_v15 = vmul.f32 %v178_v18, %v684_v46 }
 0x105   :  { %v256_v50 = vsub.f32 1.5, %v255_v16  ;;  %v204_v51 = vmul.f32 %v166_v47, %v684_v46  ;;  %v206_v24 = vmul.f32 %v172_v49, %v684_v46 }
 0x106   :  { %v831_v26 = vpop.eup %531  ;;  %v236_v54 = vsub.f32 1.5, %v235_v43  ;;  %v856_v8 = vadd.f32 1e-05, %v208_v15 }
 0x107   :  { %v833_v55 = vpop.eup %533  ;;  %v257_v23 = vmul.f32 %v528_v29, %v256_v50  ;;  %v283_v25 = vmul.f32 %v831_v26, %v819_v36  ;;  %v837_v56 = vadd.f32 1e-05, %v204_v51  ;;  %v850_v32 = vadd.f32 1e-05, %v206_v24 }
 0x108   :  { %v839_v59 = vpop.eup %535  ;;  %v237_v62 = vmul.f32 %v530_v17, %v236_v54  ;;  %v263_v63 = vmul.f32 %v833_v55, %v821_v19  ;;  %vm289_vm11 = vweird.f32 %v831_v26  ;;  %vm269_vm12 = vweird.f32 %v833_v55 }
 0x109   :  { %v261_v34 = vsel %vm260_vm7, %v528_v29, %v257_v23  ;;  %v243_v6 = vmul.f32 %v839_v59, %v823_v39  ;;  %v284_v31 = vmul.f32 %v831_v26, %v283_v25  ;;  %537 = vrsqrt.f32 %v837_v56  ;;  %vm290_vm15 = vmor %vm288_vm8, %vm289_vm11 }
 0x10a   :  { %v241_v9 = vsel %vm240_vm9, %v530_v17, %v237_v62  ;;  %v394_v13 = vmul.f32 %v261_v34, %v690_v52  ;;  %v264_v1 = vmul.f32 %v833_v55, %v263_v63  ;;  %539 = vrsqrt.f32 %v850_v32  ;;  %vm894_vm0 = vmor %vm268_vm10, %vm269_vm12 }
 0x10b   :  { %v392_v2 = vmul.f32 %v241_v9, %v694_v53  ;;  %v244_v11 = vmul.f32 %v839_v59, %v243_v6  ;;  %v285_v14 = vmul.f32 0.5, %v284_v31  ;;  %541 = vrsqrt.f32 %v856_v8  ;;  %v187_v36 = vpop.xlane.xlu0 %186 }
 0x10c   :  { %v413_v20 = vmul.f32 %v844_v61, %v394_v13  ;;  %v265_v30 = vmul.f32 0.5, %v264_v1  ;;  %v175_v38 = vpop.xlane.xlu2 %174  ;;  %vm249_vm13 = vweird.f32 %v839_v59  ;;  %v181_v40 = vpop.xlane.xlu1 %180  ;;  %vm278_vm1 = vweird.f32 %v837_v56 }
 0x10d   :  { %v411_v52 = vmul.f32 %v844_v61, %v392_v2  ;;  %v245_v21 = vmul.f32 0.5, %v244_v11  ;;  %v286_v22 = vsub.f32 1.5, %v285_v14  ;;  %v207_v3 = vmul.f32 %v175_v38, %v684_v46  ;;  %vm250_vm2 = vmor %vm248_vm14, %vm249_vm13 }
 0x10e   :  { %v432_v53 = vadd.f32 %v861_v12, %v413_v20  ;;  %v266_v27 = vsub.f32 1.5, %v265_v30  ;;  %vm318_vm3 = vweird.f32 %v856_v8  ;;  %v209_v15 = vmul.f32 %v181_v40, %v684_v46 }
 0x10f   :  { %v430_v29 = vadd.f32 %v861_v12, %v411_v52  ;;  %v246_v17 = vsub.f32 1.5, %v245_v21  ;;  %v287_v37 = vmul.f32 %v831_v26, %v286_v22  ;;  %v880_v41 = vpop.eup %537  ;;  %v888_v18 = vadd.f32 1e-05, %v207_v3 }
 0x110   :  { %v448_v42 = vpack.c.bf16 %v432_v53, %v432_v53  ;;  %v267_v16 = vmul.f32 %v833_v55, %v266_v27  ;;  %v273_v50 = vmul.f32 %v880_v41, %v837_v56  ;;  %v903_v51 = vpop.eup %539  ;;  %v211_v34 = vmul.f32 %v187_v36, %v684_v46 }
 0x111   :  { %v446_v43 = vpack.c.bf16 %v430_v29, %v430_v29  ;;  %v247_v49 = vmul.f32 %v839_v59, %v246_v17  ;;  %v291_v39 = vsel %vm290_vm15, %v831_v26, %v287_v37  ;;  %543 = vrsqrt.f32 %v888_v18  ;;  %v542_v26 = vpop.eup %541 }
 0x112   :  { %465 = vst.msk [vmem:[%s1107_s3 + $0x8] sm:$0xf] %vm462_vm5, %v448_v42  ;;  %v271_v19 = vsel %vm894_vm0, %v833_v55, %v267_v16  ;;  %v397_v24 = vmul.f32 %v291_v39, %v707_v4  ;;  %v274_v23 = vmul.f32 %v880_v41, %v273_v50  ;;  %v293_v4 = vmul.f32 %v903_v51, %v850_v32 }
 0x113   :  { %463 = vst.msk [vmem:[%s1107_s3] sm:$0xf] %vm462_vm5, %v446_v43  ;;  %v395_v54 = vmul.f32 %v271_v19, %v711_v5  ;;  %v251_v55 = vsel %vm250_vm2, %v839_v59, %v247_v49  ;;  %v313_v63 = vmul.f32 %v542_v26, %v856_v8  ;;  %vm279_vm4 = vweird.f32 %v880_v41  ;;  %v196_v56 = vpop.xlane.xlu0 %195 }
 0x114   :  { %v393_v25 = vmul.f32 %v251_v55, %v716_v7  ;;  %v416_v62 = vmul.f32 %v844_v61, %v397_v24  ;;  %v275_v31 = vmul.f32 0.5, %v274_v23  ;;  %v294_v5 = vmul.f32 %v903_v51, %v293_v4  ;;  %v184_v59 = vpop.xlane.xlu2 %183  ;;  %vm280_vm7 = vmor %vm278_vm1, %vm279_vm4  ;;  %v190_v37 = vpop.xlane.xlu1 %189 }
 0x115   :  { %v414_v6 = vmul.f32 %v844_v61, %v395_v54  ;;  %vm299_vm6 = vweird.f32 %v903_v51  ;;  %v314_v7 = vmul.f32 %v542_v26, %v313_v63  ;;  %v938_v14 = vadd.f32 1e-05, %v209_v15 }
 0x116   :  { %v412_v9 = vmul.f32 %v844_v61, %v393_v25  ;;  %v435_v13 = vadd.f32 %v861_v12, %v416_v62  ;;  %v276_v2 = vsub.f32 1.5, %v275_v31  ;;  %v295_v11 = vmul.f32 0.5, %v294_v5 }
 0x117   :  { %v433_v1 = vadd.f32 %v861_v12, %v414_v6  ;;  %v940_v20 = vpop.eup %543  ;;  %v315_v52 = vmul.f32 0.5, %v314_v7  ;;  %v943_v21 = vadd.f32 1e-05, %v211_v34  ;;  %vm319_vm8 = vweird.f32 %v542_v26 }
 0x118   :  { %v431_v30 = vadd.f32 %v861_v12, %v412_v9  ;;  %v451_v38 = vpack.c.bf16 %v435_v13, %v435_v13  ;;  %v277_v53 = vmul.f32 %v880_v41, %v276_v2  ;;  %v296_v27 = vsub.f32 1.5, %v295_v11  ;;  %vm320_vm11 = vmor %vm318_vm3, %vm319_vm8 }
 0x119   :  { %v449_v22 = vpack.c.bf16 %v433_v1, %v433_v1  ;;  %v303_v3 = vmul.f32 %v940_v20, %v888_v18  ;;  %v316_v17 = vsub.f32 1.5, %v315_v52  ;;  %545 = vrsqrt.f32 %v938_v14 }
 0x11a   :  { %v447_v29 = vpack.c.bf16 %v431_v30, %v431_v30  ;;  %468 = vst.msk [vmem:[%s1107_s3 + $0x14] sm:$0xf] %vm462_vm5, %v451_v38  ;;  %v281_v40 = vsel %vm280_vm7, %v880_v41, %v277_v53  ;;  %v297_v42 = vmul.f32 %v903_v51, %v296_v27  ;;  %vm298_vm9 = vweird.f32 %v850_v32 }
 0x11b   :  { %466 = vst.msk [vmem:[%s1107_s3 + $0xc] sm:$0xf] %vm462_vm5, %v449_v22  ;;  %v304_v16 = vmul.f32 %v940_v20, %v303_v3  ;;  %v396_v43 = vmul.f32 %v281_v40, %v728_v10  ;;  %vm300_vm10 = vmor %vm298_vm9, %vm299_vm6  ;;  %v317_v47 = vmul.f32 %v542_v26, %v316_v17  ;;  %547 = vrsqrt.f32 %v943_v21 }
 0x11c   :  { %464 = vst.msk [vmem:[%s1107_s3 + $0x4] sm:$0xf] %vm462_vm5, %v447_v29  ;;  %v301_v41 = vsel %vm300_vm10, %v903_v51, %v297_v42  ;;  %v210_v49 = vmul.f32 %v184_v59, %v684_v46  ;;  %v212_v39 = vmul.f32 %v190_v37, %v684_v46  ;;  %v214_v19 = vmul.f32 %v196_v56, %v684_v46  ;;  %v193_v8 = vpop.xlane.xlu2 %192  ;;  %v199_v7 = vpop.xlane.xlu1 %198 }
 0x11d   :  { %v305_v32 = vmul.f32 0.5, %v304_v16  ;;  %v415_v50 = vmul.f32 %v844_v61, %v396_v43  ;;  %v398_v10 = vmul.f32 %v301_v41, %v740_v0  ;;  %v321_v36 = vsel %vm320_vm11, %v542_v26, %v317_v47 }
 0x11e   :  { %v400_v24 = vmul.f32 %v321_v36, %v736_v28  ;;  %vm309_vm12 = vweird.f32 %v940_v20  ;;  %v984_v51 = vadd.f32 1e-05, %v210_v49  ;;  %vm308_vm13 = vweird.f32 %v888_v18 }
 0x11f   :  { %v306_v15 = vsub.f32 1.5, %v305_v32  ;;  %v546_v54 = vpop.eup %545  ;;  %v434_v55 = vadd.f32 %v861_v12, %v415_v50  ;;  %v417_v23 = vmul.f32 %v844_v61, %v398_v10  ;;  %v989_v4 = vadd.f32 1e-05, %v212_v39  ;;  %vm310_vm14 = vmor %vm308_vm13, %vm309_vm12 }
 0x120   :  { %v419_v0 = vmul.f32 %v844_v61, %v400_v24  ;;  %v323_v28 = vmul.f32 %v546_v54, %v938_v14  ;;  %v994_v25 = vadd.f32 1e-05, %v214_v19  ;;  %549 = vrsqrt.f32 %v984_v51 }
 0x121   :  { %v307_v26 = vmul.f32 %v940_v20, %v306_v15  ;;  %v548_v62 = vpop.eup %547  ;;  %v450_v63 = vpack.c.bf16 %v434_v55, %v434_v55  ;;  %v436_v34 = vadd.f32 %v861_v12, %v417_v23  ;;  %v213_v18 = vmul.f32 %v193_v8, %v684_v46 }
 0x122   :  { %v438_v6 = vadd.f32 %v861_v12, %v419_v0  ;;  %v324_v5 = vmul.f32 %v546_v54, %v323_v28  ;;  %v343_v59 = vmul.f32 %v548_v62, %v943_v21  ;;  %551 = vrsqrt.f32 %v989_v4 }
 0x123   :  { %v311_v31 = vsel %vm310_vm14, %v940_v20, %v307_v26  ;;  %467 = vst.msk [vmem:[%s1107_s3 + $0x10] sm:$0xf] %vm462_vm5, %v450_v63  ;;  %v452_v9 = vpack.c.bf16 %v436_v34, %v436_v34  ;;  %553 = vrsqrt.f32 %v994_v25  ;;  %v1016_v30 = vadd.f32 1e-05, %v213_v18 }
 0x124   :  { %v399_v13 = vmul.f32 %v311_v31, %v748_v35  ;;  %v454_v1 = vpack.c.bf16 %v438_v6, %v438_v6  ;;  %v325_v2 = vmul.f32 0.5, %v324_v5  ;;  %v344_v11 = vmul.f32 %v548_v62, %v343_v59 }
 0x125   :  { %469 = vst.msk [vmem:[%s1107_s3 + $0x18] sm:$0xf] %vm462_vm5, %v452_v9  ;;  %vm329_vm15 = vweird.f32 %v546_v54  ;;  %v215_v52 = vmul.f32 %v199_v7, %v684_v46  ;;  %vm328_vm0 = vweird.f32 %v938_v14  ;;  %vm348_vm1 = vweird.f32 %v943_v21 }
 0x126   :  { %v418_v20 = vmul.f32 %v844_v61, %v399_v13  ;;  %471 = vst.msk [vmem:[%s1107_s3 + $0x20] sm:$0xf] %vm462_vm5, %v454_v1  ;;  %v326_v35 = vsub.f32 1.5, %v325_v2  ;;  %v345_v38 = vmul.f32 0.5, %v344_v11  ;;  %v550_v22 = vpop.eup %549  ;;  %555 = vrsqrt.f32 %v1016_v30  ;;  %vm330_vm3 = vmor %vm328_vm0, %vm329_vm15 }
 0x127   :  { %vm349_vm2 = vweird.f32 %v548_v62  ;;  %v333_v29 = vmul.f32 %v550_v22, %v984_v51  ;;  %v1028_v40 = vadd.f32 1e-05, %v215_v52  ;;  %vm338_vm6 = vweird.f32 %v984_v51 }
 0x128   :  { %v437_v53 = vadd.f32 %v861_v12, %v418_v20  ;;  %v327_v27 = vmul.f32 %v546_v54, %v326_v35  ;;  %v346_v3 = vsub.f32 1.5, %v345_v38  ;;  %v552_v17 = vpop.eup %551  ;;  %vm350_vm4 = vmor %vm348_vm1, %vm349_vm2  ;;  %vm339_vm7 = vweird.f32 %v550_v22 }
 0x129   :  { %v334_v16 = vmul.f32 %v550_v22, %v333_v29  ;;  %v353_v56 = vmul.f32 %v552_v17, %v989_v4  ;;  %v554_v14 = vpop.eup %553  ;;  %557 = vrsqrt.f32 %v1028_v40  ;;  %vm358_vm8 = vweird.f32 %v989_v4  ;;  %vm340_vm10 = vmor %vm338_vm6, %vm339_vm7 }
 0x12a   :  { %v453_v37 = vpack.c.bf16 %v437_v53, %v437_v53  ;;  %v331_v46 = vsel %vm330_vm3, %v546_v54, %v327_v27  ;;  %v347_v42 = vmul.f32 %v548_v62, %v346_v3  ;;  %v373_v49 = vmul.f32 %v554_v14, %v994_v25 }
 0x12b   :  { %v401_v43 = vmul.f32 %v331_v46, %v766_v45  ;;  %v335_v41 = vmul.f32 0.5, %v334_v16  ;;  %v354_v32 = vmul.f32 %v552_v17, %v353_v56  ;;  %vm359_vm9 = vweird.f32 %v552_v17 }
 0x12c   :  { %470 = vst.msk [vmem:[%s1107_s3 + $0x1c] sm:$0xf] %vm462_vm5, %v453_v37  ;;  %v351_v47 = vsel %vm350_vm4, %v548_v62, %v347_v42  ;;  %v556_v39 = vpop.eup %555  ;;  %v374_v19 = vmul.f32 %v554_v14, %v373_v49  ;;  %vm378_vm11 = vweird.f32 %v994_v25  ;;  %vm379_vm12 = vweird.f32 %v554_v14  ;;  %vm360_vm13 = vmor %vm358_vm8, %vm359_vm9 }
 0x12d   :  { %v420_v50 = vmul.f32 %v844_v61, %v401_v43  ;;  %v403_v10 = vmul.f32 %v351_v47, %v762_v44  ;;  %v336_v36 = vsub.f32 1.5, %v335_v41  ;;  %v355_v45 = vmul.f32 0.5, %v354_v32  ;;  %vm380_vm15 = vmor %vm378_vm11, %vm379_vm12 }
 0x12e   :  { %v363_v21 = vmul.f32 %v556_v39, %v1016_v30  ;;  %v375_v55 = vmul.f32 0.5, %v374_v19  ;;  %vm369_vm14 = vweird.f32 %v556_v39  ;;  %vm368_vm0 = vweird.f32 %v1016_v30 }
 0x12f   :  { %v439_v24 = vadd.f32 %v861_v12, %v420_v50  ;;  %v422_v15 = vmul.f32 %v844_v61, %v403_v10  ;;  %v337_v8 = vmul.f32 %v550_v22, %v336_v36  ;;  %v356_v54 = vsub.f32 1.5, %v355_v45  ;;  %v558_v44 = vpop.eup %557  ;;  %vm370_vm1 = vmor %vm368_vm0, %vm369_vm14 }
 0x130   :  { %v364_v23 = vmul.f32 %v556_v39, %v363_v21  ;;  %v376_v63 = vsub.f32 1.5, %v375_v55  ;;  %v383_v51 = vmul.f32 %v558_v44, %v1028_v40  ;;  %vm389_vm2 = vweird.f32 %v558_v44 }
 0x131   :  { %v455_v0 = vpack.c.bf16 %v439_v24, %v439_v24  ;;  %v441_v26 = vadd.f32 %v861_v12, %v422_v15  ;;  %v341_v28 = vsel %vm340_vm10, %v550_v22, %v337_v8  ;;  %v357_v62 = vmul.f32 %v552_v17, %v356_v54 }
 0x132   :  { %v365_v34 = vmul.f32 0.5, %v364_v23  ;;  %v402_v6 = vmul.f32 %v341_v28, %v772_v48  ;;  %v377_v5 = vmul.f32 %v554_v14, %v376_v63  ;;  %v384_v48 = vmul.f32 %v558_v44, %v383_v51 }
 0x133   :  { %472 = vst.msk [vmem:[%s1107_s3 + $0x24] sm:$0xf] %vm462_vm5, %v455_v0  ;;  %v457_v18 = vpack.c.bf16 %v441_v26, %v441_v26  ;;  %v361_v31 = vsel %vm360_vm13, %v552_v17, %v357_v62  ;;  %vm388_vm3 = vweird.f32 %v1028_v40 }
 0x134   :  { %v366_v59 = vsub.f32 1.5, %v365_v34  ;;  %v421_v9 = vmul.f32 %v844_v61, %v402_v6  ;;  %v404_v13 = vmul.f32 %v361_v31, %v790_v58  ;;  %v381_v4 = vsel %vm380_vm15, %v554_v14, %v377_v5  ;;  %vm390_vm4 = vmor %vm388_vm3, %vm389_vm2 }
 0x135   :  { %474 = vst.msk [vmem:[%s1107_s3 + $0x2c] sm:$0xf] %vm462_vm5, %v457_v18  ;;  %v406_v11 = vmul.f32 %v381_v4, %v786_v57  ;;  %v385_v20 = vmul.f32 0.5, %v384_v48 }
 0x136   :  { %v367_v7 = vmul.f32 %v556_v39, %v366_v59  ;;  %v440_v1 = vadd.f32 %v861_v12, %v421_v9  ;;  %v423_v2 = vmul.f32 %v844_v61, %v404_v13 }
 0x137   :  { %v425_v25 = vmul.f32 %v844_v61, %v406_v11  ;;  %v386_v22 = vsub.f32 1.5, %v385_v20 }
 0x138   :  { %v371_v35 = vsel %vm370_vm1, %v556_v39, %v367_v7  ;;  %v456_v38 = vpack.c.bf16 %v440_v1, %v440_v1  ;;  %v442_v58 = vadd.f32 %v861_v12, %v423_v2 }
 0x139   :  { %v405_v52 = vmul.f32 %v371_v35, %v796_v60  ;;  %v444_v57 = vadd.f32 %v861_v12, %v425_v25  ;;  %v387_v27 = vmul.f32 %v558_v44, %v386_v22 }
 0x13a   :  { %473 = vst.msk [vmem:[%s1107_s3 + $0x28] sm:$0xf] %vm462_vm5, %v456_v38  ;;  %v458_v30 = vpack.c.bf16 %v442_v58, %v442_v58 }
 0x13b   :  { %v424_v53 = vmul.f32 %v844_v61, %v405_v52  ;;  %v460_v60 = vpack.c.bf16 %v444_v57, %v444_v57  ;;  %v391_v29 = vsel %vm390_vm4, %v558_v44, %v387_v27 }
 0x13c   :  { %475 = vst.msk [vmem:[%s1107_s3 + $0x30] sm:$0xf] %vm462_vm5, %v458_v30  ;;  %v407_v37 = vmul.f32 %v391_v29, %v808_v33 }
 0x13d   :  { %v443_v3 = vadd.f32 %v861_v12, %v424_v53  ;;  %477 = vst.msk [vmem:[%s1107_s3 + $0x38] sm:$0xf] %vm462_vm5, %v460_v60 }
 0x13e   :  { %v426_v40 = vmul.f32 %v844_v61, %v407_v37 }
 0x13f   :  { %v459_v17 = vpack.c.bf16 %v443_v3, %v443_v3 }
 0x140   :  { %v445_v46 = vadd.f32 %v861_v12, %v426_v40 }
 0x141   :  { %476 = vst.msk [vmem:[%s1107_s3 + $0x34] sm:$0xf] %vm462_vm5, %v459_v17 }
 0x142   :  { %v461_v42 = vpack.c.bf16 %v445_v46, %v445_v46 }
 0x144   :  { %478 = vst.msk [vmem:[%s1107_s3 + $0x3c] sm:$0xf] %vm462_vm5, %v461_v42 }

// kernel: _lambda_.16
= control target key start
LH: loop header
LB: loop body
LE: loop exit
PB: predicated region body
PF: predicated region fallthrough
CT: control target
= control target key end

     0   :  { %vm83_vm0 = vcmask 130048   ;;  %vm173_vm1 = vcmask 257024   ;;  %s373_s1 = inlined_call_operand.vmem [shape: bf16[16,32], index: 1, kind: input, shape index: {}]   ;;  %s374_s0 = inlined_call_operand.vmem [shape: bf16[128,16], index: 0, kind: input, shape index: {}]   ;;  %s375_s2 = inlined_call_operand.vmem [shape: f32[1,32], index: 2, kind: input, shape index: {}]   ;;  %s376_s3 = inlined_call_operand.vmem [shape: bf16[128,32], index: 3, kind: output, shape index: {}]  }
   0x1   :  { %v246_v0 = vld [vmem:[%s373_s1] sm:$0xff]  ;;  %v240_v2 = vld [vmem:[%s374_s0 + $0x10] sm:$0xff]  ;;  %v239_v5 = vld [vmem:[%s374_s0 + $0x8] sm:$0xff] }
   0x2   :  { %v238_v1 = vld [vmem:[%s374_s0] sm:$0xff]  ;;  %115 = vmatpush.bf16.msra.mxu0 %v246_v0  ;;  %247 = vmatpush.bf16.msra.mxu1 %v246_v0  ;;  %v244_v4 = vld [vmem:[%s374_s0 + $0x30] sm:$0xff]  ;;  %v241_v6 = vld [vmem:[%s374_s0 + $0x18] sm:$0xff] }
   0x3   :  { %v242_v3 = vld [vmem:[%s374_s0 + $0x20] sm:$0xff]  ;;  %248 = vmatpush.bf16.msra.mxu2 %v246_v0  ;;  %249 = vmatpush.bf16.msra.mxu3 %v246_v0  ;;  %v243_v7 = vld [vmem:[%s374_s0 + $0x28] sm:$0xff]  ;;  %v245_v8 = vld [vmem:[%s374_s0 + $0x38] sm:$0xff] }
   0x4   :  { %v250_v9 = vld [vmem:[%s375_s2] ss:$0 sm:$0xff] }
   0x5   :  { %230 = vmatmul.msk.bf16.vlgmr.msra.gmra.mxu0 %vm83_vm0, %v238_v1  ;;  %232 = vmatmul.msk.bf16.vlgmr.msra.gmra.mxu1 %vm83_vm0, %v240_v2 }
   0x6   :  { %234 = vmatmul.msk.bf16.vlgmr.msra.gmra.mxu2 %vm83_vm0, %v242_v3  ;;  %236 = vmatmul.msk.bf16.vlgmr.msra.gmra.mxu3 %vm83_vm0, %v244_v4 }
  0x15   :  { %231 = vmatmul.msk.bf16.gmra.mxu0 %vm83_vm0, %v239_v5  ;;  %233 = vmatmul.msk.bf16.gmra.mxu1 %vm83_vm0, %v241_v6 }
  0x16   :  { %235 = vmatmul.msk.bf16.gmra.mxu2 %vm83_vm0, %v243_v7  ;;  %237 = vmatmul.msk.bf16.gmra.mxu3 %vm83_vm0, %v245_v8 }
  0x82   :  { %v117_v10 = vpop.f32.mrf.mxu0  ;;  %v127_v11 = vpop.f32.mrf.mxu1 }
  0x83   :  { %v118_v12 = vadd.f32 %v250_v9, %v117_v10  ;;  %v128_v13 = vadd.f32 %v250_v9, %v127_v11 }
  0x85   :  { %v157_v14 = vpack.c.bf16 %v118_v12, %v118_v12  ;;  %v161_v15 = vpack.c.bf16 %v128_v13, %v128_v13 }
  0x87   :  { %174 = vst.msk [vmem:[%s376_s3] sm:$0xf] %vm173_vm1, %v157_v14 }
  0x88   :  { %178 = vst.msk [vmem:[%s376_s3 + $0x10] sm:$0xf] %vm173_vm1, %v161_v15 }
  0x89   :  { %v137_v16 = vpop.f32.mrf.mxu2  ;;  %v147_v17 = vpop.f32.mrf.mxu3 }
  0x8a   :  { %v138_v18 = vadd.f32 %v250_v9, %v137_v16  ;;  %v148_v19 = vadd.f32 %v250_v9, %v147_v17  ;;  %v119_v20 = vpop.f32.mrf.mxu0  ;;  %v129_v21 = vpop.f32.mrf.mxu1 }
  0x8b   :  { %v120_v22 = vadd.f32 %v250_v9, %v119_v20  ;;  %v130_v23 = vadd.f32 %v250_v9, %v129_v21 }
  0x8c   :  { %v165_v24 = vpack.c.bf16 %v138_v18, %v138_v18  ;;  %v169_v25 = vpack.c.bf16 %v148_v19, %v148_v19 }
  0x8d   :  { %v158_v26 = vpack.c.bf16 %v120_v22, %v120_v22  ;;  %v162_v27 = vpack.c.bf16 %v130_v23, %v130_v23 }
  0x8e   :  { %182 = vst.msk [vmem:[%s376_s3 + $0x20] sm:$0xf] %vm173_vm1, %v165_v24 }
  0x8f   :  { %186 = vst.msk [vmem:[%s376_s3 + $0x30] sm:$0xf] %vm173_vm1, %v169_v25 }
  0x90   :  { %175 = vst.msk [vmem:[%s376_s3 + $0x4] sm:$0xf] %vm173_vm1, %v158_v26 }
  0x91   :  { %179 = vst.msk [vmem:[%s376_s3 + $0x14] sm:$0xf] %vm173_vm1, %v162_v27  ;;  %v139_v28 = vpop.f32.mrf.mxu2  ;;  %v149_v29 = vpop.f32.mrf.mxu3 }
  0x92   :  { %v140_v30 = vadd.f32 %v250_v9, %v139_v28  ;;  %v150_v31 = vadd.f32 %v250_v9, %v149_v29  ;;  %v122_v32 = vpop.f32.mrf.mxu0  ;;  %v132_v33 = vpop.f32.mrf.mxu1 }
  0x93   :  { %v123_v34 = vadd.f32 %v250_v9, %v122_v32  ;;  %v133_v35 = vadd.f32 %v250_v9, %v132_v33 }
  0x94   :  { %v166_v36 = vpack.c.bf16 %v140_v30, %v140_v30  ;;  %v170_v37 = vpack.c.bf16 %v150_v31, %v150_v31 }
  0x95   :  { %v159_v38 = vpack.c.bf16 %v123_v34, %v123_v34  ;;  %v163_v39 = vpack.c.bf16 %v133_v35, %v133_v35 }
  0x96   :  { %183 = vst.msk [vmem:[%s376_s3 + $0x24] sm:$0xf] %vm173_vm1, %v166_v36 }
  0x97   :  { %187 = vst.msk [vmem:[%s376_s3 + $0x34] sm:$0xf] %vm173_vm1, %v170_v37 }
  0x98   :  { %176 = vst.msk [vmem:[%s376_s3 + $0x8] sm:$0xf] %vm173_vm1, %v159_v38 }
  0x99   :  { %180 = vst.msk [vmem:[%s376_s3 + $0x18] sm:$0xf] %vm173_vm1, %v163_v39  ;;  %v142_v40 = vpop.f32.mrf.mxu2  ;;  %v152_v41 = vpop.f32.mrf.mxu3 }
  0x9a   :  { %v143_v42 = vadd.f32 %v250_v9, %v142_v40  ;;  %v153_v43 = vadd.f32 %v250_v9, %v152_v41  ;;  %v124_v44 = vpop.f32.mrf.mxu0  ;;  %v134_v45 = vpop.f32.mrf.mxu1 }
  0x9b   :  { %v125_v46 = vadd.f32 %v250_v9, %v124_v44  ;;  %v135_v47 = vadd.f32 %v250_v9, %v134_v45 }
  0x9c   :  { %v167_v48 = vpack.c.bf16 %v143_v42, %v143_v42  ;;  %v171_v49 = vpack.c.bf16 %v153_v43, %v153_v43 }
  0x9d   :  { %v160_v50 = vpack.c.bf16 %v125_v46, %v125_v46  ;;  %v164_v51 = vpack.c.bf16 %v135_v47, %v135_v47 }
  0x9e   :  { %184 = vst.msk [vmem:[%s376_s3 + $0x28] sm:$0xf] %vm173_vm1, %v167_v48 }
  0x9f   :  { %188 = vst.msk [vmem:[%s376_s3 + $0x38] sm:$0xf] %vm173_vm1, %v171_v49 }
  0xa0   :  { %177 = vst.msk [vmem:[%s376_s3 + $0xc] sm:$0xf] %vm173_vm1, %v160_v50 }
  0xa1   :  { %181 = vst.msk [vmem:[%s376_s3 + $0x1c] sm:$0xf] %vm173_vm1, %v164_v51  ;;  %v144_v52 = vpop.f32.mrf.mxu2  ;;  %v154_v53 = vpop.f32.mrf.mxu3 }
  0xa2   :  { %v145_v54 = vadd.f32 %v250_v9, %v144_v52  ;;  %v155_v55 = vadd.f32 %v250_v9, %v154_v53 }
  0xa4   :  { %v168_v56 = vpack.c.bf16 %v145_v54, %v145_v54  ;;  %v172_v57 = vpack.c.bf16 %v155_v55, %v155_v55 }
  0xa6   :  { %185 = vst.msk [vmem:[%s376_s3 + $0x2c] sm:$0xf] %vm173_vm1, %v168_v56 }
  0xa7   :  { %189 = vst.msk [vmem:[%s376_s3 + $0x3c] sm:$0xf] %vm173_vm1, %v172_v57 }

// kernel: _lambda_.18
= control target key start
LH: loop header
LB: loop body
LE: loop exit
PB: predicated region body
PF: predicated region fallthrough
CT: control target
= control target key end

     0   :  { %vm55_vm0 = vcmask 261120   ;;  %v692_v40 = vmov 32.0   ;;  %s1373_s0 = inlined_call_operand.vmem [shape: bf16[128,32], index: 0, kind: input, shape index: {}]   ;;  %s1374_s1 = inlined_call_operand.vmem [shape: f32[1,32], index: 1, kind: input, shape index: {}]   ;;  %s1375_s2 = inlined_call_operand.vmem [shape: f32[1,32], index: 2, kind: input, shape index: {}]   ;;  %s1376_s4 = inlined_call_operand.vmem [shape: f32[1,96], index: 4, kind: input, shape index: {}]   ;;  %s1377_s3 = inlined_call_operand.vmem [shape: bf16[32,96], index: 3, kind: input, shape index: {}]   ;;  %s1378_s5 = inlined_call_operand.vmem [shape: bf16[128,96], index: 5, kind: output, shape index: {}]  }
   0x1   :  { %v726_v0 = vld [vmem:[%s1373_s0 + $0x30] sm:$0xff]   ;;  %v731_v1 = vld [vmem:[%s1373_s0 + $0x20] sm:$0xff]   ;;  %v770_v16 = vld [vmem:[%s1373_s0 + $0x28] sm:$0xff]   ;;  %658 = vrcp.f32 %v692_v40 }
   0x2   :  { %v736_v2 = vld [vmem:[%s1373_s0] sm:$0xff]   ;;  %v635_v3 = vunpack.c.l.bf16 %v726_v0  ;;  %v627_v4 = vunpack.c.l.bf16 %v731_v1  ;;  %v636_v9 = vunpack.c.h.bf16 %v726_v0  ;;  %v628_v10 = vunpack.c.h.bf16 %v731_v1  ;;  %v765_v15 = vld [vmem:[%s1373_s0 + $0x10] sm:$0xff]   ;;  %v787_v23 = vld [vmem:[%s1373_s0 + $0x38] sm:$0xff]  }
   0x3   :  { %v611_v5 = vunpack.c.l.bf16 %v736_v2  ;;  %v612_v11 = vunpack.c.h.bf16 %v736_v2  ;;  %v619_v17 = vunpack.c.l.bf16 %v765_v15  ;;  %v620_v18 = vunpack.c.h.bf16 %v765_v15  ;;  %v804_v30 = vld [vmem:[%s1373_s0 + $0x8] sm:$0xff]   ;;  %v809_v31 = vld [vmem:[%s1373_s0 + $0x18] sm:$0xff]  }
   0x4   :  { %v92_v6 = vsel %vm55_vm0, %v635_v3, 0.0  ;;  %v80_v7 = vsel %vm55_vm0, %v627_v4, 0.0  ;;  %v95_v12 = vsel %vm55_vm0, %v636_v9, 0.0  ;;  %v83_v13 = vsel %vm55_vm0, %v628_v10, 0.0 }
   0x5   :  { %v56_v8 = vsel %vm55_vm0, %v611_v5, 0.0  ;;  %93 = vadd.xlane.f32.xlu1 %v92_v6  ;;  %81 = vadd.xlane.f32.xlu0 %v80_v7  ;;  %v59_v14 = vsel %vm55_vm0, %v612_v11, 0.0  ;;  %v631_v19 = vunpack.c.l.bf16 %v770_v16  ;;  %v68_v20 = vsel %vm55_vm0, %v619_v17, 0.0 }
   0x6   :  { %57 = vadd.xlane.f32.xlu2 %v56_v8  ;;  %v71_v21 = vsel %vm55_vm0, %v620_v18, 0.0  ;;  %v632_v24 = vunpack.c.h.bf16 %v770_v16  ;;  %v639_v25 = vunpack.c.l.bf16 %v787_v23  ;;  %v640_v26 = vunpack.c.h.bf16 %v787_v23 }
   0x7   :  { %v86_v22 = vsel %vm55_vm0, %v631_v19, 0.0  ;;  %v615_v32 = vunpack.c.l.bf16 %v804_v30  ;;  %v616_v33 = vunpack.c.h.bf16 %v804_v30  ;;  %v623_v34 = vunpack.c.l.bf16 %v809_v31  ;;  %v659_v41 = vpop.eup %658 }
   0x8   :  { %v89_v27 = vsel %vm55_vm0, %v632_v24, 0.0  ;;  %v98_v28 = vsel %vm55_vm0, %v639_v25, 0.0  ;;  %v101_v29 = vsel %vm55_vm0, %v640_v26, 0.0  ;;  %v624_v38 = vunpack.c.h.bf16 %v809_v31  ;;  %v608_v31 = vld [vmem:[%s1377_s3 + $0x8] sm:$0xff] }
   0x9   :  { %v62_v35 = vsel %vm55_vm0, %v615_v32, 0.0  ;;  %v65_v36 = vsel %vm55_vm0, %v616_v33, 0.0  ;;  %v74_v37 = vsel %vm55_vm0, %v623_v34, 0.0  ;;  %v105_v42 = vmul.f32 32.0, %v659_v41  ;;  %649 = vmatpush.bf16.msra.mxu2 %v608_v31  ;;  %650 = vmatpush.bf16.msra.mxu3 %v608_v31 }
   0xa   :  { %v77_v39 = vsel %vm55_vm0, %v624_v38, 0.0  ;;  %vm109_vm1 = vweird.f32 %v659_v41  ;;  %511 = vmatpush.bf16.msra.mxu0 %v608_v31  ;;  %648 = vmatpush.bf16.msra.mxu1 %v608_v31 }
   0xb   :  { %v106_v43 = vsub.f32 1.0, %v105_v42 }
   0xd   :  { %96 = vadd.xlane.f32.xlu1 %v95_v12  ;;  %84 = vadd.xlane.f32.xlu0 %v83_v13  ;;  %v107_v44 = vmul.f32 %v659_v41, %v106_v43 }
   0xe   :  { %60 = vadd.xlane.f32.xlu2 %v59_v14 }
   0xf   :  { %v108_v45 = vadd.f32 %v659_v41, %v107_v44 }
  0x11   :  { %v827_v46 = vsel %vm109_vm1, %v659_v41, %v108_v45 }
  0x15   :  { %69 = vadd.xlane.f32.xlu0 %v68_v20  ;;  %72 = vadd.xlane.f32.xlu1 %v71_v21 }
  0x16   :  { %87 = vadd.xlane.f32.xlu2 %v86_v22 }
  0x1d   :  { %90 = vadd.xlane.f32.xlu0 %v89_v27  ;;  %99 = vadd.xlane.f32.xlu1 %v98_v28 }
  0x1e   :  { %102 = vadd.xlane.f32.xlu2 %v101_v29 }
  0x25   :  { %63 = vadd.xlane.f32.xlu0 %v62_v35  ;;  %66 = vadd.xlane.f32.xlu1 %v65_v36 }
  0x26   :  { %75 = vadd.xlane.f32.xlu2 %v74_v37 }
  0x2d   :  { %78 = vadd.xlane.f32.xlu0 %v77_v39 }
  0x78   :  { %v94_v47 = vpop.xlane.xlu1 %93  ;;  %v82_v48 = vpop.xlane.xlu0 %81 }
  0x79   :  { %v123_v49 = vmul.f32 %v827_v46, %v94_v47  ;;  %v119_v50 = vmul.f32 %v827_v46, %v82_v48  ;;  %v58_v51 = vpop.xlane.xlu2 %57 }
  0x7b   :  { %v833_v52 = vsub.f32 %v635_v3, %v123_v49  ;;  %v837_v53 = vsub.f32 %v627_v4, %v119_v50  ;;  %v111_v3 = vmul.f32 %v827_v46, %v58_v51 }
  0x7d   :  { %v151_v54 = vmul.f32 %v837_v53, %v837_v53  ;;  %v155_v55 = vmul.f32 %v833_v52, %v833_v52  ;;  %v869_v0 = vsub.f32 %v611_v5, %v111_v3 }
  0x7f   :  { %v183_v56 = vsel %vm55_vm0, %v151_v54, 0.0  ;;  %v195_v57 = vsel %vm55_vm0, %v155_v55, 0.0  ;;  %v143_v27 = vmul.f32 %v869_v0, %v869_v0 }
  0x80   :  { %v97_v58 = vpop.xlane.xlu1 %96  ;;  %v85_v59 = vpop.xlane.xlu0 %84  ;;  %184 = vadd.xlane.f32.xlu1 %v183_v56  ;;  %196 = vadd.xlane.f32.xlu0 %v195_v57 }
  0x81   :  { %v124_v60 = vmul.f32 %v827_v46, %v97_v58  ;;  %v120_v61 = vmul.f32 %v827_v46, %v85_v59  ;;  %v61_v62 = vpop.xlane.xlu2 %60  ;;  %v159_v37 = vsel %vm55_vm0, %v143_v27, 0.0 }
  0x82   :  { %v112_v63 = vmul.f32 %v827_v46, %v61_v62 }
  0x83   :  { %v851_v4 = vsub.f32 %v636_v9, %v124_v60  ;;  %v855_v6 = vsub.f32 %v628_v10, %v120_v61 }
  0x84   :  { %v859_v7 = vsub.f32 %v612_v11, %v112_v63 }
  0x85   :  { %v156_v8 = vmul.f32 %v851_v4, %v851_v4  ;;  %v152_v12 = vmul.f32 %v855_v6, %v855_v6 }
  0x86   :  { %v144_v13 = vmul.f32 %v859_v7, %v859_v7 }
  0x87   :  { %v198_v1 = vsel %vm55_vm0, %v156_v8, 0.0  ;;  %v186_v9 = vsel %vm55_vm0, %v152_v12, 0.0 }
  0x88   :  { %v70_v10 = vpop.xlane.xlu0 %69  ;;  %199 = vadd.xlane.f32.xlu1 %v198_v1  ;;  %187 = vadd.xlane.f32.xlu2 %v186_v9  ;;  %v162_v11 = vsel %vm55_vm0, %v144_v13, 0.0  ;;  %v73_v14 = vpop.xlane.xlu1 %72 }
  0x89   :  { %v115_v20 = vmul.f32 %v827_v46, %v70_v10  ;;  %163 = vadd.xlane.f32.xlu0 %v162_v11  ;;  %v88_v21 = vpop.xlane.xlu2 %87  ;;  %v116_v22 = vmul.f32 %v827_v46, %v73_v14 }
  0x8a   :  { %v121_v2 = vmul.f32 %v827_v46, %v88_v21 }
  0x8b   :  { %v879_v5 = vsub.f32 %v619_v17, %v115_v20  ;;  %v889_v29 = vsub.f32 %v620_v18, %v116_v22 }
  0x8c   :  { %v885_v28 = vsub.f32 %v631_v19, %v121_v2 }
  0x8d   :  { %v147_v35 = vmul.f32 %v879_v5, %v879_v5  ;;  %v148_v42 = vmul.f32 %v889_v29, %v889_v29 }
  0x8e   :  { %v153_v36 = vmul.f32 %v885_v28, %v885_v28 }
  0x8f   :  { %v171_v17 = vsel %vm55_vm0, %v147_v35, 0.0  ;;  %v174_v49 = vsel %vm55_vm0, %v148_v42, 0.0 }
  0x90   :  { %v91_v39 = vpop.xlane.xlu0 %90  ;;  %172 = vadd.xlane.f32.xlu1 %v171_v17  ;;  %160 = vadd.xlane.f32.xlu2 %v159_v37  ;;  %v189_v19 = vsel %vm55_vm0, %v153_v36, 0.0  ;;  %v100_v40 = vpop.xlane.xlu1 %99  ;;  %v607_v36 = vld [vmem:[%s1377_s3] sm:$0xff] }
  0x91   :  { %v122_v15 = vmul.f32 %v827_v46, %v91_v39  ;;  %190 = vadd.xlane.f32.xlu0 %v189_v19  ;;  %v103_v18 = vpop.xlane.xlu2 %102  ;;  %v125_v41 = vmul.f32 %v827_v46, %v100_v40  ;;  %652 = vmatpush.bf16.msra.mxu2 %v607_v36 }
  0x92   :  { %v126_v43 = vmul.f32 %v827_v46, %v103_v18  ;;  %653 = vmatpush.bf16.msra.mxu3 %v607_v36  ;;  %512 = vmatpush.bf16.msra.mxu0 %v607_v36 }
  0x93   :  { %v905_v44 = vsub.f32 %v632_v24, %v122_v15  ;;  %v913_v47 = vsub.f32 %v639_v25, %v125_v41  ;;  %651 = vmatpush.bf16.msra.mxu1 %v607_v36 }
  0x94   :  { %v909_v45 = vsub.f32 %v640_v26, %v126_v43 }
  0x95   :  { %v154_v48 = vmul.f32 %v905_v44, %v905_v44  ;;  %v157_v55 = vmul.f32 %v913_v47, %v913_v47 }
  0x96   :  { %v158_v50 = vmul.f32 %v909_v45, %v909_v45 }
  0x97   :  { %v192_v16 = vsel %vm55_vm0, %v154_v48, 0.0  ;;  %v201_v61 = vsel %vm55_vm0, %v157_v55, 0.0 }
  0x98   :  { %193 = vadd.xlane.f32.xlu1 %v192_v16  ;;  %v64_v24 = vpop.xlane.xlu0 %63  ;;  %175 = vadd.xlane.f32.xlu2 %v174_v49  ;;  %v204_v26 = vsel %vm55_vm0, %v158_v50, 0.0  ;;  %v67_v51 = vpop.xlane.xlu1 %66 }
  0x99   :  { %v113_v23 = vmul.f32 %v827_v46, %v64_v24  ;;  %205 = vadd.xlane.f32.xlu0 %v204_v26  ;;  %v76_v25 = vpop.xlane.xlu2 %75  ;;  %v114_v54 = vmul.f32 %v827_v46, %v67_v51 }
  0x9a   :  { %v117_v56 = vmul.f32 %v827_v46, %v76_v25 }
  0x9b   :  { %v929_v57 = vsub.f32 %v615_v32, %v113_v23  ;;  %v937_v59 = vsub.f32 %v616_v33, %v114_v54 }
  0x9c   :  { %v933_v58 = vsub.f32 %v623_v34, %v117_v56 }
  0x9d   :  { %v145_v60 = vmul.f32 %v929_v57, %v929_v57  ;;  %v146_v30 = vmul.f32 %v937_v59, %v937_v59 }
  0x9e   :  { %v149_v62 = vmul.f32 %v933_v58, %v933_v58 }
  0x9f   :  { %v165_v63 = vsel %vm55_vm0, %v145_v60, 0.0  ;;  %v168_v12 = vsel %vm55_vm0, %v146_v30, 0.0 }
  0xa0   :  { %166 = vadd.xlane.f32.xlu1 %v165_v63  ;;  %v79_v32 = vpop.xlane.xlu0 %78  ;;  %202 = vadd.xlane.f32.xlu2 %v201_v61  ;;  %v177_v34 = vsel %vm55_vm0, %v149_v62, 0.0 }
  0xa1   :  { %v118_v3 = vmul.f32 %v827_v46, %v79_v32  ;;  %178 = vadd.xlane.f32.xlu0 %v177_v34 }
  0xa3   :  { %v951_v33 = vsub.f32 %v624_v38, %v118_v3 }
  0xa5   :  { %v150_v8 = vmul.f32 %v951_v33, %v951_v33 }
  0xa7   :  { %v180_v13 = vsel %vm55_vm0, %v150_v8, 0.0 }
  0xa8   :  { %181 = vadd.xlane.f32.xlu1 %v180_v13  ;;  %169 = vadd.xlane.f32.xlu2 %v168_v12 }
  0xf3   :  { %v185_v1 = vpop.xlane.xlu1 %184  ;;  %v197_v9 = vpop.xlane.xlu0 %196 }
  0xf4   :  { %v215_v10 = vmul.f32 %v185_v1, %v827_v46  ;;  %v219_v11 = vmul.f32 %v197_v9, %v827_v46 }
  0xf6   :  { %v231_v14 = vadd.f32 1e-05, %v215_v10  ;;  %v235_v20 = vadd.f32 1e-05, %v219_v11 }
  0xf8   :  { %660 = vrsqrt.f32 %v231_v14  ;;  %vm325_vm4 = vweird.f32 %v231_v14  ;;  %vm365_vm6 = vweird.f32 %v235_v20 }
  0xf9   :  { %662 = vrsqrt.f32 %v235_v20 }
  0xfb   :  { %v200_v38 = vpop.xlane.xlu1 %199  ;;  %v188_v21 = vpop.xlane.xlu2 %187 }
  0xfc   :  { %v220_v22 = vmul.f32 %v200_v38, %v827_v46  ;;  %v164_v2 = vpop.xlane.xlu0 %163  ;;  %v216_v27 = vmul.f32 %v188_v21, %v827_v46 }
  0xfd   :  { %v208_v35 = vmul.f32 %v164_v2, %v827_v46 }
  0xfe   :  { %v968_v17 = vpop.eup %660  ;;  %v970_v37 = vadd.f32 1e-05, %v220_v22  ;;  %v972_v39 = vadd.f32 1e-05, %v216_v27 }
  0xff   :  { %v974_v19 = vpop.eup %662  ;;  %v320_v40 = vmul.f32 %v968_v17, %v231_v14  ;;  %v977_v15 = vadd.f32 1e-05, %v208_v35  ;;  %vm326_vm2 = vweird.f32 %v968_v17 }
 0x100   :  { %v360_v18 = vmul.f32 %v974_v19, %v235_v20  ;;  %664 = vrsqrt.f32 %v970_v37  ;;  %vm366_vm3 = vweird.f32 %v974_v19  ;;  %vm1011_vm5 = vmor %vm325_vm4, %vm326_vm2  ;;  %vm375_vm8 = vweird.f32 %v970_v37 }
 0x101   :  { %v321_v41 = vmul.f32 %v968_v17, %v320_v40  ;;  %666 = vrsqrt.f32 %v977_v15  ;;  %vm1018_vm7 = vmor %vm365_vm6, %vm366_vm3  ;;  %vm255_vm9 = vweird.f32 %v977_v15  ;;  %vm335_vm11 = vweird.f32 %v972_v39 }
 0x102   :  { %v361_v42 = vmul.f32 %v974_v19, %v360_v18  ;;  %668 = vrsqrt.f32 %v972_v39 }
 0x103   :  { %v322_v43 = vmul.f32 0.5, %v321_v41  ;;  %v173_v48 = vpop.xlane.xlu1 %172  ;;  %v161_v49 = vpop.xlane.xlu2 %160 }
 0x104   :  { %v362_v50 = vmul.f32 0.5, %v361_v42  ;;  %v211_v16 = vmul.f32 %v173_v48, %v827_v46  ;;  %v191_v24 = vpop.xlane.xlu0 %190  ;;  %v207_v26 = vmul.f32 %v161_v49, %v827_v46 }
 0x105   :  { %v323_v51 = vsub.f32 1.5, %v322_v43  ;;  %v217_v23 = vmul.f32 %v191_v24, %v827_v46  ;;  %v1047_v43 = vld [vmem:[%s1374_s1] ss:$0 sm:$0xff] }
 0x106   :  { %v988_v25 = vpop.eup %664  ;;  %v363_v54 = vsub.f32 1.5, %v362_v50  ;;  %v991_v55 = vadd.f32 1e-05, %v211_v16  ;;  %v1000_v62 = vadd.f32 1e-05, %v207_v26 }
 0x107   :  { %v993_v56 = vpop.eup %666  ;;  %v370_v60 = vmul.f32 %v988_v25, %v970_v37  ;;  %v998_v61 = vadd.f32 1e-05, %v217_v23  ;;  %v324_v32 = vmul.f32 %v968_v17, %v323_v51  ;;  %vm376_vm12 = vweird.f32 %v988_v25 }
 0x108   :  { %v669_v63 = vpop.eup %668  ;;  %v364_v34 = vmul.f32 %v974_v19, %v363_v54  ;;  %v250_v3 = vmul.f32 %v993_v56, %v977_v15  ;;  %670 = vrsqrt.f32 %v991_v55  ;;  %vm256_vm14 = vweird.f32 %v993_v56  ;;  %vm1081_vm2 = vmor %vm375_vm8, %vm376_vm12 }
 0x109   :  { %v371_v30 = vmul.f32 %v988_v25, %v370_v60  ;;  %v330_v8 = vmul.f32 %v669_v63, %v972_v39  ;;  %672 = vrsqrt.f32 %v998_v61  ;;  %v328_v31 = vsel %vm1011_vm5, %v968_v17, %v324_v32  ;;  %vm1103_vm5 = vmor %vm255_vm9, %vm256_vm14 }
 0x10a   :  { %v251_v13 = vmul.f32 %v993_v56, %v250_v3  ;;  %v368_v20 = vsel %vm1018_vm7, %v974_v19, %v364_v34  ;;  %674 = vrsqrt.f32 %v1000_v62  ;;  %vm336_vm10 = vweird.f32 %v669_v63 }
 0x10b   :  { %v372_v9 = vmul.f32 0.5, %v371_v30  ;;  %v331_v10 = vmul.f32 %v669_v63, %v330_v8  ;;  %v194_v11 = vpop.xlane.xlu1 %193  ;;  %v176_v14 = vpop.xlane.xlu2 %175  ;;  %v407_v18 = vmul.f32 %v328_v31, %v837_v53  ;;  %v411_v41 = vmul.f32 %v368_v20, %v833_v52  ;;  %vm337_vm13 = vmor %vm335_vm11, %vm336_vm10 }
 0x10c   :  { %v206_v38 = vpop.xlane.xlu0 %205  ;;  %v252_v21 = vmul.f32 0.5, %v251_v13  ;;  %v218_v2 = vmul.f32 %v194_v11, %v827_v46  ;;  %v212_v17 = vmul.f32 %v176_v14, %v827_v46  ;;  %vm285_vm15 = vweird.f32 %v991_v55 }
 0x10d   :  { %v332_v22 = vmul.f32 0.5, %v331_v10  ;;  %v222_v27 = vmul.f32 %v206_v38, %v827_v46  ;;  %v373_v36 = vsub.f32 1.5, %v372_v9  ;;  %vm345_vm1 = vweird.f32 %v998_v61 }
 0x10e   :  { %v1032_v35 = vpop.eup %670  ;;  %v1042_v42 = vadd.f32 1e-05, %v218_v2  ;;  %v253_v49 = vsub.f32 1.5, %v252_v21  ;;  %v1061_v26 = vadd.f32 1e-05, %v212_v17  ;;  %v426_v30 = vmul.f32 %v1047_v43, %v407_v18 }
 0x10f   :  { %v333_v40 = vsub.f32 1.5, %v332_v22  ;;  %v280_v19 = vmul.f32 %v1032_v35, %v991_v55  ;;  %v1049_v48 = vpop.eup %672  ;;  %v1052_v24 = vadd.f32 1e-05, %v222_v27  ;;  %v374_v52 = vmul.f32 %v988_v25, %v373_v36 }
 0x110   :  { %v1054_v53 = vpop.eup %674  ;;  %v340_v39 = vmul.f32 %v1049_v48, %v998_v61  ;;  %676 = vrsqrt.f32 %v1042_v42  ;;  %v1086_v8 = vmul.f32 %v993_v56, %v253_v49  ;;  %vm245_vm3 = vweird.f32 %v1000_v62 }
 0x111   :  { %v334_v50 = vmul.f32 %v669_v63, %v333_v40  ;;  %v281_v16 = vmul.f32 %v1032_v35, %v280_v19  ;;  %v240_v54 = vmul.f32 %v1054_v53, %v1000_v62  ;;  %678 = vrsqrt.f32 %v1052_v24 }
 0x112   :  { %v341_v32 = vmul.f32 %v1049_v48, %v340_v39  ;;  %v430_v1 = vmul.f32 %v1047_v43, %v411_v41  ;;  %v378_v37 = vsel %vm1081_vm2, %v988_v25, %v374_v52  ;;  %680 = vrsqrt.f32 %v1061_v26 }
 0x113   :  { %v338_v51 = vsel %vm337_vm13, %v669_v63, %v334_v50  ;;  %v282_v23 = vmul.f32 0.5, %v281_v16  ;;  %v167_v34 = vpop.xlane.xlu1 %166  ;;  %v1075_v63 = vld [vmem:[%s1375_s2] ss:$0 sm:$0xff]  ;;  %v241_v12 = vmul.f32 %v1054_v53, %v240_v54  ;;  %v203_v13 = vpop.xlane.xlu2 %202  ;;  %vm286_vm4 = vweird.f32 %v1032_v35 }
 0x114   :  { %v408_v60 = vmul.f32 %v338_v51, %v855_v6  ;;  %v179_v3 = vpop.xlane.xlu0 %178  ;;  %v342_v10 = vmul.f32 0.5, %v341_v32  ;;  %v209_v14 = vmul.f32 %v167_v34, %v827_v46  ;;  %v221_v38 = vmul.f32 %v203_v13, %v827_v46  ;;  %vm1145_vm9 = vmor %vm285_vm15, %vm286_vm4 }
 0x115   :  { %v283_v9 = vsub.f32 1.5, %v282_v23  ;;  %v242_v11 = vmul.f32 0.5, %v241_v12  ;;  %v213_v31 = vmul.f32 %v179_v3, %v827_v46  ;;  %v445_v22 = vadd.f32 %v1075_v63, %v426_v30 }
 0x116   :  { %v343_v25 = vsub.f32 1.5, %v342_v10  ;;  %v427_v21 = vmul.f32 %v1047_v43, %v408_v60  ;;  %v412_v2 = vmul.f32 %v378_v37, %v851_v4  ;;  %v258_v27 = vsel %vm1103_vm5, %v993_v56, %v1086_v8  ;;  %v1117_v17 = vpop.eup %676 }
 0x117   :  { %v243_v36 = vsub.f32 1.5, %v242_v11  ;;  %v1115_v15 = vadd.f32 1e-05, %v209_v14  ;;  %v1120_v40 = vmul.f32 %v1032_v35, %v283_v9  ;;  %vm346_vm6 = vweird.f32 %v1049_v48  ;;  %v1126_v4 = vpop.eup %678 }
 0x118   :  { %vm246_vm7 = vweird.f32 %v1054_v53  ;;  %v1124_v19 = vadd.f32 1e-05, %v213_v31  ;;  %v350_v41 = vmul.f32 %v1117_v17, %v1042_v42  ;;  %v1132_v49 = vadd.f32 1e-05, %v221_v38  ;;  %v1134_v50 = vpop.eup %680  ;;  %vm1174_vm14 = vmor %vm345_vm1, %vm346_vm6 }
 0x119   :  { %v244_v18 = vmul.f32 %v1054_v53, %v243_v36  ;;  %682 = vrsqrt.f32 %v1115_v15  ;;  %v344_v16 = vmul.f32 %v1049_v48, %v343_v25  ;;  %vm355_vm8 = vweird.f32 %v1042_v42  ;;  %vm1163_vm12 = vmor %vm245_vm3, %vm246_vm7 }
 0x11a   :  { %v390_v52 = vmul.f32 %v1126_v4, %v1052_v24  ;;  %v446_v39 = vadd.f32 %v1075_v63, %v427_v21  ;;  %v351_v23 = vmul.f32 %v1117_v17, %v350_v41  ;;  %vm395_vm10 = vweird.f32 %v1052_v24 }
 0x11b   :  { %v290_v54 = vmul.f32 %v1134_v50, %v1061_v26  ;;  %vm295_vm11 = vweird.f32 %v1061_v26  ;;  %v431_v60 = vmul.f32 %v1047_v43, %v412_v2  ;;  %v288_v55 = vsel %vm1145_vm9, %v1032_v35, %v1120_v40  ;;  %v182_v3 = vpop.xlane.xlu1 %181  ;;  %v170_v12 = vpop.xlane.xlu2 %169 }
 0x11c   :  { %vm356_vm13 = vweird.f32 %v1117_v17  ;;  %v391_v34 = vmul.f32 %v1126_v4, %v390_v52  ;;  %684 = vrsqrt.f32 %v1124_v19  ;;  %v248_v62 = vsel %vm1163_vm12, %v1054_v53, %v244_v18 }
 0x11d   :  { %v352_v30 = vmul.f32 0.5, %v351_v23  ;;  %v291_v6 = vmul.f32 %v1134_v50, %v290_v54  ;;  %686 = vrsqrt.f32 %v1132_v49  ;;  %v348_v13 = vsel %vm1174_vm14, %v1049_v48, %v344_v16  ;;  %vm1204_vm1 = vmor %vm355_vm8, %vm356_vm13 }
 0x11e   :  { %v392_v37 = vmul.f32 0.5, %v391_v34  ;;  %v457_v61 = vpack.c.bf16 %v446_v39, %v445_v22  ;;  %v449_v9 = vadd.f32 %v1075_v63, %v430_v1  ;;  %v450_v53 = vadd.f32 %v1075_v63, %v431_v60 }
 0x11f   :  { %v1187_v10 = vpop.eup %682  ;;  %v353_v11 = vsub.f32 1.5, %v352_v30  ;;  %v292_v14 = vmul.f32 0.5, %v291_v6  ;;  %v214_v31 = vmul.f32 %v182_v3, %v827_v46  ;;  %v399_v25 = vmul.f32 %v248_v62, %v869_v0 }
 0x120   :  { %v393_v38 = vsub.f32 1.5, %v392_v37  ;;  %v260_v21 = vmul.f32 %v1187_v10, %v1115_v15  ;;  %603 = vmatmul.msk.bf16.vlgmr.msra.gmra.mxu2 %vm55_vm0, %v457_v61  ;;  %v210_v48 = vmul.f32 %v170_v12, %v827_v46  ;;  %vm296_vm15 = vweird.f32 %v1134_v50 }
 0x121   :  { %v354_v1 = vmul.f32 %v1117_v17, %v353_v11  ;;  %v293_v22 = vsub.f32 1.5, %v292_v14  ;;  %v459_v2 = vpack.c.bf16 %v450_v53, %v449_v9  ;;  %vm396_vm2 = vweird.f32 %v1126_v4  ;;  %vm297_vm3 = vmor %vm295_vm11, %vm296_vm15 }
 0x122   :  { %v1198_v36 = vpop.eup %684  ;;  %v394_v40 = vmul.f32 %v1126_v4, %v393_v38  ;;  %v261_v46 = vmul.f32 %v1187_v10, %v260_v21  ;;  %v1211_v18 = vadd.f32 1e-05, %v214_v31  ;;  %v1220_v39 = vadd.f32 1e-05, %v210_v48  ;;  %vm1243_vm4 = vmor %vm395_vm10, %vm396_vm2 }
 0x123   :  { %v687_v41 = vpop.eup %686  ;;  %v358_v16 = vsel %vm1204_vm1, %v1117_v17, %v354_v1  ;;  %v294_v52 = vmul.f32 %v1134_v50, %v293_v22  ;;  %v300_v42 = vmul.f32 %v1198_v36, %v1124_v19  ;;  %605 = vmatmul.msk.bf16.vlgmr.msra.gmra.mxu3 %vm55_vm0, %v459_v2  ;;  %v400_v51 = vmul.f32 %v258_v27, %v859_v7 }
 0x124   :  { %v403_v23 = vmul.f32 %v288_v55, %v879_v5  ;;  %v380_v17 = vmul.f32 %v687_v41, %v1132_v49  ;;  %v418_v54 = vmul.f32 %v1047_v43, %v399_v25  ;;  %v409_v60 = vmul.f32 %v348_v13, %v885_v28 }
 0x125   :  { %v410_v32 = vmul.f32 %v358_v16, %v905_v44  ;;  %v298_v20 = vsel %vm297_vm3, %v1134_v50, %v294_v52  ;;  %v301_v56 = vmul.f32 %v1198_v36, %v300_v42  ;;  %v262_v26 = vmul.f32 0.5, %v261_v46 }
 0x126   :  { %v404_v5 = vmul.f32 %v298_v20, %v889_v29  ;;  %v381_v8 = vmul.f32 %v687_v41, %v380_v17  ;;  %688 = vrsqrt.f32 %v1211_v18  ;;  %v398_v28 = vsel %vm1243_vm4, %v1126_v4, %v394_v40 }
 0x127   :  { %v302_v44 = vmul.f32 0.5, %v301_v56  ;;  %vm305_vm5 = vweird.f32 %v1124_v19  ;;  %690 = vrsqrt.f32 %v1220_v39  ;;  %vm386_vm6 = vweird.f32 %v687_v41 }
 0x128   :  { %v382_v24 = vmul.f32 0.5, %v381_v8  ;;  %v419_v27 = vmul.f32 %v1047_v43, %v400_v51  ;;  %v437_v50 = vadd.f32 %v1075_v63, %v418_v54  ;;  %v422_v55 = vmul.f32 %v1047_v43, %v403_v23 }
 0x129   :  { %v303_v29 = vsub.f32 1.5, %v302_v44  ;;  %v423_v34 = vmul.f32 %v1047_v43, %v404_v5  ;;  %v428_v3 = vmul.f32 %v1047_v43, %v409_v60  ;;  %v263_v35 = vsub.f32 1.5, %v262_v26 }
 0x12a   :  { %v383_v4 = vsub.f32 1.5, %v382_v24  ;;  %v438_v62 = vadd.f32 %v1075_v63, %v419_v27  ;;  %v429_v30 = vmul.f32 %v1047_v43, %v410_v32  ;;  %v414_v6 = vmul.f32 %v398_v28, %v909_v45 }
 0x12b   :  { %vm385_vm7 = vweird.f32 %v1132_v49  ;;  %v441_v12 = vadd.f32 %v1075_v63, %v422_v55  ;;  %v442_v13 = vadd.f32 %v1075_v63, %v423_v34  ;;  %vm306_vm8 = vweird.f32 %v1198_v36 }
 0x12c   :  { %v689_v37 = vpop.eup %688  ;;  %v384_v61 = vmul.f32 %v687_v41, %v383_v4  ;;  %v453_v9 = vpack.c.bf16 %v438_v62, %v437_v50  ;;  %v448_v11 = vadd.f32 %v1075_v63, %v429_v30  ;;  %v304_v53 = vmul.f32 %v1198_v36, %v303_v29  ;;  %vm387_vm9 = vmor %vm385_vm7, %vm386_vm6 }
 0x12d   :  { %v691_v14 = vpop.eup %690  ;;  %v310_v45 = vmul.f32 %v689_v37, %v1211_v18  ;;  %v455_v31 = vpack.c.bf16 %v442_v13, %v441_v12  ;;  %v447_v49 = vadd.f32 %v1075_v63, %v428_v3  ;;  %v264_v25 = vmul.f32 %v1187_v10, %v263_v35  ;;  %vm307_vm12 = vmor %vm305_vm5, %vm306_vm8 }
 0x12e   :  { %vm266_vm10 = vweird.f32 %v1187_v10  ;;  %v388_v38 = vsel %vm387_vm9, %v687_v41, %v384_v61  ;;  %v270_v21 = vmul.f32 %v691_v14, %v1220_v39  ;;  %599 = vmatmul.msk.bf16.vlgmr.msra.gmra.mxu0 %vm55_vm0, %v453_v9  ;;  %v433_v2 = vmul.f32 %v1047_v43, %v414_v6 }
 0x12f   :  { %v413_v48 = vmul.f32 %v388_v38, %v913_v47  ;;  %v311_v1 = vmul.f32 %v689_v37, %v310_v45  ;;  %601 = vmatmul.msk.bf16.vlgmr.msra.gmra.mxu1 %vm55_vm0, %v455_v31  ;;  %v458_v22 = vpack.c.bf16 %v448_v11, %v447_v49  ;;  %vm265_vm11 = vweird.f32 %v1115_v15 }
 0x130   :  { %v271_v0 = vmul.f32 %v691_v14, %v270_v21  ;;  %vm267_vm13 = vmor %vm265_vm11, %vm266_vm10  ;;  %v308_v40 = vsel %vm307_vm12, %v1198_v36, %v304_v53  ;;  %vm316_vm14 = vweird.f32 %v689_v37  ;;  %v452_v42 = vadd.f32 %v1075_v63, %v433_v2 }
 0x131   :  { %v312_v46 = vmul.f32 0.5, %v311_v1  ;;  %604 = vmatmul.msk.bf16.gmra.mxu2 %vm55_vm0, %v458_v22  ;;  %v432_v47 = vmul.f32 %v1047_v43, %v413_v48  ;;  %v268_v41 = vsel %vm267_vm13, %v1187_v10, %v264_v25  ;;  %v405_v19 = vmul.f32 %v308_v40, %v933_v58 }
 0x132   :  { %v272_v16 = vmul.f32 0.5, %v271_v0  ;;  %vm276_vm15 = vweird.f32 %v691_v14  ;;  %v401_v36 = vmul.f32 %v268_v41, %v929_v57  ;;  %vm315_vm1 = vweird.f32 %v1211_v18 }
 0x133   :  { %v313_v52 = vsub.f32 1.5, %v312_v46  ;;  %v451_v15 = vadd.f32 %v1075_v63, %v432_v47  ;;  %vm317_vm2 = vmor %vm315_vm1, %vm316_vm14  ;;  %vm275_vm3 = vweird.f32 %v1220_v39  ;;  %v424_v58 = vmul.f32 %v1047_v43, %v405_v19 }
 0x134   :  { %v273_v51 = vsub.f32 1.5, %v272_v16  ;;  %vm277_vm4 = vmor %vm275_vm3, %vm276_vm15  ;;  %v420_v57 = vmul.f32 %v1047_v43, %v401_v36  ;;  %vm570_vm5 = vcmask 781312  }
 0x135   :  { %v314_v23 = vmul.f32 %v689_v37, %v313_v52  ;;  %v460_v17 = vpack.c.bf16 %v452_v42, %v451_v15  ;;  %v443_v7 = vadd.f32 %v1075_v63, %v424_v58 }
 0x136   :  { %v274_v54 = vmul.f32 %v691_v14, %v273_v51  ;;  %v439_v5 = vadd.f32 %v1075_v63, %v420_v57 }
 0x137   :  { %v318_v10 = vsel %vm317_vm2, %v689_v37, %v314_v23  ;;  %606 = vmatmul.msk.bf16.gmra.mxu3 %vm55_vm0, %v460_v17 }
 0x138   :  { %v406_v60 = vmul.f32 %v318_v10, %v951_v33  ;;  %v278_v32 = vsel %vm277_vm4, %v691_v14, %v274_v54 }
 0x139   :  { %v402_v20 = vmul.f32 %v278_v32, %v937_v59  ;;  %v657_v59 = vld [vmem:[%s1376_s4] ss:$0 sm:$0xff] }
 0x13a   :  { %v425_v18 = vmul.f32 %v1047_v43, %v406_v60 }
 0x13b   :  { %v421_v56 = vmul.f32 %v1047_v43, %v402_v20 }
 0x13c   :  { %v444_v39 = vadd.f32 %v1075_v63, %v425_v18 }
 0x13d   :  { %v440_v26 = vadd.f32 %v1075_v63, %v421_v56 }
 0x13e   :  { %v456_v33 = vpack.c.bf16 %v444_v39, %v443_v7 }
 0x13f   :  { %v454_v8 = vpack.c.bf16 %v440_v26, %v439_v5 }
 0x140   :  { %602 = vmatmul.msk.bf16.gmra.mxu1 %vm55_vm0, %v456_v33 }
 0x141   :  { %600 = vmatmul.msk.bf16.gmra.mxu0 %vm55_vm0, %v454_v8 }
 0x1a3   :  { %v534_v28 = vpop.f32.mrf.mxu2 }
 0x1a4   :  { %v535_v43 = vadd.f32 %v657_v59, %v534_v28 }
 0x1a6   :  { %v562_v44 = vpack.c.bf16 %v535_v43, %v535_v43  ;;  %v544_v24 = vpop.f32.mrf.mxu3 }
 0x1a7   :  { %v545_v27 = vadd.f32 %v657_v59, %v544_v24 }
 0x1a8   :  { %579 = vst.msk [vmem:[%s1378_s5 + $0x20] sm:$0xf] %vm570_vm5, %v562_v44 }
 0x1a9   :  { %v566_v63 = vpack.c.bf16 %v545_v27, %v545_v27 }
 0x1ab   :  { %583 = vst.msk [vmem:[%s1378_s5 + $0x30] sm:$0xf] %vm570_vm5, %v566_v63  ;;  %v514_v50 = vpop.f32.mrf.mxu0  ;;  %v536_v29 = vpop.f32.mrf.mxu2 }
 0x1ac   :  { %v515_v55 = vadd.f32 %v657_v59, %v514_v50  ;;  %v537_v34 = vadd.f32 %v657_v59, %v536_v29  ;;  %v524_v3 = vpop.f32.mrf.mxu1 }
 0x1ad   :  { %v525_v35 = vadd.f32 %v657_v59, %v524_v3 }
 0x1ae   :  { %v554_v4 = vpack.c.bf16 %v515_v55, %v515_v55  ;;  %v563_v62 = vpack.c.bf16 %v537_v34, %v537_v34  ;;  %v546_v30 = vpop.f32.mrf.mxu3 }
 0x1af   :  { %v547_v6 = vadd.f32 %v657_v59, %v546_v30  ;;  %v558_v12 = vpack.c.bf16 %v525_v35, %v525_v35 }
 0x1b0   :  { %571 = vst.msk [vmem:[%s1378_s5] sm:$0xf] %vm570_vm5, %v554_v4 }
 0x1b1   :  { %580 = vst.msk [vmem:[%s1378_s5 + $0x24] sm:$0xf] %vm570_vm5, %v563_v62  ;;  %v567_v13 = vpack.c.bf16 %v547_v6, %v547_v6 }
 0x1b2   :  { %575 = vst.msk [vmem:[%s1378_s5 + $0x10] sm:$0xf] %vm570_vm5, %v558_v12 }
 0x1b3   :  { %584 = vst.msk [vmem:[%s1378_s5 + $0x34] sm:$0xf] %vm570_vm5, %v567_v13  ;;  %v516_v37 = vpop.f32.mrf.mxu0 }
 0x1b4   :  { %v517_v61 = vadd.f32 %v657_v59, %v516_v37  ;;  %v539_v9 = vpop.f32.mrf.mxu2  ;;  %v526_v11 = vpop.f32.mrf.mxu1 }
 0x1b5   :  { %v540_v14 = vadd.f32 %v657_v59, %v539_v9  ;;  %v527_v53 = vadd.f32 %v657_v59, %v526_v11 }
 0x1b6   :  { %v555_v45 = vpack.c.bf16 %v517_v61, %v517_v61 }
 0x1b7   :  { %v564_v31 = vpack.c.bf16 %v540_v14, %v540_v14  ;;  %v559_v49 = vpack.c.bf16 %v527_v53, %v527_v53 }
 0x1b8   :  { %572 = vst.msk [vmem:[%s1378_s5 + $0x4] sm:$0xf] %vm570_vm5, %v555_v45 }
 0x1b9   :  { %581 = vst.msk [vmem:[%s1378_s5 + $0x28] sm:$0xf] %vm570_vm5, %v564_v31 }
 0x1ba   :  { %576 = vst.msk [vmem:[%s1378_s5 + $0x14] sm:$0xf] %vm570_vm5, %v559_v49  ;;  %v549_v25 = vpop.f32.mrf.mxu3 }
 0x1bb   :  { %v550_v38 = vadd.f32 %v657_v59, %v549_v25 }
 0x1bc   :  { %v541_v21 = vpop.f32.mrf.mxu2 }
 0x1bd   :  { %v542_v48 = vadd.f32 %v657_v59, %v541_v21  ;;  %v568_v1 = vpack.c.bf16 %v550_v38, %v550_v38  ;;  %v529_v22 = vpop.f32.mrf.mxu1 }
 0x1be   :  { %v519_v2 = vpop.f32.mrf.mxu0  ;;  %v530_v0 = vadd.f32 %v657_v59, %v529_v22 }
 0x1bf   :  { %v565_v40 = vpack.c.bf16 %v542_v48, %v542_v48  ;;  %585 = vst.msk [vmem:[%s1378_s5 + $0x38] sm:$0xf] %vm570_vm5, %v568_v1  ;;  %v520_v46 = vadd.f32 %v657_v59, %v519_v2 }
 0x1c0   :  { %v560_v47 = vpack.c.bf16 %v530_v0, %v530_v0 }
 0x1c1   :  { %582 = vst.msk [vmem:[%s1378_s5 + $0x2c] sm:$0xf] %vm570_vm5, %v565_v40  ;;  %v556_v41 = vpack.c.bf16 %v520_v46, %v520_v46 }
 0x1c2   :  { %577 = vst.msk [vmem:[%s1378_s5 + $0x18] sm:$0xf] %vm570_vm5, %v560_v47  ;;  %v551_v16 = vpop.f32.mrf.mxu3 }
 0x1c3   :  { %573 = vst.msk [vmem:[%s1378_s5 + $0x8] sm:$0xf] %vm570_vm5, %v556_v41  ;;  %v552_v52 = vadd.f32 %v657_v59, %v551_v16 }
 0x1c5   :  { %v569_v15 = vpack.c.bf16 %v552_v52, %v552_v52  ;;  %v531_v42 = vpop.f32.mrf.mxu1 }
 0x1c6   :  { %v521_v19 = vpop.f32.mrf.mxu0  ;;  %v532_v51 = vadd.f32 %v657_v59, %v531_v42 }
 0x1c7   :  { %586 = vst.msk [vmem:[%s1378_s5 + $0x3c] sm:$0xf] %vm570_vm5, %v569_v15  ;;  %v522_v36 = vadd.f32 %v657_v59, %v521_v19 }
 0x1c8   :  { %v561_v23 = vpack.c.bf16 %v532_v51, %v532_v51 }
 0x1c9   :  { %v557_v17 = vpack.c.bf16 %v522_v36, %v522_v36 }
 0x1ca   :  { %578 = vst.msk [vmem:[%s1378_s5 + $0x1c] sm:$0xf] %vm570_vm5, %v561_v23 }
 0x1cb   :  { %574 = vst.msk [vmem:[%s1378_s5 + $0xc] sm:$0xf] %vm570_vm5, %v557_v17 }

// kernel: _lambda_.19
= control target key start
LH: loop header
LB: loop body
LE: loop exit
PB: predicated region body
PF: predicated region fallthrough
CT: control target
= control target key end

     0   :  { %s686_s15 = smov 0   ;;  %s753_s0 = inlined_call_operand.vmem [shape: bf16[8,16,96], index: 0, kind: input, shape index: {}]   ;;  %s754_s1 = inlined_call_operand.vmem [shape: f32[4,16,16], index: 1, kind: input, shape index: {}]   ;;  %s755_s2 = inlined_call_operand.vmem [shape: bf16[32,32], index: 2, kind: input, shape index: {}]   ;;  %s756_s3 = inlined_call_operand.vmem [shape: f32[1,32], index: 3, kind: input, shape index: {}]   ;;  %s757_s4 = inlined_call_operand.vmem [shape: bf16[8,16,32], index: 4, kind: output, shape index: {}]  }
   0x1 LB: > { %s692_s16 = sadd.s32 4294967295, %s653_s15   ;;  %p576_p0 = scmp.ge.s32.totalorder %s653_s15, 1  ;;  %s653_s15 = sphi %s686_s15, %s14_s15  }
   0x2   : > { %p220_p1 = scmp.lt.s32.totalorder %s653_s15, 9 }
   0x4   : > { %p221_p2 = pnand %p576_p0, %p220_p1 }
   0x5   : > { %p263_p3 = scmp.lt.s32.totalorder (!%p221_p2), %s692_s16, 7  ;;  %s655_s22 = smov (!%p221_p2), 80  }
   0x6   : > { %224 = sbr.rel (%p221_p2) target bundleno = 938 (0x3aa), region = 36  ;;  %s656_s23 = smov (!%p221_p2), 96  }
   0x7   : > { %s657_s24 = smov (!%p221_p2), 112   ;;  %s269_s25 = ssub.s32 (!%p221_p2), 0, %s692_s16 }
   0x8   : > { %s579_s26 = smin.u32 (!%p221_p2), %s692_s16, %s269_s25  ;;  %p268_p4 = scmp.lt.s32.totalorder (!%p221_p2), %s692_s16, 0 }
   0x9   : > { %s271_s27 = sand.u32 (!%p221_p2), 3, %s579_s26   ;;  %s658_s8 = smov (!%p221_p2), 64  }
   0xa   : > { %s272_s28 = ssub.s32 (!%p221_p2), 0, %s271_s27  ;;  %s659_s9 = smov (!%p221_p2), 48  }
   0xb   : > { %s698_s17 = scalar_select %p263_p3, %s692_s16, 7  ;;  %vm314_vm0 = vcmask 130048   ;;  %v610_v59 = vld [vmem:[%s755_s2 + $0x8] sm:$0xff]  ;;  %v609_v60 = vld [vmem:[%s755_s2] sm:$0xff]  ;;  %vm476_vm1 = vcmask 261120   ;;  %vm496_vm2 = vcmask 257024  }
   0xc   : > { %s759_s28 = smov (!%p268_p4, %s272_s28), %s271_s27  ;;  %s660_s10 = smov 16  }
   0xd   : > { %s605_s18 = sshll.u32 %s698_s17, 3  ;;  %p581_p5 = scmp.lt.s32.totalorder %s759_s28, 0 }
   0xe   : > { %s267_s21 = scalar_lea.vmem %s753_s0, %s605_s18  ;;  %s278_s29 = sadd.s32 4, %s759_s28 }
   0xf   : > { %v706_v0 = vld [vmem:[%s267_s21] sm:$0xff]  ;;  %s761_s29 = smov (!%p581_p5, %s278_s29), %s759_s28 }
  0x10   : > { %380 = vrot.lane.b32.xlu0 %v706_v0, %s655_s22  ;;  %312 = vrot.lane.b32.xlu1 %v706_v0, %s656_s23  ;;  %p280_p6 = scmp.lt.s32.totalorder %s761_s29, 3  ;;  %s301_s22 = scalar_lea.vmem %s757_s4, %s605_s18 }
  0x12   : > { %s763_s29 = smov (!%p280_p6, %s761_s29), 3 }
  0x13   : > { %s606_s30 = sshll.u32 %s763_s29, 4 }
  0x14   : > { %s284_s7 = scalar_lea.vmem %s754_s1, %s606_s30 }
  0x15   : > { %v305_v7 = vld [vmem:[%s284_s7] sm:$0xff]  ;;  %v306_v9 = vld [vmem:[%s284_s7 + $0x8] sm:$0xff] }
  0x18   : > { %378 = vrot.lane.b32.xlu0 %v706_v0, %s657_s24 }
  0x82   : > { %v381_v1 = vpop.permute.xlu0 %380  ;;  %v313_v2 = vpop.permute.xlu1 %312 }
  0x83   : > { %v386_v3 = vsel %vm314_vm0, %v381_v1, 0  ;;  %v319_v4 = vsel %vm314_vm0, %v313_v2, 0 }
  0x84   : > { %395 = vmatpush.bf16.xpose.msra.mxu2 %v386_v3  ;;  %328 = vmatpush.bf16.xpose.msra.mxu0 %v319_v4 }
  0x8a   : > { %v379_v5 = vpop.permute.xlu0 %378 }
  0x8b   : > { %592 = vmatmul.msk.bf16.vlgmr.msra.gmra.mxu2 %vm314_vm0, %v379_v5  ;;  %590 = vmatmul.msk.bf16.vlgmr.msra.gmra.mxu0 %vm314_vm0, %v706_v0  ;;  %v630_v5 = vld [vmem:[%s756_s3] ss:$0 sm:$0xff] }
 0x108   : > { %v330_v6 = vpop.f32.mrf.mxu0 }
 0x109   : > { %v331_v18 = vadd.f32 %v330_v6, %v305_v7 }
 0x10b   : > { %v335_v19 = vsel %vm314_vm0, %v331_v18, -inf }
 0x10e   : > { %v397_v8 = vpop.f32.mrf.mxu2 }
 0x10f   : > { %v398_v10 = vadd.f32 %v397_v8, %v305_v7 }
 0x110   : > { %v332_v11 = vpop.f32.mrf.mxu0 }
 0x111   : > { %v333_v12 = vadd.f32 %v332_v11, %v306_v9  ;;  %v402_v13 = vsel %vm314_vm0, %v398_v10, -inf }
 0x112   : > { %403 = vmax.xlane.f32.xlu1 %v402_v13 }
 0x113   : > { %v338_v14 = vsel %vm314_vm0, %v333_v12, -inf }
 0x114   : > { %339 = vmax.xlane.f32.xlu0 %v338_v14 }
 0x116   : > { %v399_v15 = vpop.f32.mrf.mxu2 }
 0x117   : > { %v400_v16 = vadd.f32 %v399_v15, %v306_v9 }
 0x119   : > { %v405_v17 = vsel %vm314_vm0, %v400_v16, -inf }
 0x11a   : > { %406 = vmax.xlane.f32.xlu2 %v405_v17 }
 0x122   : > { %336 = vmax.xlane.f32.xlu2 %v335_v19 }
 0x128   : > { %358 = vrot.lane.b32.xlu0 %v706_v0, %s658_s8 }
 0x185   : > { %v404_v20 = vpop.xlane.xlu1 %403 }
 0x186   : > { %v408_v21 = vsub.f32 %v398_v10, %v404_v20 }
 0x187   : > { %v340_v35 = vpop.xlane.xlu0 %339 }
 0x188   : > { %v410_v22 = vmul.f32 1.442695, %v408_v21  ;;  %v342_v36 = vsub.f32 %v333_v12, %v340_v35 }
 0x18a   : > { %631 = vpow2.f32 %v410_v22  ;;  %v345_v37 = vmul.f32 1.442695, %v342_v36 }
 0x18d   : > { %v407_v23 = vpop.xlane.xlu2 %406 }
 0x18e   : > { %v409_v24 = vsub.f32 %v400_v16, %v407_v23 }
 0x190   : > { %v632_v25 = vpop.eup %631  ;;  %v412_v26 = vmul.f32 1.442695, %v409_v24 }
 0x191   : > { %v414_v27 = vsel %vm314_vm0, %v632_v25, 0.0 }
 0x192   : > { %633 = vpow2.f32 %v412_v26  ;;  %415 = vadd.xlane.f32.xlu2 %v414_v27 }
 0x195   : > { %v337_v28 = vpop.xlane.xlu2 %336 }
 0x196   : > { %v341_v29 = vsub.f32 %v331_v18, %v337_v28 }
 0x198   : > { %v634_v30 = vpop.eup %633  ;;  %v343_v31 = vmul.f32 1.442695, %v341_v29 }
 0x199   : > { %v417_v32 = vsel %vm314_vm0, %v634_v30, 0.0 }
 0x19a   : > { %635 = vpow2.f32 %v343_v31  ;;  %418 = vadd.xlane.f32.xlu2 %v417_v32  ;;  %v359_v48 = vpop.permute.xlu0 %358 }
 0x19b   : > { %637 = vpow2.f32 %v345_v37  ;;  %371 = vmatpush.bf16.msra.mxu1 %v359_v48 }
 0x19f   : > { %486 = vmatpush.bf16.msrb.mxu1 %v610_v59 }
 0x1a0   : > { %v636_v33 = vpop.eup %635 }
 0x1a1   : > { %v347_v34 = vsel %vm314_vm0, %v636_v33, 0.0  ;;  %v638_v38 = vpop.eup %637 }
 0x1a2   : > { %348 = vadd.xlane.f32.xlu1 %v347_v34  ;;  %v350_v39 = vsel %vm314_vm0, %v638_v38, 0.0 }
 0x1a3   : > { %487 = vmatpush.bf16.msrb.mxu1 %v609_v60 }
 0x1b2   : > { %425 = vrot.lane.b32.xlu2 %v706_v0, %s659_s9 }
 0x1db   : > { %351 = vadd.xlane.f32.xlu2 %v350_v39 }
 0x205   : > { %v416_v40 = vpop.xlane.xlu2 %415 }
 0x206   : > { %639 = vrcp.f32 %v416_v40 }
 0x20c   : > { %v640_v42 = vpop.eup %639 }
 0x20d   : > { %v419_v41 = vpop.xlane.xlu2 %418  ;;  %v422_v45 = vmul.f32 %v640_v42, %v632_v25 }
 0x20e   : > { %641 = vrcp.f32 %v419_v41 }
 0x214   : > { %v642_v43 = vpop.eup %641 }
 0x215   : > { %v426_v44 = vpop.permute.xlu2 %425  ;;  %v423_v46 = vmul.f32 %v642_v43, %v634_v30  ;;  %v349_v49 = vpop.xlane.xlu1 %348 }
 0x216   : > { %438 = vmatpush.bf16.msra.mxu3 %v426_v44  ;;  %643 = vrcp.f32 %v349_v49 }
 0x217   : > { %v424_v47 = vpack.c.bf16 %v423_v46, %v422_v45 }
 0x219   : > { %593 = vmatmul.msk.bf16.vlgmr.msra.gmra.mxu3 %vm314_vm0, %v424_v47 }
 0x21c   : > { %v644_v51 = vpop.eup %643 }
 0x21d   : > { %v355_v53 = vmul.f32 %v644_v51, %v636_v33 }
 0x24e   : > { %v352_v50 = vpop.xlane.xlu2 %351 }
 0x24f   : > { %645 = vrcp.f32 %v352_v50 }
 0x255   : > { %v646_v52 = vpop.eup %645 }
 0x256   : > { %v356_v54 = vmul.f32 %v646_v52, %v638_v38 }
 0x258   : > { %v357_v55 = vpack.c.bf16 %v356_v54, %v355_v53 }
 0x25a   : > { %591 = vmatmul.msk.bf16.vlgmr.msra.gmra.mxu1 %vm314_vm0, %v357_v55 }
 0x29c   : > { %v440_v56 = vpop.f32.mrf.mxu3 }
 0x2a4   : > { %v442_v57 = vpop.f32.mrf.mxu3 }
 0x2a5   : > { %v625_v58 = vpack.i.bf16 %v442_v57, %v440_v56 }
 0x2a7   : > { %626 = vrot.lane.b32.xlu1 %v625_v58, %s660_s10 }
 0x2d7   : > { %v373_v61 = vpop.f32.mrf.mxu1 }
 0x2df   : > { %v375_v1 = vpop.f32.mrf.mxu1 }
 0x319   : > { %v627_v62 = vpop.permute.xlu1 %626 }
 0x31a   : > { %v629_v63 = vunpack.i.h.bf16 %v627_v62  ;;  %v628_v0 = vunpack.i.l.bf16 %v627_v62 }
 0x31c   : > { %v453_v2 = vsel %vm314_vm0, %v373_v61, %v628_v0  ;;  %v454_v3 = vsel %vm314_vm0, %v375_v1, %v629_v63 }
 0x31d   : > { %v455_v4 = vpack.c.bf16 %v454_v3, %v453_v2 }
 0x31f   : > { %602 = vmatmul.msk.bf16.vlgmr.msrb.gmra.mxu1 %vm476_vm1, %v455_v4 }
 0x39c   : > { %v489_v6 = vpop.f32.mrf.mxu1 }
 0x39d   : > { %v490_v7 = vadd.f32 %v630_v5, %v489_v6 }
 0x39f   : > { %v494_v8 = vpack.c.bf16 %v490_v7, %v490_v7 }
 0x3a1   : > { %497 = vst.msk [vmem:[%s301_s22] sm:$0xf] %vm496_vm2, %v494_v8 }
 0x3a4   : > { %v491_v9 = vpop.f32.mrf.mxu1 }
 0x3a5   : > { %v492_v10 = vadd.f32 %v630_v5, %v491_v9 }
 0x3a7   : > { %v495_v11 = vpack.c.bf16 %v492_v10, %v492_v10 }
 0x3a9   : > { %498 = vst.msk [vmem:[%s301_s22 + $0x4] sm:$0xf] %vm496_vm2, %v495_v11 }
 0x3aa PF: > { %s14_s15 = sadd.s32 1, %s653_s15  }
 0x3ab   : > { %p11_p7 = scmp.ge.s32.totalorder %s14_s15, 10  }
 0x3ad   :  { %13 = sbr.rel (!%p11_p7) target bundleno = 1 (0x1), region = 69 }

// kernel: _lambda_.20
= control target key start
LH: loop header
LB: loop body
LE: loop exit
PB: predicated region body
PF: predicated region fallthrough
CT: control target
= control target key end

     0   :  { %vm61_vm0 = vcmask 261120   ;;  %v1060_v18 = vmov 32.0   ;;  %s1730_s0 = inlined_call_operand.vmem [shape: bf16[128,32], index: 0, kind: input, shape index: {}]   ;;  %s1731_s1 = inlined_call_operand.vmem [shape: f32[1,32], index: 1, kind: input, shape index: {}]   ;;  %s1732_s2 = inlined_call_operand.vmem [shape: f32[1,32], index: 2, kind: input, shape index: {}]   ;;  %s1733_s3 = inlined_call_operand.vmem [shape: bf16[32,128], index: 3, kind: input, shape index: {}]   ;;  %s1734_s4 = inlined_call_operand.vmem [shape: f32[1,128], index: 4, kind: input, shape index: {}]   ;;  %s1735_s5 = inlined_call_operand.vmem [shape: bf16[128,32], index: 5, kind: input, shape index: {}]   ;;  %s1736_s6 = inlined_call_operand.vmem [shape: f32[1,32], index: 6, kind: input, shape index: {}]   ;;  %s1737_s7 = inlined_call_operand.vmem [shape: bf16[128,32], index: 7, kind: output, shape index: {}]  }
   0x1   :  { %v972_v0 = vld [vmem:[%s1730_s0 + $0x8] sm:$0xff]   ;;  %v941_v1 = vld [vmem:[%s1730_s0] sm:$0xff]   ;;  %v973_v2 = vld [vmem:[%s1730_s0 + $0x10] sm:$0xff]   ;;  %994 = vrcp.f32 %v1060_v18 }
   0x2   :  { %v1110_v3 = vunpack.c.l.bf16 %v972_v0  ;;  %v1112_v4 = vunpack.c.l.bf16 %v941_v1  ;;  %v1114_v5 = vunpack.c.l.bf16 %v973_v2  ;;  %v1122_v9 = vunpack.c.h.bf16 %v972_v0  ;;  %v974_v15 = vld [vmem:[%s1730_s0 + $0x18] sm:$0xff]   ;;  %v976_v45 = vld [vmem:[%s1730_s0 + $0x28] sm:$0xff]   ;;  %v975_v46 = vld [vmem:[%s1730_s0 + $0x20] sm:$0xff]  }
   0x3   :  { %v1124_v10 = vunpack.c.h.bf16 %v941_v1  ;;  %v1126_v11 = vunpack.c.h.bf16 %v973_v2  ;;  %v1137_v16 = vunpack.c.l.bf16 %v974_v15  ;;  %v1152_v36 = vunpack.c.h.bf16 %v974_v15  ;;  %v978_v18 = vld [vmem:[%s1730_s0 + $0x38] sm:$0xff]  }
   0x4   :  { %v68_v6 = vsel %vm61_vm0, %v1110_v3, 0.0  ;;  %v62_v7 = vsel %vm61_vm0, %v1112_v4, 0.0  ;;  %v74_v8 = vsel %vm61_vm0, %v1114_v5, 0.0  ;;  %v71_v12 = vsel %vm61_vm0, %v1122_v9, 0.0 }
   0x5   :  { %69 = vadd.xlane.f32.xlu1 %v68_v6  ;;  %63 = vadd.xlane.f32.xlu0 %v62_v7  ;;  %v65_v13 = vsel %vm61_vm0, %v1124_v10, 0.0  ;;  %v77_v14 = vsel %vm61_vm0, %v1126_v11, 0.0  ;;  %v80_v17 = vsel %vm61_vm0, %v1137_v16, 0.0  ;;  %v83_v42 = vsel %vm61_vm0, %v1152_v36, 0.0  ;;  %v977_v7 = vld [vmem:[%s1730_s0 + $0x30] sm:$0xff]  }
   0x6   :  { %75 = vadd.xlane.f32.xlu2 %v74_v8  ;;  %v1179_v50 = vunpack.c.l.bf16 %v976_v45  ;;  %v1181_v51 = vunpack.c.l.bf16 %v975_v46  ;;  %v1196_v60 = vunpack.c.h.bf16 %v976_v45  ;;  %v1199_v62 = vunpack.c.h.bf16 %v975_v46 }
   0x7   :  { %v995_v19 = vpop.eup %994 }
   0x8   :  { %v111_v20 = vmul.f32 32.0, %v995_v19  ;;  %vm115_vm1 = vweird.f32 %v995_v19  ;;  %v92_v54 = vsel %vm61_vm0, %v1179_v50, 0.0  ;;  %v86_v55 = vsel %vm61_vm0, %v1181_v51, 0.0 }
   0x9   :  { %v95_v1 = vsel %vm61_vm0, %v1196_v60, 0.0  ;;  %v89_v6 = vsel %vm61_vm0, %v1199_v62, 0.0 }
   0xa   :  { %v112_v21 = vsub.f32 1.0, %v111_v20  ;;  %v1230_v20 = vunpack.c.h.bf16 %v977_v7 }
   0xc   :  { %v113_v22 = vmul.f32 %v995_v19, %v112_v21 }
   0xd   :  { %72 = vadd.xlane.f32.xlu1 %v71_v12  ;;  %66 = vadd.xlane.f32.xlu0 %v65_v13  ;;  %v1217_v12 = vunpack.c.l.bf16 %v977_v7 }
   0xe   :  { %78 = vadd.xlane.f32.xlu2 %v77_v14  ;;  %v114_v23 = vadd.f32 %v995_v19, %v113_v22  ;;  %v101_v22 = vsel %vm61_vm0, %v1230_v20, 0.0 }
   0xf   :  { %v98_v15 = vsel %vm61_vm0, %v1217_v12, 0.0 }
  0x10   :  { %v1141_v24 = vsel %vm115_vm1, %v995_v19, %v114_v23  ;;  %v1228_v19 = vunpack.c.h.bf16 %v978_v18  ;;  %v1236_v23 = vunpack.c.l.bf16 %v978_v18 }
  0x12   :  { %v107_v21 = vsel %vm61_vm0, %v1228_v19, 0.0 }
  0x16   :  { %81 = vadd.xlane.f32.xlu2 %v80_v17 }
  0x78   :  { %v70_v25 = vpop.xlane.xlu1 %69  ;;  %v64_v26 = vpop.xlane.xlu0 %63 }
  0x79   :  { %v117_v27 = vmul.f32 %v1141_v24, %v64_v26  ;;  %v76_v28 = vpop.xlane.xlu2 %75  ;;  %v119_v37 = vmul.f32 %v1141_v24, %v70_v25  ;;  %v104_v25 = vsel %vm61_vm0, %v1236_v23, 0.0  ;;  %v931_v26 = vld [vmem:[%s1733_s3 + $0x8] sm:$0xff] }
  0x7a   :  { %v121_v61 = vmul.f32 %v1141_v24, %v76_v28  ;;  %517 = vmatpush.bf16.msra.mxu0 %v931_v26  ;;  %979 = vmatpush.bf16.msra.mxu3 %v931_v26 }
  0x7b   :  { %v1145_v29 = vsub.f32 %v1112_v4, %v117_v27  ;;  %v1168_v44 = vsub.f32 %v1110_v3, %v119_v37 }
  0x7c   :  { %v1208_v2 = vsub.f32 %v1114_v5, %v121_v61 }
  0x7d   :  { %v149_v30 = vmul.f32 %v1145_v29, %v1145_v29  ;;  %v151_v52 = vmul.f32 %v1168_v44, %v1168_v44 }
  0x7e   :  { %v153_v13 = vmul.f32 %v1208_v2, %v1208_v2 }
  0x7f   :  { %v165_v31 = vsel %vm61_vm0, %v149_v30, 0.0  ;;  %v171_v56 = vsel %vm61_vm0, %v151_v52, 0.0 }
  0x80   :  { %v73_v32 = vpop.xlane.xlu1 %72  ;;  %166 = vadd.xlane.f32.xlu0 %v165_v31  ;;  %v67_v33 = vpop.xlane.xlu0 %66  ;;  %v177_v17 = vsel %vm61_vm0, %v153_v13, 0.0  ;;  %v930_v31 = vld [vmem:[%s1733_s3] sm:$0xff] }
  0x81   :  { %v120_v34 = vmul.f32 %v1141_v24, %v73_v32  ;;  %v118_v35 = vmul.f32 %v1141_v24, %v67_v33  ;;  %v79_v40 = vpop.xlane.xlu2 %78  ;;  %518 = vmatpush.bf16.msra.mxu0 %v930_v31  ;;  %980 = vmatpush.bf16.msra.mxu3 %v930_v31 }
  0x82   :  { %v122_v49 = vmul.f32 %v1141_v24, %v79_v40 }
  0x83   :  { %v1156_v38 = vsub.f32 %v1122_v9, %v120_v34  ;;  %v1159_v39 = vsub.f32 %v1124_v10, %v118_v35 }
  0x84   :  { %v1186_v53 = vsub.f32 %v1126_v11, %v122_v49 }
  0x85   :  { %v152_v41 = vmul.f32 %v1156_v38, %v1156_v38  ;;  %v150_v43 = vmul.f32 %v1159_v39, %v1159_v39 }
  0x86   :  { %v154_v59 = vmul.f32 %v1186_v53, %v1186_v53 }
  0x87   :  { %v174_v47 = vsel %vm61_vm0, %v152_v41, 0.0  ;;  %v168_v48 = vsel %vm61_vm0, %v150_v43, 0.0 }
  0x88   :  { %175 = vadd.xlane.f32.xlu2 %v174_v47  ;;  %84 = vadd.xlane.f32.xlu0 %v83_v42  ;;  %v180_v0 = vsel %vm61_vm0, %v154_v59, 0.0 }
  0x89   :  { %169 = vadd.xlane.f32.xlu1 %v168_v48  ;;  %v82_v57 = vpop.xlane.xlu2 %81 }
  0x8a   :  { %v123_v58 = vmul.f32 %v1141_v24, %v82_v57 }
  0x8c   :  { %v1202_v63 = vsub.f32 %v1137_v16, %v123_v58 }
  0x8e   :  { %v155_v8 = vmul.f32 %v1202_v63, %v1202_v63 }
  0x90   :  { %93 = vadd.xlane.f32.xlu2 %v92_v54  ;;  %87 = vadd.xlane.f32.xlu0 %v86_v55  ;;  %v183_v14 = vsel %vm61_vm0, %v155_v8, 0.0 }
  0x91   :  { %172 = vadd.xlane.f32.xlu1 %v171_v56 }
  0x98   :  { %181 = vadd.xlane.f32.xlu2 %v180_v0  ;;  %96 = vadd.xlane.f32.xlu0 %v95_v1 }
  0x99   :  { %90 = vadd.xlane.f32.xlu1 %v89_v6 }
  0xa0   :  { %184 = vadd.xlane.f32.xlu2 %v183_v14  ;;  %99 = vadd.xlane.f32.xlu0 %v98_v15 }
  0xa1   :  { %178 = vadd.xlane.f32.xlu1 %v177_v17 }
  0xa8   :  { %108 = vadd.xlane.f32.xlu2 %v107_v21 }
  0xa9   :  { %102 = vadd.xlane.f32.xlu1 %v101_v22 }
  0xb1   :  { %105 = vadd.xlane.f32.xlu1 %v104_v25 }
  0xf3   :  { %v167_v27 = vpop.xlane.xlu0 %166 }
  0xf4   :  { %v213_v28 = vmul.f32 %v167_v27, %v1141_v24 }
  0xf6   :  { %v229_v30 = vadd.f32 1e-05, %v213_v28 }
  0xf8   :  { %996 = vrsqrt.f32 %v229_v30  ;;  %vm251_vm3 = vweird.f32 %v229_v30 }
  0xfb   :  { %v176_v32 = vpop.xlane.xlu2 %175  ;;  %v85_v33 = vpop.xlane.xlu0 %84 }
  0xfc   :  { %v216_v34 = vmul.f32 %v176_v32, %v1141_v24  ;;  %v170_v35 = vpop.xlane.xlu1 %169  ;;  %v124_v37 = vmul.f32 %v1141_v24, %v85_v33 }
  0xfd   :  { %v214_v40 = vmul.f32 %v170_v35, %v1141_v24 }
  0xfe   :  { %v997_v41 = vpop.eup %996  ;;  %v1250_v42 = vadd.f32 1e-05, %v216_v34  ;;  %v1253_v43 = vsub.f32 %v1152_v36, %v124_v37 }
  0xff   :  { %v246_v45 = vmul.f32 %v997_v41, %v229_v30  ;;  %v230_v46 = vadd.f32 1e-05, %v214_v40  ;;  %vm252_vm2 = vweird.f32 %v997_v41 }
 0x100   :  { %998 = vrsqrt.f32 %v1250_v42  ;;  %v156_v47 = vmul.f32 %v1253_v43, %v1253_v43  ;;  %vm1279_vm4 = vmor %vm251_vm3, %vm252_vm2  ;;  %vm281_vm8 = vweird.f32 %v1250_v42 }
 0x101   :  { %v247_v48 = vmul.f32 %v997_v41, %v246_v45  ;;  %1000 = vrsqrt.f32 %v230_v46  ;;  %vm261_vm6 = vweird.f32 %v230_v46 }
 0x102   :  { %v186_v49 = vsel %vm61_vm0, %v156_v47, 0.0 }
 0x103   :  { %v248_v52 = vmul.f32 0.5, %v247_v48  ;;  %v94_v54 = vpop.xlane.xlu2 %93  ;;  %187 = vadd.xlane.f32.xlu0 %v186_v49  ;;  %v88_v55 = vpop.xlane.xlu0 %87 }
 0x104   :  { %v127_v56 = vmul.f32 %v1141_v24, %v94_v54  ;;  %v173_v57 = vpop.xlane.xlu1 %172  ;;  %v125_v58 = vmul.f32 %v1141_v24, %v88_v55 }
 0x105   :  { %v249_v59 = vsub.f32 1.5, %v248_v52  ;;  %v215_v61 = vmul.f32 %v173_v57, %v1141_v24  ;;  %v1303_v52 = vld [vmem:[%s1731_s1] ss:$0 sm:$0xff] }
 0x106   :  { %v1262_v0 = vpop.eup %998  ;;  %v1265_v1 = vsub.f32 %v1179_v50, %v127_v56  ;;  %v1268_v6 = vsub.f32 %v1181_v51, %v125_v58 }
 0x107   :  { %v1001_v7 = vpop.eup %1000  ;;  %v250_v8 = vmul.f32 %v997_v41, %v249_v59  ;;  %v1270_v13 = vadd.f32 1e-05, %v215_v61  ;;  %v276_v14 = vmul.f32 %v1262_v0, %v1250_v42  ;;  %vm282_vm9 = vweird.f32 %v1262_v0 }
 0x108   :  { %v256_v15 = vmul.f32 %v1001_v7, %v230_v46  ;;  %v159_v17 = vmul.f32 %v1265_v1, %v1265_v1  ;;  %v157_v18 = vmul.f32 %v1268_v6, %v1268_v6  ;;  %vm262_vm5 = vweird.f32 %v1001_v7  ;;  %vm1336_vm12 = vmor %vm281_vm8, %vm282_vm9 }
 0x109   :  { %1002 = vrsqrt.f32 %v1270_v13  ;;  %v254_v27 = vsel %vm1279_vm4, %v997_v41, %v250_v8  ;;  %v277_v30 = vmul.f32 %v1262_v0, %v276_v14  ;;  %vm263_vm7 = vmor %vm261_vm6, %vm262_vm5  ;;  %vm271_vm11 = vweird.f32 %v1270_v13 }
 0x10a   :  { %v257_v22 = vmul.f32 %v1001_v7, %v256_v15  ;;  %v195_v25 = vsel %vm61_vm0, %v159_v17, 0.0  ;;  %v189_v26 = vsel %vm61_vm0, %v157_v18, 0.0  ;;  %v405_v48 = vmul.f32 %v254_v27, %v1145_v29  ;;  %v1320_v18 = vld [vmem:[%s1732_s2] ss:$0 sm:$0xff] }
 0x10b   :  { %196 = vadd.xlane.f32.xlu2 %v195_v25  ;;  %v182_v28 = vpop.xlane.xlu2 %181  ;;  %190 = vadd.xlane.f32.xlu0 %v189_v26  ;;  %v97_v31 = vpop.xlane.xlu0 %96  ;;  %v278_v54 = vmul.f32 0.5, %v277_v30 }
 0x10c   :  { %v258_v32 = vmul.f32 0.5, %v257_v22  ;;  %v218_v33 = vmul.f32 %v182_v28, %v1141_v24  ;;  %v91_v34 = vpop.xlane.xlu1 %90  ;;  %v128_v35 = vmul.f32 %v1141_v24, %v97_v31  ;;  %v424_v17 = vmul.f32 %v1303_v52, %v405_v48 }
 0x10d   :  { %v126_v37 = vmul.f32 %v1141_v24, %v91_v34  ;;  %v279_v21 = vsub.f32 1.5, %v278_v54 }
 0x10e   :  { %v259_v40 = vsub.f32 1.5, %v258_v32  ;;  %v1291_v45 = vadd.f32 1e-05, %v218_v33  ;;  %v1294_v41 = vsub.f32 %v1196_v60, %v128_v35  ;;  %v443_v32 = vadd.f32 %v1320_v18, %v424_v17 }
 0x10f   :  { %v1003_v47 = vpop.eup %1002  ;;  %v1298_v49 = vsub.f32 %v1199_v62, %v126_v37  ;;  %v280_v33 = vmul.f32 %v1262_v0, %v279_v21 }
 0x110   :  { %v260_v55 = vmul.f32 %v1001_v7, %v259_v40  ;;  %v266_v56 = vmul.f32 %v1003_v47, %v1270_v13  ;;  %1004 = vrsqrt.f32 %v1291_v45  ;;  %v160_v29 = vmul.f32 %v1294_v41, %v1294_v41 }
 0x111   :  { %v158_v57 = vmul.f32 %v1298_v49, %v1298_v49  ;;  %vm272_vm10 = vweird.f32 %v1003_v47  ;;  %vm301_vm14 = vweird.f32 %v1291_v45 }
 0x112   :  { %v264_v46 = vsel %vm263_vm7, %v1001_v7, %v260_v55  ;;  %v267_v58 = vmul.f32 %v1003_v47, %v266_v56  ;;  %v198_v14 = vsel %vm61_vm0, %v160_v29, 0.0  ;;  %vm273_vm13 = vmor %vm271_vm11, %vm272_vm10  ;;  %v284_v56 = vsel %vm1336_vm12, %v1262_v0, %v280_v33 }
 0x113   :  { %v406_v59 = vmul.f32 %v264_v46, %v1159_v39  ;;  %v1312_v61 = vpop.xlane.xlu2 %184  ;;  %v192_v8 = vsel %vm61_vm0, %v158_v57, 0.0  ;;  %v100_v15 = vpop.xlane.xlu0 %99  ;;  %199 = vadd.xlane.f32.xlu0 %v198_v14  ;;  %v408_v14 = vmul.f32 %v284_v56, %v1156_v38 }
 0x114   :  { %v268_v22 = vmul.f32 0.5, %v267_v58  ;;  %193 = vadd.xlane.f32.xlu1 %v192_v8  ;;  %v179_v7 = vpop.xlane.xlu1 %178  ;;  %v129_v39 = vmul.f32 %v1141_v24, %v100_v15 }
 0x115   :  { %v217_v25 = vmul.f32 %v179_v7, %v1141_v24  ;;  %v425_v26 = vmul.f32 %v1303_v52, %v406_v59  ;;  %v427_v38 = vmul.f32 %v1303_v52, %v408_v14  ;;  %v219_v14 = vmul.f32 %v1312_v61, %v1141_v24 }
 0x116   :  { %v1327_v27 = vpop.eup %1004  ;;  %v269_v28 = vsub.f32 1.5, %v268_v22  ;;  %v1330_v31 = vsub.f32 %v1217_v12, %v129_v39 }
 0x117   :  { %v233_v30 = vadd.f32 1e-05, %v217_v25  ;;  %v444_v42 = vadd.f32 %v1320_v18, %v425_v26  ;;  %v296_v37 = vmul.f32 %v1327_v27, %v1291_v45  ;;  %vm302_vm15 = vweird.f32 %v1327_v27 }
 0x118   :  { %v270_v35 = vmul.f32 %v1003_v47, %v269_v28  ;;  %v161_v40 = vmul.f32 %v1330_v31, %v1330_v31  ;;  %vm303_vm3 = vmor %vm301_vm14, %vm302_vm15 }
 0x119   :  { %1006 = vrsqrt.f32 %v233_v30  ;;  %v459_v13 = vpack.c.bf16 %v444_v42, %v443_v32  ;;  %v297_v57 = vmul.f32 %v1327_v27, %v296_v37  ;;  %vm291_vm1 = vweird.f32 %v233_v30 }
 0x11a   :  { %v274_v48 = vsel %vm273_vm13, %v1003_v47, %v270_v35  ;;  %v201_v54 = vsel %vm61_vm0, %v161_v40, 0.0  ;;  %v446_v37 = vadd.f32 %v1320_v18, %v427_v38  ;;  %v938_v38 = vld [vmem:[%s1735_s5 + $0x30] sm:$0xff] }
 0x11b   :  { %890 = vmatmul.msk.bf16.vlgmr.msra.gmra.mxu0 %vm61_vm0, %v459_v13  ;;  %v109_v55 = vpop.xlane.xlu2 %108  ;;  %v407_v58 = vmul.f32 %v274_v48, %v1168_v44  ;;  %v298_v0 = vmul.f32 0.5, %v297_v57 }
 0x11c   :  { %v132_v29 = vmul.f32 %v1141_v24, %v109_v55  ;;  %v103_v46 = vpop.xlane.xlu1 %102  ;;  %202 = vadd.xlane.f32.xlu1 %v201_v54 }
 0x11d   :  { %v130_v59 = vmul.f32 %v1141_v24, %v103_v46  ;;  %v426_v44 = vmul.f32 %v1303_v52, %v407_v58  ;;  %v299_v26 = vsub.f32 1.5, %v298_v0 }
 0x11e   :  { %v1354_v47 = vsub.f32 %v1228_v19, %v132_v29 }
 0x11f   :  { %v1007_v8 = vpop.eup %1006  ;;  %v1358_v15 = vsub.f32 %v1230_v20, %v130_v59  ;;  %v445_v33 = vadd.f32 %v1320_v18, %v426_v44  ;;  %v300_v40 = vmul.f32 %v1327_v27, %v299_v26 }
 0x120   :  { %v286_v17 = vmul.f32 %v1007_v8, %v233_v30  ;;  %v164_v21 = vmul.f32 %v1354_v47, %v1354_v47  ;;  %vm292_vm2 = vweird.f32 %v1007_v8 }
 0x121   :  { %v162_v22 = vmul.f32 %v1358_v15, %v1358_v15  ;;  %vm293_vm4 = vmor %vm291_vm1, %vm292_vm2  ;;  %v460_v45 = vpack.c.bf16 %v446_v37, %v445_v33  ;;  %v304_v55 = vsel %vm303_vm3, %v1327_v27, %v300_v40  ;;  %v235_v27 = vadd.f32 1e-05, %v219_v14  ;;  %v937_v40 = vld [vmem:[%s1735_s5 + $0x28] sm:$0xff] }
 0x122   :  { %v287_v7 = vmul.f32 %v1007_v8, %v286_v17  ;;  %v210_v39 = vsel %vm61_vm0, %v164_v21, 0.0  ;;  %v410_v57 = vmul.f32 %v304_v55, %v1186_v53 }
 0x123   :  { %v204_v25 = vsel %vm61_vm0, %v162_v22, 0.0  ;;  %1008 = vrsqrt.f32 %v235_v27  ;;  %vm311_vm5 = vweird.f32 %v235_v27 }
 0x124   :  { %v288_v28 = vmul.f32 0.5, %v287_v7  ;;  %205 = vadd.xlane.f32.xlu2 %v204_v25  ;;  %v106_v32 = vpop.xlane.xlu1 %105  ;;  %211 = vadd.xlane.f32.xlu1 %v210_v39  ;;  %v429_v46 = vmul.f32 %v1303_v52, %v410_v57  ;;  %v939_v7 = vld [vmem:[%s1735_s5 + $0x38] sm:$0xff] }
 0x125   :  { %v131_v42 = vmul.f32 %v1141_v24, %v106_v32  ;;  %780 = vmatpush.bf16.msra.mxu1 %v939_v7  ;;  %981 = vmatpush.bf16.msra.mxu2 %v939_v7 }
 0x126   :  { %v289_v34 = vsub.f32 1.5, %v288_v28  ;;  %v448_v59 = vadd.f32 %v1320_v18, %v429_v46  ;;  %v936_v46 = vld [vmem:[%s1735_s5 + $0x20] sm:$0xff] }
 0x127   :  { %v1373_v35 = vsub.f32 %v1236_v23, %v131_v42 }
 0x128   :  { %v290_v13 = vmul.f32 %v1007_v8, %v289_v34 }
 0x129   :  { %v163_v48 = vmul.f32 %v1373_v35, %v1373_v35  ;;  %v1009_v0 = vpop.eup %1008  ;;  %781 = vmatpush.bf16.msra.mxu1 %v938_v38  ;;  %982 = vmatpush.bf16.msra.mxu2 %v938_v38 }
 0x12a   :  { %v294_v54 = vsel %vm293_vm4, %v1007_v8, %v290_v13  ;;  %vm312_vm6 = vweird.f32 %v1009_v0 }
 0x12b   :  { %891 = vmatmul.msk.bf16.gmra.mxu0 %vm61_vm0, %v460_v45  ;;  %v207_v30 = vsel %vm61_vm0, %v163_v48, 0.0  ;;  %v409_v56 = vmul.f32 %v294_v54, %v1208_v2  ;;  %v306_v2 = vmul.f32 %v1009_v0, %v235_v27  ;;  %vm1407_vm7 = vmor %vm311_vm5, %vm312_vm6 }
 0x12c   :  { %208 = vadd.xlane.f32.xlu0 %v207_v30 }
 0x12d   :  { %v428_v29 = vmul.f32 %v1303_v52, %v409_v56  ;;  %v307_v17 = vmul.f32 %v1009_v0, %v306_v2  ;;  %782 = vmatpush.bf16.msra.mxu1 %v937_v40  ;;  %983 = vmatpush.bf16.msra.mxu2 %v937_v40 }
 0x12f   :  { %v447_v58 = vadd.f32 %v1320_v18, %v428_v29  ;;  %v308_v44 = vmul.f32 0.5, %v307_v17 }
 0x131   :  { %v461_v8 = vpack.c.bf16 %v448_v59, %v447_v58  ;;  %v309_v39 = vsub.f32 1.5, %v308_v44  ;;  %783 = vmatpush.bf16.msra.mxu1 %v936_v46  ;;  %984 = vmatpush.bf16.msra.mxu2 %v936_v46  ;;  %v1467_v46 = vld [vmem:[%s1734_s4] ss:$0 sm:$0xff] }
 0x133   :  { %v310_v34 = vmul.f32 %v1009_v0, %v309_v39 }
 0x135   :  { %v314_v48 = vsel %vm1407_vm7, %v1009_v0, %v310_v34 }
 0x136   :  { %v411_v59 = vmul.f32 %v314_v48, %v1202_v63 }
 0x138   :  { %v430_v7 = vmul.f32 %v1303_v52, %v411_v59 }
 0x13a   :  { %v449_v34 = vadd.f32 %v1320_v18, %v430_v7  ;;  %v932_v7 = vld [vmem:[%s1735_s5] sm:$0xff] }
 0x13b   :  { %892 = vmatmul.msk.bf16.gmra.mxu0 %vm61_vm0, %v461_v8 }
 0x176   :  { %v188_v53 = vpop.xlane.xlu0 %187 }
 0x177   :  { %v220_v21 = vmul.f32 %v188_v53, %v1141_v24 }
 0x179   :  { %v236_v22 = vadd.f32 1e-05, %v220_v21  ;;  %v935_v21 = vld [vmem:[%s1735_s5 + $0x18] sm:$0xff] }
 0x17a   :  { %784 = vmatpush.bf16.msra.mxu1 %v935_v21  ;;  %985 = vmatpush.bf16.msra.mxu2 %v935_v21 }
 0x17b   :  { %1010 = vrsqrt.f32 %v236_v22  ;;  %vm321_vm9 = vweird.f32 %v236_v22 }
 0x17e   :  { %v197_v25 = vpop.xlane.xlu2 %196  ;;  %v191_v61 = vpop.xlane.xlu0 %190 }
 0x17f   :  { %v223_v26 = vmul.f32 %v197_v25, %v1141_v24  ;;  %v221_v28 = vmul.f32 %v191_v61, %v1141_v24 }
 0x181   :  { %v1011_v32 = vpop.eup %1010  ;;  %v1400_v42 = vadd.f32 1e-05, %v223_v26  ;;  %v1402_v33 = vadd.f32 1e-05, %v221_v28  ;;  %v934_v28 = vld [vmem:[%s1735_s5 + $0x10] sm:$0xff] }
 0x182   :  { %v316_v37 = vmul.f32 %v1011_v32, %v236_v22  ;;  %vm322_vm8 = vweird.f32 %v1011_v32  ;;  %785 = vmatpush.bf16.msra.mxu1 %v934_v28  ;;  %986 = vmatpush.bf16.msra.mxu2 %v934_v28 }
 0x183   :  { %1012 = vrsqrt.f32 %v1400_v42  ;;  %vm323_vm10 = vmor %vm321_vm9, %vm322_vm8  ;;  %vm351_vm11 = vweird.f32 %v1400_v42  ;;  %vm331_vm13 = vweird.f32 %v1402_v33 }
 0x184   :  { %v317_v45 = vmul.f32 %v1011_v32, %v316_v37  ;;  %1014 = vrsqrt.f32 %v1402_v33 }
 0x186   :  { %v318_v54 = vmul.f32 0.5, %v317_v45  ;;  %v200_v55 = vpop.xlane.xlu0 %199 }
 0x187   :  { %v194_v30 = vpop.xlane.xlu1 %193  ;;  %v224_v29 = vmul.f32 %v200_v55, %v1141_v24 }
 0x188   :  { %v319_v56 = vsub.f32 1.5, %v318_v54  ;;  %v222_v57 = vmul.f32 %v194_v30, %v1141_v24 }
 0x189   :  { %v1420_v58 = vpop.eup %1012  ;;  %v1431_v17 = vadd.f32 1e-05, %v224_v29 }
 0x18a   :  { %v1423_v8 = vpop.eup %1014  ;;  %v320_v14 = vmul.f32 %v1011_v32, %v319_v56  ;;  %v346_v27 = vmul.f32 %v1420_v58, %v1400_v42  ;;  %v1427_v0 = vadd.f32 1e-05, %v222_v57  ;;  %vm352_vm12 = vweird.f32 %v1420_v58  ;;  %v933_v56 = vld [vmem:[%s1735_s5 + $0x8] sm:$0xff] }
 0x18b   :  { %v326_v2 = vmul.f32 %v1423_v8, %v1402_v33  ;;  %vm332_vm14 = vweird.f32 %v1423_v8  ;;  %vm1471_vm15 = vmor %vm351_vm11, %vm352_vm12  ;;  %786 = vmatpush.bf16.msra.mxu1 %v933_v56  ;;  %987 = vmatpush.bf16.msra.mxu2 %v933_v56  ;;  %vm361_vm3 = vweird.f32 %v1431_v17 }
 0x18c   :  { %v324_v53 = vsel %vm323_vm10, %v1011_v32, %v320_v14  ;;  %v347_v63 = vmul.f32 %v1420_v58, %v346_v27  ;;  %1016 = vrsqrt.f32 %v1427_v0  ;;  %vm1477_vm1 = vmor %vm331_vm13, %vm332_vm14  ;;  %vm341_vm2 = vweird.f32 %v1427_v0 }
 0x18d   :  { %v412_v22 = vmul.f32 %v324_v53, %v1253_v43  ;;  %v327_v44 = vmul.f32 %v1423_v8, %v326_v2  ;;  %1018 = vrsqrt.f32 %v1431_v17 }
 0x18e   :  { %v348_v39 = vmul.f32 0.5, %v347_v63 }
 0x18f   :  { %v328_v25 = vmul.f32 0.5, %v327_v44  ;;  %v203_v61 = vpop.xlane.xlu1 %202  ;;  %v431_v38 = vmul.f32 %v1303_v52, %v412_v22  ;;  %787 = vmatpush.bf16.msra.mxu1 %v932_v7  ;;  %988 = vmatpush.bf16.msra.mxu2 %v932_v7 }
 0x190   :  { %v225_v26 = vmul.f32 %v203_v61, %v1141_v24  ;;  %v349_v43 = vsub.f32 1.5, %v348_v39 }
 0x191   :  { %v329_v32 = vsub.f32 1.5, %v328_v25  ;;  %v450_v37 = vadd.f32 %v1320_v18, %v431_v38 }
 0x192   :  { %v1017_v40 = vpop.eup %1016  ;;  %v1450_v13 = vadd.f32 1e-05, %v225_v26  ;;  %v350_v57 = vmul.f32 %v1420_v58, %v349_v43 }
 0x193   :  { %v1019_v45 = vpop.eup %1018  ;;  %v336_v48 = vmul.f32 %v1017_v40, %v1427_v0  ;;  %v462_v54 = vpack.c.bf16 %v450_v37, %v449_v34  ;;  %v330_v30 = vmul.f32 %v1423_v8, %v329_v32  ;;  %vm342_vm4 = vweird.f32 %v1017_v40 }
 0x194   :  { %v356_v55 = vmul.f32 %v1019_v45, %v1431_v17  ;;  %1020 = vrsqrt.f32 %v1450_v13  ;;  %v354_v39 = vsel %vm1471_vm15, %v1420_v58, %v350_v57  ;;  %vm362_vm5 = vweird.f32 %v1019_v45  ;;  %vm343_vm6 = vmor %vm341_vm2, %vm342_vm4 }
 0x195   :  { %v337_v29 = vmul.f32 %v1017_v40, %v336_v48  ;;  %893 = vmatmul.msk.bf16.gmra.mxu0 %vm61_vm0, %v462_v54  ;;  %v334_v63 = vsel %vm1477_vm1, %v1423_v8, %v330_v30  ;;  %v415_v48 = vmul.f32 %v354_v39, %v1265_v1  ;;  %vm363_vm7 = vmor %vm361_vm3, %vm362_vm5  ;;  %vm371_vm8 = vweird.f32 %v1450_v13 }
 0x196   :  { %v357_v14 = vmul.f32 %v1019_v45, %v356_v55  ;;  %v413_v43 = vmul.f32 %v334_v63, %v1268_v6 }
 0x197   :  { %v338_v2 = vmul.f32 0.5, %v337_v29  ;;  %v206_v53 = vpop.xlane.xlu2 %205  ;;  %v212_v42 = vpop.xlane.xlu1 %211 }
 0x198   :  { %v358_v21 = vmul.f32 0.5, %v357_v14  ;;  %v226_v22 = vmul.f32 %v206_v53, %v1141_v24  ;;  %v228_v33 = vmul.f32 %v212_v42, %v1141_v24  ;;  %v520_v44 = vpop.f32.mrf.mxu0  ;;  %v432_v59 = vmul.f32 %v1303_v52, %v413_v43 }
 0x199   :  { %v339_v25 = vsub.f32 1.5, %v338_v2  ;;  %v1495_v61 = vadd.f32 %v1467_v46, %v520_v44 }
 0x19a   :  { %v1497_v8 = vpop.eup %1020  ;;  %v359_v38 = vsub.f32 1.5, %v358_v21  ;;  %v1499_v26 = vadd.f32 1e-05, %v226_v22  ;;  %v1501_v28 = vadd.f32 1e-05, %v228_v33  ;;  %v451_v22 = vadd.f32 %v1320_v18, %v432_v59 }
 0x19b   :  { %v340_v32 = vmul.f32 %v1017_v40, %v339_v25  ;;  %v366_v58 = vmul.f32 %v1497_v8, %v1450_v13  ;;  %v576_v34 = vmul.f32 0.044715, %v1495_v61  ;;  %vm372_vm9 = vweird.f32 %v1497_v8 }
 0x19c   :  { %v360_v37 = vmul.f32 %v1019_v45, %v359_v38  ;;  %1022 = vrsqrt.f32 %v1499_v26  ;;  %vm1540_vm10 = vmor %vm371_vm8, %vm372_vm9  ;;  %vm381_vm11 = vweird.f32 %v1499_v26  ;;  %vm401_vm1 = vweird.f32 %v1501_v28 }
 0x19d   :  { %v344_v54 = vsel %vm343_vm6, %v1017_v40, %v340_v32  ;;  %v367_v6 = vmul.f32 %v1497_v8, %v366_v58  ;;  %1024 = vrsqrt.f32 %v1501_v28  ;;  %v592_v56 = vmul.f32 %v576_v34, %v1495_v61 }
 0x19e   :  { %v414_v30 = vmul.f32 %v344_v54, %v1298_v49  ;;  %v364_v55 = vsel %vm363_vm7, %v1019_v45, %v360_v37  ;;  %v434_v49 = vmul.f32 %v1303_v52, %v415_v48 }
 0x19f   :  { %v416_v0 = vmul.f32 %v364_v55, %v1294_v41  ;;  %v368_v57 = vmul.f32 0.5, %v367_v6  ;;  %v209_v29 = vpop.xlane.xlu0 %208  ;;  %v608_v14 = vmul.f32 %v592_v56, %v1495_v61 }
 0x1a0   :  { %v227_v1 = vmul.f32 %v209_v29, %v1141_v24  ;;  %v522_v40 = vpop.f32.mrf.mxu0  ;;  %v433_v17 = vmul.f32 %v1303_v52, %v414_v30  ;;  %v453_v25 = vadd.f32 %v1320_v18, %v434_v49 }
 0x1a1   :  { %v369_v27 = vsub.f32 1.5, %v368_v57  ;;  %v1523_v2 = vadd.f32 %v1467_v46, %v522_v40  ;;  %v435_v45 = vmul.f32 %v1303_v52, %v416_v0  ;;  %v624_v33 = vadd.f32 %v608_v14, %v1495_v61 }
 0x1a2   :  { %v1023_v41 = vpop.eup %1022  ;;  %v1529_v53 = vadd.f32 1e-05, %v227_v1  ;;  %v452_v24 = vadd.f32 %v1320_v18, %v433_v17 }
 0x1a3   :  { %v1532_v42 = vpop.eup %1024  ;;  %v376_v63 = vmul.f32 %v1023_v41, %v1499_v26  ;;  %v577_v21 = vmul.f32 0.044715, %v1523_v2  ;;  %v370_v44 = vmul.f32 %v1497_v8, %v369_v27  ;;  %v454_v38 = vadd.f32 %v1320_v18, %v435_v45 }
 0x1a4   :  { %1026 = vrsqrt.f32 %v1529_v53  ;;  %v463_v39 = vpack.c.bf16 %v452_v24, %v451_v22  ;;  %v396_v43 = vmul.f32 %v1532_v42, %v1501_v28  ;;  %v640_v37 = vmul.f32 0.7978846, %v624_v33 }
 0x1a5   :  { %v377_v7 = vmul.f32 %v1023_v41, %v376_v63  ;;  %v593_v32 = vmul.f32 %v577_v21, %v1523_v2  ;;  %v464_v34 = vpack.c.bf16 %v454_v38, %v453_v25  ;;  %v374_v48 = vsel %vm1540_vm10, %v1497_v8, %v370_v44 }
 0x1a6   :  { %894 = vmatmul.msk.bf16.gmra.mxu0 %vm61_vm0, %v463_v39  ;;  %vm382_vm12 = vweird.f32 %v1023_v41  ;;  %v397_v0 = vmul.f32 %v1532_v42, %v396_v43  ;;  %1028 = vtanh.f32 %v640_v37  ;;  %v417_v8 = vmul.f32 %v374_v48, %v1330_v31 }
 0x1a7   :  { %v378_v58 = vmul.f32 0.5, %v377_v7  ;;  %v609_v6 = vmul.f32 %v593_v32, %v1523_v2  ;;  %895 = vmatmul.msk.bf16.vlgmr.msra.gmra.mxu3 %vm61_vm0, %v464_v34  ;;  %vm383_vm13 = vmor %vm381_vm11, %vm382_vm12  ;;  %vm391_vm14 = vweird.f32 %v1529_v53  ;;  %vm402_vm2 = vweird.f32 %v1532_v42 }
 0x1a8   :  { %v525_v54 = vpop.f32.mrf.mxu0  ;;  %v398_v49 = vmul.f32 0.5, %v397_v0  ;;  %v436_v24 = vmul.f32 %v1303_v52, %v417_v8  ;;  %v560_v32 = vmul.f32 0.5, %v1495_v61  ;;  %vm1585_vm4 = vmor %vm401_vm1, %vm402_vm2 }
 0x1a9   :  { %v379_v30 = vsub.f32 1.5, %v378_v58  ;;  %v1557_v55 = vadd.f32 %v1467_v46, %v525_v54  ;;  %v625_v57 = vadd.f32 %v609_v6, %v1523_v2  ;;  %v561_v58 = vmul.f32 0.5, %v1523_v2 }
 0x1aa   :  { %v1027_v56 = vpop.eup %1026  ;;  %v399_v13 = vsub.f32 1.5, %v398_v49  ;;  %v455_v39 = vadd.f32 %v1320_v18, %v436_v24 }
 0x1ab   :  { %v380_v29 = vmul.f32 %v1023_v41, %v379_v30  ;;  %v386_v59 = vmul.f32 %v1027_v56, %v1529_v53  ;;  %v578_v1 = vmul.f32 0.044715, %v1557_v55  ;;  %v641_v26 = vmul.f32 0.7978846, %v625_v57 }
 0x1ac   :  { %v1029_v63 = vpop.eup %1028  ;;  %vm392_vm15 = vweird.f32 %v1027_v56  ;;  %v400_v6 = vmul.f32 %v1532_v42, %v399_v13 }
 0x1ad   :  { %v384_v40 = vsel %vm383_vm13, %v1023_v41, %v380_v29  ;;  %v387_v17 = vmul.f32 %v1027_v56, %v386_v59  ;;  %v594_v14 = vmul.f32 %v578_v1, %v1557_v55  ;;  %1030 = vtanh.f32 %v641_v26  ;;  %vm1578_vm3 = vmor %vm391_vm14, %vm392_vm15 }
 0x1ae   :  { %v418_v27 = vmul.f32 %v384_v40, %v1358_v15  ;;  %v672_v25 = vadd.f32 1.0, %v1029_v63  ;;  %v404_v28 = vsel %vm1585_vm4, %v1532_v42, %v400_v6 }
 0x1af   :  { %v388_v45 = vmul.f32 0.5, %v387_v17  ;;  %v610_v31 = vmul.f32 %v594_v14, %v1557_v55  ;;  %v420_v14 = vmul.f32 %v404_v28, %v1354_v47 }
 0x1b0   :  { %v527_v21 = vpop.f32.mrf.mxu0  ;;  %v437_v22 = vmul.f32 %v1303_v52, %v418_v27  ;;  %v688_v0 = vmul.f32 %v672_v25, %v560_v32 }
 0x1b1   :  { %v389_v33 = vsub.f32 1.5, %v388_v45  ;;  %v528_v44 = vadd.f32 %v1467_v46, %v527_v21  ;;  %v626_v41 = vadd.f32 %v610_v31, %v1557_v55  ;;  %v439_v63 = vmul.f32 %v1303_v52, %v420_v14 }
 0x1b2   :  { %v456_v15 = vadd.f32 %v1320_v18, %v437_v22 }
 0x1b3   :  { %v579_v7 = vmul.f32 0.044715, %v528_v44  ;;  %v1031_v38 = vpop.eup %1030  ;;  %v390_v43 = vmul.f32 %v1027_v56, %v389_v33  ;;  %v642_v54 = vmul.f32 0.7978846, %v626_v41  ;;  %v562_v41 = vmul.f32 0.5, %v1557_v55 }
 0x1b4   :  { %v465_v53 = vpack.c.bf16 %v456_v15, %v455_v39  ;;  %v673_v37 = vadd.f32 1.0, %v1031_v38  ;;  %v563_v47 = vmul.f32 0.5, %v528_v44  ;;  %v458_v15 = vadd.f32 %v1320_v18, %v439_v63 }
 0x1b5   :  { %v595_v48 = vmul.f32 %v579_v7, %v528_v44  ;;  %v394_v2 = vsel %vm1578_vm3, %v1027_v56, %v390_v43  ;;  %1032 = vtanh.f32 %v642_v54 }
 0x1b6   :  { %v689_v61 = vmul.f32 %v673_v37, %v561_v58  ;;  %v419_v26 = vmul.f32 %v394_v2, %v1373_v35 }
 0x1b7   :  { %v611_v57 = vmul.f32 %v595_v48, %v528_v44  ;;  %896 = vmatmul.msk.bf16.gmra.mxu3 %vm61_vm0, %v465_v53 }
 0x1b8   :  { %v530_v8 = vpop.f32.mrf.mxu0  ;;  %v704_v59 = vpack.c.bf16 %v689_v61, %v688_v0  ;;  %v438_v49 = vmul.f32 %v1303_v52, %v419_v26 }
 0x1b9   :  { %v531_v29 = vadd.f32 %v1467_v46, %v530_v8  ;;  %v627_v1 = vadd.f32 %v611_v57, %v528_v44 }
 0x1ba   :  { %788 = vmatmul.bf16.vlgmr.msra.gmra.mxu1 %v704_v59  ;;  %v457_v33 = vadd.f32 %v1320_v18, %v438_v49 }
 0x1bb   :  { %v580_v40 = vmul.f32 0.044715, %v531_v29  ;;  %v643_v17 = vmul.f32 0.7978846, %v627_v1  ;;  %v1033_v27 = vpop.eup %1032  ;;  %v564_v37 = vmul.f32 0.5, %v531_v29 }
 0x1bc   :  { %v674_v42 = vadd.f32 1.0, %v1033_v27  ;;  %v466_v43 = vpack.c.bf16 %v458_v15, %v457_v33 }
 0x1bd   :  { %1034 = vtanh.f32 %v643_v17  ;;  %v596_v56 = vmul.f32 %v580_v40, %v531_v29 }
 0x1be   :  { %v690_v25 = vmul.f32 %v674_v42, %v562_v41 }
 0x1bf   :  { %v612_v45 = vmul.f32 %v596_v56, %v531_v29 }
 0x1c0   :  { %v532_v24 = vpop.f32.mrf.mxu0 }
 0x1c1   :  { %v533_v31 = vadd.f32 %v1467_v46, %v532_v24  ;;  %v628_v21 = vadd.f32 %v612_v45, %v531_v29 }
 0x1c3   :  { %v1035_v22 = vpop.eup %1034  ;;  %v581_v35 = vmul.f32 0.044715, %v533_v31  ;;  %v644_v39 = vmul.f32 0.7978846, %v628_v21  ;;  %v565_v48 = vmul.f32 0.5, %v533_v31 }
 0x1c4   :  { %v675_v13 = vadd.f32 1.0, %v1035_v22 }
 0x1c5   :  { %v597_v7 = vmul.f32 %v581_v35, %v533_v31  ;;  %1036 = vtanh.f32 %v644_v39 }
 0x1c6   :  { %v691_v38 = vmul.f32 %v675_v13, %v563_v47 }
 0x1c7   :  { %v613_v32 = vmul.f32 %v597_v7, %v533_v31  ;;  %897 = vmatmul.msk.bf16.gmra.mxu3 %vm61_vm0, %v466_v43  ;;  %vm861_vm0 = vcmask 257024  }
 0x1c8   :  { %v705_v58 = vpack.c.bf16 %v691_v38, %v690_v25 }
 0x1c9   :  { %v629_v52 = vadd.f32 %v613_v32, %v533_v31 }
 0x1ca   :  { %793 = vmatmul.bf16.gmra.mxu1 %v705_v58 }
 0x1cb   :  { %v645_v34 = vmul.f32 0.7978846, %v629_v52  ;;  %v1037_v53 = vpop.eup %1036 }
 0x1cc   :  { %v676_v55 = vadd.f32 1.0, %v1037_v53 }
 0x1cd   :  { %1038 = vtanh.f32 %v645_v34 }
 0x1ce   :  { %v692_v54 = vmul.f32 %v676_v55, %v564_v37 }
 0x1d3   :  { %v1039_v44 = vpop.eup %1038 }
 0x1d4   :  { %v677_v18 = vadd.f32 1.0, %v1039_v44  ;;  %v1617_v44 = vld [vmem:[%s1736_s6] ss:$0 sm:$0xff] }
 0x1d6   :  { %v693_v6 = vmul.f32 %v677_v18, %v565_v48 }
 0x1d8   :  { %v706_v30 = vpack.c.bf16 %v693_v6, %v692_v54 }
 0x1da   :  { %798 = vmatmul.bf16.gmra.mxu1 %v706_v30 }
 0x212   :  { %v535_v0 = vpop.f32.mrf.mxu0 }
 0x213   :  { %v536_v61 = vadd.f32 %v1467_v46, %v535_v0 }
 0x215   :  { %v582_v57 = vmul.f32 0.044715, %v536_v61  ;;  %v566_v13 = vmul.f32 0.5, %v536_v61 }
 0x217   :  { %v598_v2 = vmul.f32 %v582_v57, %v536_v61 }
 0x219   :  { %v614_v8 = vmul.f32 %v598_v2, %v536_v61 }
 0x21a   :  { %v537_v59 = vpop.f32.mrf.mxu0 }
 0x21b   :  { %v538_v1 = vadd.f32 %v1467_v46, %v537_v59  ;;  %v630_v28 = vadd.f32 %v614_v8, %v536_v61 }
 0x21d   :  { %v583_v26 = vmul.f32 0.044715, %v538_v1  ;;  %v646_v17 = vmul.f32 0.7978846, %v630_v28  ;;  %v567_v15 = vmul.f32 0.5, %v538_v1 }
 0x21f   :  { %v599_v40 = vmul.f32 %v583_v26, %v538_v1  ;;  %1040 = vtanh.f32 %v646_v17 }
 0x221   :  { %v615_v29 = vmul.f32 %v599_v40, %v538_v1 }
 0x223   :  { %v631_v14 = vadd.f32 %v615_v29, %v538_v1  ;;  %v540_v56 = vpop.f32.mrf.mxu0 }
 0x224   :  { %v541_v27 = vadd.f32 %v1467_v46, %v540_v56 }
 0x225   :  { %v647_v49 = vmul.f32 0.7978846, %v631_v14  ;;  %v1041_v24 = vpop.eup %1040 }
 0x226   :  { %v584_v45 = vmul.f32 0.044715, %v541_v27  ;;  %v678_v22 = vadd.f32 1.0, %v1041_v24 }
 0x227   :  { %1042 = vtanh.f32 %v647_v49 }
 0x228   :  { %v600_v31 = vmul.f32 %v584_v45, %v541_v27  ;;  %v694_v25 = vmul.f32 %v678_v22, %v566_v13 }
 0x22a   :  { %v616_v63 = vmul.f32 %v600_v31, %v541_v27  ;;  %v545_v21 = vpop.f32.mrf.mxu3 }
 0x22b   :  { %v542_v42 = vpop.f32.mrf.mxu0  ;;  %v1609_v33 = vadd.f32 %v1467_v46, %v545_v21 }
 0x22c   :  { %v543_v41 = vadd.f32 %v1467_v46, %v542_v42  ;;  %v632_v47 = vadd.f32 %v616_v63, %v541_v27 }
 0x22d   :  { %v1043_v35 = vpop.eup %1042  ;;  %v586_v43 = vmul.f32 0.044715, %v1609_v33 }
 0x22e   :  { %v679_v7 = vadd.f32 1.0, %v1043_v35  ;;  %v585_v39 = vmul.f32 0.044715, %v543_v41  ;;  %v648_v58 = vmul.f32 0.7978846, %v632_v47  ;;  %v569_v49 = vmul.f32 0.5, %v543_v41 }
 0x22f   :  { %v602_v48 = vmul.f32 %v586_v43, %v1609_v33 }
 0x230   :  { %v695_v38 = vmul.f32 %v679_v7, %v567_v15  ;;  %v601_v32 = vmul.f32 %v585_v39, %v543_v41  ;;  %1044 = vtanh.f32 %v648_v58 }
 0x231   :  { %v618_v61 = vmul.f32 %v602_v48, %v1609_v33 }
 0x232   :  { %v707_v52 = vpack.c.bf16 %v695_v38, %v694_v25  ;;  %v617_v34 = vmul.f32 %v601_v32, %v543_v41  ;;  %v547_v53 = vpop.f32.mrf.mxu3 }
 0x233   :  { %v548_v55 = vadd.f32 %v1467_v46, %v547_v53  ;;  %v634_v26 = vadd.f32 %v618_v61, %v1609_v33 }
 0x234   :  { %803 = vmatmul.bf16.gmra.mxu1 %v707_v52  ;;  %v633_v37 = vadd.f32 %v617_v34, %v543_v41 }
 0x235   :  { %v587_v18 = vmul.f32 0.044715, %v548_v55  ;;  %v650_v63 = vmul.f32 0.7978846, %v634_v26 }
 0x236   :  { %v649_v54 = vmul.f32 0.7978846, %v633_v37  ;;  %v1045_v57 = vpop.eup %1044 }
 0x237   :  { %v789_v6 = vpop.f32.mrf.mxu1  ;;  %v603_v0 = vmul.f32 %v587_v18, %v548_v55  ;;  %v680_v17 = vadd.f32 1.0, %v1045_v57 }
 0x238   :  { %v790_v30 = vadd.f32 %v1617_v44, %v789_v6  ;;  %1046 = vtanh.f32 %v649_v54  ;;  %v571_v54 = vmul.f32 0.5, %v548_v55 }
 0x239   :  { %v619_v8 = vmul.f32 %v603_v0, %v548_v55 }
 0x23a   :  { %v829_v2 = vadd.f32 %v1112_v4, %v790_v30  ;;  %v550_v59 = vpop.f32.mrf.mxu3  ;;  %v568_v4 = vmul.f32 0.5, %v541_v27 }
 0x23b   :  { %v1624_v28 = vadd.f32 %v1467_v46, %v550_v59  ;;  %v635_v40 = vadd.f32 %v619_v8, %v548_v55 }
 0x23c   :  { %v845_v1 = vpack.c.bf16 %v829_v2, %v829_v2  ;;  %v696_v21 = vmul.f32 %v680_v17, %v568_v4 }
 0x23d   :  { %v651_v14 = vmul.f32 0.7978846, %v635_v40  ;;  %v588_v24 = vmul.f32 0.044715, %v1624_v28 }
 0x23e   :  { %v1047_v29 = vpop.eup %1046  ;;  %862 = vst.msk [vmem:[%s1737_s7] sm:$0xf] %vm861_vm0, %v845_v1 }
 0x23f   :  { %v791_v56 = vpop.f32.mrf.mxu1  ;;  %v681_v45 = vadd.f32 1.0, %v1047_v29  ;;  %1048 = vtanh.f32 %v651_v14  ;;  %v604_v27 = vmul.f32 %v588_v24, %v1624_v28 }
 0x240   :  { %v792_v31 = vadd.f32 %v1617_v44, %v791_v56  ;;  %1050 = vtanh.f32 %v650_v63 }
 0x241   :  { %v697_v42 = vmul.f32 %v681_v45, %v569_v49  ;;  %v620_v38 = vmul.f32 %v604_v27, %v1624_v28  ;;  %v572_v27 = vmul.f32 0.5, %v1624_v28 }
 0x242   :  { %v830_v22 = vadd.f32 %v1124_v10, %v792_v31  ;;  %v552_v35 = vpop.f32.mrf.mxu3 }
 0x243   :  { %v708_v47 = vpack.c.bf16 %v697_v42, %v696_v21  ;;  %v553_v15 = vadd.f32 %v1467_v46, %v552_v35  ;;  %v636_v48 = vadd.f32 %v620_v38, %v1624_v28 }
 0x244   :  { %v846_v13 = vpack.c.bf16 %v830_v22, %v830_v22 }
 0x245   :  { %808 = vmatmul.bf16.vlgmr.msra.gmra.mxu2 %v708_v47  ;;  %v589_v41 = vmul.f32 0.044715, %v553_v15  ;;  %v1049_v39 = vpop.eup %1048  ;;  %v652_v8 = vmul.f32 0.7978846, %v636_v48  ;;  %v573_v22 = vmul.f32 0.5, %v553_v15 }
 0x246   :  { %863 = vst.msk [vmem:[%s1737_s7 + $0x4] sm:$0xf] %vm861_vm0, %v846_v13  ;;  %v1051_v43 = vpop.eup %1050  ;;  %v683_v34 = vadd.f32 1.0, %v1049_v39 }
 0x247   :  { %v794_v7 = vpop.f32.mrf.mxu1  ;;  %v605_v25 = vmul.f32 %v589_v41, %v553_v15  ;;  %v682_v6 = vadd.f32 1.0, %v1051_v43 }
 0x248   :  { %v795_v10 = vadd.f32 %v1617_v44, %v794_v7  ;;  %v699_v61 = vmul.f32 %v683_v34, %v571_v54 }
 0x249   :  { %v621_v58 = vmul.f32 %v605_v25, %v553_v15 }
 0x24a   :  { %v831_v32 = vadd.f32 %v1110_v3, %v795_v10  ;;  %v555_v52 = vpop.f32.mrf.mxu3  ;;  %v570_v3 = vmul.f32 0.5, %v1609_v33 }
 0x24b   :  { %v556_v37 = vadd.f32 %v1467_v46, %v555_v52  ;;  %v637_v18 = vadd.f32 %v621_v58, %v553_v15 }
 0x24c   :  { %v847_v53 = vpack.c.bf16 %v831_v32, %v831_v32  ;;  %v698_v59 = vmul.f32 %v682_v6, %v570_v3 }
 0x24d   :  { %v653_v30 = vmul.f32 0.7978846, %v637_v18  ;;  %v590_v57 = vmul.f32 0.044715, %v556_v37  ;;  %v574_v52 = vmul.f32 0.5, %v556_v37 }
 0x24e   :  { %864 = vst.msk [vmem:[%s1737_s7 + $0x8] sm:$0xf] %vm861_vm0, %v847_v53  ;;  %v709_v26 = vpack.c.bf16 %v699_v61, %v698_v59 }
 0x24f   :  { %v796_v0 = vpop.f32.mrf.mxu1  ;;  %1052 = vtanh.f32 %v653_v30  ;;  %v606_v29 = vmul.f32 %v590_v57, %v556_v37 }
 0x250   :  { %v797_v2 = vadd.f32 %v1617_v44, %v796_v0  ;;  %1054 = vtanh.f32 %v652_v8 }
 0x251   :  { %v622_v49 = vmul.f32 %v606_v29, %v556_v37 }
 0x252   :  { %v832_v1 = vadd.f32 %v1122_v9, %v797_v2  ;;  %v557_v55 = vpop.f32.mrf.mxu3 }
 0x253   :  { %v558_v17 = vadd.f32 %v1467_v46, %v557_v55  ;;  %v638_v21 = vadd.f32 %v622_v49, %v556_v37 }
 0x254   :  { %v848_v40 = vpack.c.bf16 %v832_v1, %v832_v1 }
 0x255   :  { %813 = vmatmul.bf16.gmra.mxu2 %v709_v26  ;;  %v591_v33 = vmul.f32 0.044715, %v558_v17  ;;  %v1053_v56 = vpop.eup %1052  ;;  %v575_v32 = vmul.f32 0.5, %v558_v17 }
 0x256   :  { %865 = vst.msk [vmem:[%s1737_s7 + $0xc] sm:$0xf] %vm861_vm0, %v848_v40  ;;  %v1055_v45 = vpop.eup %1054  ;;  %v685_v46 = vadd.f32 1.0, %v1053_v56 }
 0x257   :  { %v799_v14 = vpop.f32.mrf.mxu1  ;;  %v607_v9 = vmul.f32 %v591_v33, %v558_v17  ;;  %v684_v35 = vadd.f32 1.0, %v1055_v45 }
 0x258   :  { %v800_v4 = vadd.f32 %v1617_v44, %v799_v14  ;;  %v701_v41 = vmul.f32 %v685_v46, %v573_v22 }
 0x259   :  { %v623_v31 = vmul.f32 %v607_v9, %v558_v17  ;;  %v700_v39 = vmul.f32 %v684_v35, %v572_v27 }
 0x25a   :  { %v833_v24 = vadd.f32 %v1114_v5, %v800_v4  ;;  %v654_v5 = vmul.f32 0.7978846, %v638_v21 }
 0x25b   :  { %v639_v42 = vadd.f32 %v623_v31, %v558_v17  ;;  %v710_v25 = vpack.c.bf16 %v701_v41, %v700_v39 }
 0x25c   :  { %v849_v63 = vpack.c.bf16 %v833_v24, %v833_v24 }
 0x25d   :  { %v655_v47 = vmul.f32 0.7978846, %v639_v42 }
 0x25e   :  { %866 = vst.msk [vmem:[%s1737_s7 + $0x10] sm:$0xf] %vm861_vm0, %v849_v63 }
 0x25f   :  { %v801_v13 = vpop.f32.mrf.mxu1  ;;  %1056 = vtanh.f32 %v655_v47 }
 0x260   :  { %v802_v7 = vadd.f32 %v1617_v44, %v801_v13  ;;  %1058 = vtanh.f32 %v654_v5 }
 0x262   :  { %v834_v10 = vadd.f32 %v1126_v11, %v802_v7 }
 0x264   :  { %v850_v15 = vpack.c.bf16 %v834_v10, %v834_v10 }
 0x265   :  { %818 = vmatmul.bf16.gmra.mxu2 %v710_v25  ;;  %v1057_v38 = vpop.eup %1056 }
 0x266   :  { %867 = vst.msk [vmem:[%s1737_s7 + $0x14] sm:$0xf] %vm861_vm0, %v850_v15  ;;  %v1059_v43 = vpop.eup %1058  ;;  %v687_v28 = vadd.f32 1.0, %v1057_v38 }
 0x267   :  { %v686_v58 = vadd.f32 1.0, %v1059_v43 }
 0x268   :  { %v703_v34 = vmul.f32 %v687_v28, %v575_v32 }
 0x269   :  { %v702_v53 = vmul.f32 %v686_v58, %v574_v52 }
 0x26b   :  { %v711_v48 = vpack.c.bf16 %v703_v34, %v702_v53 }
 0x275   :  { %823 = vmatmul.bf16.gmra.mxu2 %v711_v48 }
 0x2b1   :  { %v804_v11 = vpop.f32.mrf.mxu1 }
 0x2b2   :  { %v805_v18 = vadd.f32 %v1617_v44, %v804_v11 }
 0x2b4   :  { %v835_v54 = vadd.f32 %v1137_v16, %v805_v18 }
 0x2b6   :  { %v851_v6 = vpack.c.bf16 %v835_v54, %v835_v54 }
 0x2b8   :  { %868 = vst.msk [vmem:[%s1737_s7 + $0x18] sm:$0xf] %vm861_vm0, %v851_v6 }
 0x2b9   :  { %v806_v30 = vpop.f32.mrf.mxu1 }
 0x2ba   :  { %v807_v0 = vadd.f32 %v1617_v44, %v806_v30 }
 0x2bc   :  { %v836_v37 = vadd.f32 %v1152_v36, %v807_v0 }
 0x2be   :  { %v852_v3 = vpack.c.bf16 %v836_v37, %v836_v37 }
 0x2c0   :  { %869 = vst.msk [vmem:[%s1737_s7 + $0x1c] sm:$0xf] %vm861_vm0, %v852_v3 }
 0x2c8   :  { %v809_v61 = vpop.f32.mrf.mxu2 }
 0x2c9   :  { %v810_v16 = vadd.f32 %v1617_v44, %v809_v61 }
 0x2cb   :  { %v837_v57 = vadd.f32 %v1181_v51, %v810_v16 }
 0x2cd   :  { %v853_v2 = vpack.c.bf16 %v837_v57, %v837_v57 }
 0x2cf   :  { %870 = vst.msk [vmem:[%s1737_s7 + $0x20] sm:$0xf] %vm861_vm0, %v853_v2 }
 0x2d0   :  { %v811_v8 = vpop.f32.mrf.mxu2 }
 0x2d1   :  { %v812_v36 = vadd.f32 %v1617_v44, %v811_v8 }
 0x2d3   :  { %v838_v59 = vadd.f32 %v1199_v62, %v812_v36 }
 0x2d5   :  { %v854_v1 = vpack.c.bf16 %v838_v59, %v838_v59 }
 0x2d7   :  { %871 = vst.msk [vmem:[%s1737_s7 + $0x24] sm:$0xf] %vm861_vm0, %v854_v1 }
 0x2d8   :  { %v814_v55 = vpop.f32.mrf.mxu2 }
 0x2d9   :  { %v815_v51 = vadd.f32 %v1617_v44, %v814_v55 }
 0x2db   :  { %v839_v26 = vadd.f32 %v1179_v50, %v815_v51 }
 0x2dd   :  { %v855_v40 = vpack.c.bf16 %v839_v26, %v839_v26 }
 0x2df   :  { %872 = vst.msk [vmem:[%s1737_s7 + $0x28] sm:$0xf] %vm861_vm0, %v855_v40 }
 0x2e0   :  { %v816_v17 = vpop.f32.mrf.mxu2 }
 0x2e1   :  { %v817_v62 = vadd.f32 %v1617_v44, %v816_v17 }
 0x2e3   :  { %v840_v29 = vadd.f32 %v1196_v60, %v817_v62 }
 0x2e5   :  { %v856_v33 = vpack.c.bf16 %v840_v29, %v840_v29 }
 0x2e7   :  { %873 = vst.msk [vmem:[%s1737_s7 + $0x2c] sm:$0xf] %vm861_vm0, %v856_v33 }
 0x2e8   :  { %v819_v14 = vpop.f32.mrf.mxu2 }
 0x2e9   :  { %v820_v50 = vadd.f32 %v1617_v44, %v819_v14 }
 0x2eb   :  { %v841_v56 = vadd.f32 %v1217_v12, %v820_v50 }
 0x2ed   :  { %v857_v4 = vpack.c.bf16 %v841_v56, %v841_v56 }
 0x2ef   :  { %874 = vst.msk [vmem:[%s1737_s7 + $0x30] sm:$0xf] %vm861_vm0, %v857_v4 }
 0x2f0   :  { %v821_v9 = vpop.f32.mrf.mxu2 }
 0x2f1   :  { %v822_v60 = vadd.f32 %v1617_v44, %v821_v9 }
 0x2f3   :  { %v842_v49 = vadd.f32 %v1230_v20, %v822_v60 }
 0x2f5   :  { %v858_v45 = vpack.c.bf16 %v842_v49, %v842_v49 }
 0x2f7   :  { %875 = vst.msk [vmem:[%s1737_s7 + $0x34] sm:$0xf] %vm861_vm0, %v858_v45 }
 0x2f8   :  { %v824_v24 = vpop.f32.mrf.mxu2 }
 0x2f9   :  { %v825_v12 = vadd.f32 %v1617_v44, %v824_v24 }
 0x2fb   :  { %v843_v31 = vadd.f32 %v1236_v23, %v825_v12 }
 0x2fd   :  { %v859_v46 = vpack.c.bf16 %v843_v31, %v843_v31 }
 0x2ff   :  { %876 = vst.msk [vmem:[%s1737_s7 + $0x38] sm:$0xf] %vm861_vm0, %v859_v46 }
 0x300   :  { %v826_v63 = vpop.f32.mrf.mxu2 }
 0x301   :  { %v827_v20 = vadd.f32 %v1617_v44, %v826_v63 }
 0x303   :  { %v844_v21 = vadd.f32 %v1228_v19, %v827_v20 }
 0x305   :  { %v860_v42 = vpack.c.bf16 %v844_v21, %v844_v21 }
 0x307   :  { %877 = vst.msk [vmem:[%s1737_s7 + $0x3c] sm:$0xf] %vm861_vm0, %v860_v42 }

// kernel: _lambda_.24
= control target key start
LH: loop header
LB: loop body
LE: loop exit
PB: predicated region body
PF: predicated region fallthrough
CT: control target
= control target key end

     0   :  { %v296_v6 = vmov 128.0   ;;  %vm217_vm13 = vcmask 519168   ;;  %s390_s0 = inlined_call_operand.vmem [shape: bf16[32,128], index: 0, kind: input, shape index: {}]   ;;  %s391_s1 = inlined_call_operand.vmem [shape: f32[1,128], index: 1, kind: input, shape index: {}]   ;;  %s392_s2 = inlined_call_operand.vmem [shape: f32[1,128], index: 2, kind: input, shape index: {}]   ;;  %s393_s3 = inlined_call_operand.vmem [shape: bf16[128,64], index: 3, kind: input, shape index: {}]   ;;  %s394_s4 = inlined_call_operand.vmem [shape: bf16[32,64], index: 4, kind: output, shape index: {}]  }
   0x1   :  { %v274_v0 = vld [vmem:[%s390_s0 + $0x8] sm:$0xff]   ;;  %v267_v1 = vld [vmem:[%s390_s0] sm:$0xff]   ;;  %286 = vrcp.f32 %v296_v6  ;;  %v265_v29 = vld [vmem:[%s393_s3 + $0x38] sm:$0xff] }
   0x2   :  { %v272_v2 = vunpack.c.l.bf16 %v274_v0  ;;  %v268_v3 = vunpack.c.l.bf16 %v267_v1  ;;  %v273_v4 = vunpack.c.h.bf16 %v274_v0  ;;  %v269_v5 = vunpack.c.h.bf16 %v267_v1  ;;  %194 = vmatpush.bf16.msra.mxu0 %v265_v29  ;;  %275 = vmatpush.bf16.msra.mxu1 %v265_v29  ;;  %v264_v30 = vld [vmem:[%s393_s3 + $0x30] sm:$0xff]  ;;  %v263_v31 = vld [vmem:[%s393_s3 + $0x28] sm:$0xff]  ;;  %v262_v32 = vld [vmem:[%s393_s3 + $0x20] sm:$0xff] }
   0x3   :  { %v261_v33 = vld [vmem:[%s393_s3 + $0x18] sm:$0xff]  ;;  %v260_v34 = vld [vmem:[%s393_s3 + $0x10] sm:$0xff]  ;;  %v259_v35 = vld [vmem:[%s393_s3 + $0x8] sm:$0xff] }
   0x4   :  { %31 = vadd.xlane.f32.xlu1 %v272_v2  ;;  %27 = vadd.xlane.f32.xlu0 %v268_v3  ;;  %v258_v40 = vld [vmem:[%s393_s3] sm:$0xff] }
   0x6   :  { %195 = vmatpush.bf16.msra.mxu0 %v264_v30  ;;  %276 = vmatpush.bf16.msra.mxu1 %v264_v30 }
   0x7   :  { %v287_v7 = vpop.eup %286 }
   0x8   :  { %v36_v8 = vmul.f32 128.0, %v287_v7  ;;  %vm40_vm0 = vweird.f32 %v287_v7 }
   0xa   :  { %v37_v9 = vsub.f32 1.0, %v36_v8  ;;  %196 = vmatpush.bf16.msra.mxu0 %v263_v31  ;;  %277 = vmatpush.bf16.msra.mxu1 %v263_v31 }
   0xc   :  { %33 = vadd.xlane.f32.xlu1 %v273_v4  ;;  %29 = vadd.xlane.f32.xlu0 %v269_v5  ;;  %v38_v10 = vmul.f32 %v287_v7, %v37_v9  ;;  %v284_v9 = vld [vmem:[%s391_s1] ss:$0 sm:$0xff] }
   0xe   :  { %v39_v11 = vadd.f32 %v287_v7, %v38_v10  ;;  %197 = vmatpush.bf16.msra.mxu0 %v262_v32  ;;  %278 = vmatpush.bf16.msra.mxu1 %v262_v32 }
  0x10   :  { %v41_v12 = vsel %vm40_vm0, %v287_v7, %v39_v11 }
  0x12   :  { %198 = vmatpush.bf16.msra.mxu0 %v261_v33  ;;  %279 = vmatpush.bf16.msra.mxu1 %v261_v33 }
  0x16   :  { %199 = vmatpush.bf16.msra.mxu0 %v260_v34  ;;  %280 = vmatpush.bf16.msra.mxu1 %v260_v34 }
  0x1a   :  { %200 = vmatpush.bf16.msra.mxu0 %v259_v35  ;;  %281 = vmatpush.bf16.msra.mxu1 %v259_v35 }
  0x1e   :  { %201 = vmatpush.bf16.msra.mxu0 %v258_v40  ;;  %282 = vmatpush.bf16.msra.mxu1 %v258_v40 }
  0x77   :  { %v32_v13 = vpop.xlane.xlu1 %31  ;;  %v28_v14 = vpop.xlane.xlu0 %27 }
  0x78   :  { %v44_v15 = vmul.f32 %v41_v12, %v32_v13  ;;  %v42_v16 = vmul.f32 %v41_v12, %v28_v14 }
  0x7a   :  { %v328_v17 = vsub.f32 %v272_v2, %v44_v15  ;;  %v330_v18 = vsub.f32 %v268_v3, %v42_v16  ;;  %v285_v16 = vld [vmem:[%s392_s2] ss:$0 sm:$0xff] }
  0x7c   :  { %v52_v19 = vmul.f32 %v328_v17, %v328_v17  ;;  %v50_v20 = vmul.f32 %v330_v18, %v330_v18 }
  0x7e   :  { %58 = vadd.xlane.f32.xlu0 %v52_v19  ;;  %54 = vadd.xlane.f32.xlu2 %v50_v20 }
  0x7f   :  { %v34_v21 = vpop.xlane.xlu1 %33  ;;  %v30_v22 = vpop.xlane.xlu0 %29 }
  0x80   :  { %v45_v23 = vmul.f32 %v41_v12, %v34_v21  ;;  %v43_v24 = vmul.f32 %v41_v12, %v30_v22 }
  0x82   :  { %v336_v25 = vsub.f32 %v273_v4, %v45_v23  ;;  %v338_v26 = vsub.f32 %v269_v5, %v43_v24 }
  0x84   :  { %v53_v27 = vmul.f32 %v336_v25, %v336_v25  ;;  %v51_v28 = vmul.f32 %v338_v26, %v338_v26 }
  0x86   :  { %60 = vadd.xlane.f32.xlu1 %v53_v27  ;;  %56 = vadd.xlane.f32.xlu2 %v51_v28 }
  0xf1   :  { %v55_v36 = vpop.xlane.xlu2 %54  ;;  %v59_v37 = vpop.xlane.xlu0 %58 }
  0xf2   :  { %v62_v38 = vmul.f32 %v55_v36, %v41_v12  ;;  %v64_v39 = vmul.f32 %v59_v37, %v41_v12 }
  0xf4   :  { %v66_v41 = vadd.f32 1e-05, %v62_v38  ;;  %v68_v42 = vadd.f32 1e-05, %v64_v39 }
  0xf6   :  { %288 = vrsqrt.f32 %v66_v41  ;;  %vm96_vm3 = vweird.f32 %v68_v42  ;;  %vm76_vm4 = vweird.f32 %v66_v41 }
  0xf7   :  { %290 = vrsqrt.f32 %v68_v42 }
  0xf9   :  { %v61_v43 = vpop.xlane.xlu1 %60  ;;  %v57_v44 = vpop.xlane.xlu2 %56 }
  0xfa   :  { %v65_v45 = vmul.f32 %v61_v43, %v41_v12  ;;  %v63_v46 = vmul.f32 %v57_v44, %v41_v12 }
  0xfc   :  { %v289_v47 = vpop.eup %288  ;;  %v69_v48 = vadd.f32 1e-05, %v65_v45  ;;  %v67_v49 = vadd.f32 1e-05, %v63_v46 }
  0xfd   :  { %v291_v50 = vpop.eup %290  ;;  %v71_v51 = vmul.f32 %v289_v47, %v66_v41  ;;  %vm77_vm2 = vweird.f32 %v289_v47 }
  0xfe   :  { %v91_v52 = vmul.f32 %v291_v50, %v68_v42  ;;  %292 = vrsqrt.f32 %v69_v48  ;;  %vm97_vm1 = vweird.f32 %v291_v50  ;;  %vm78_vm6 = vmor %vm76_vm4, %vm77_vm2  ;;  %vm106_vm9 = vweird.f32 %v69_v48 }
  0xff   :  { %v72_v53 = vmul.f32 %v289_v47, %v71_v51  ;;  %294 = vrsqrt.f32 %v67_v49  ;;  %vm98_vm5 = vmor %vm96_vm3, %vm97_vm1  ;;  %vm86_vm11 = vweird.f32 %v67_v49 }
 0x100   :  { %v92_v54 = vmul.f32 %v291_v50, %v91_v52 }
 0x101   :  { %v73_v55 = vmul.f32 0.5, %v72_v53 }
 0x102   :  { %v93_v56 = vmul.f32 0.5, %v92_v54 }
 0x103   :  { %v74_v57 = vsub.f32 1.5, %v73_v55 }
 0x104   :  { %v293_v58 = vpop.eup %292  ;;  %v94_v59 = vsub.f32 1.5, %v93_v56 }
 0x105   :  { %v295_v60 = vpop.eup %294  ;;  %v101_v61 = vmul.f32 %v293_v58, %v69_v48  ;;  %v75_v62 = vmul.f32 %v289_v47, %v74_v57  ;;  %vm107_vm7 = vweird.f32 %v293_v58 }
 0x106   :  { %v95_v63 = vmul.f32 %v291_v50, %v94_v59  ;;  %v81_v0 = vmul.f32 %v295_v60, %v67_v49  ;;  %vm87_vm8 = vweird.f32 %v295_v60  ;;  %vm108_vm10 = vmor %vm106_vm9, %vm107_vm7 }
 0x107   :  { %v102_v1 = vmul.f32 %v293_v58, %v101_v61  ;;  %v79_v6 = vsel %vm78_vm6, %v289_v47, %v75_v62  ;;  %vm88_vm12 = vmor %vm86_vm11, %vm87_vm8 }
 0x108   :  { %v82_v2 = vmul.f32 %v295_v60, %v81_v0  ;;  %v99_v4 = vsel %vm98_vm5, %v291_v50, %v95_v63  ;;  %v110_v12 = vmul.f32 %v79_v6, %v330_v18 }
 0x109   :  { %v103_v3 = vmul.f32 0.5, %v102_v1  ;;  %v112_v10 = vmul.f32 %v99_v4, %v328_v17 }
 0x10a   :  { %v83_v5 = vmul.f32 0.5, %v82_v2  ;;  %v117_v17 = vmul.f32 %v284_v9, %v110_v12 }
 0x10b   :  { %v104_v7 = vsub.f32 1.5, %v103_v3  ;;  %v119_v20 = vmul.f32 %v284_v9, %v112_v10 }
 0x10c   :  { %v84_v8 = vsub.f32 1.5, %v83_v5  ;;  %v124_v27 = vadd.f32 %v285_v16, %v117_v17 }
 0x10d   :  { %v105_v11 = vmul.f32 %v293_v58, %v104_v7  ;;  %v126_v24 = vadd.f32 %v285_v16, %v119_v20 }
 0x10e   :  { %v85_v13 = vmul.f32 %v295_v60, %v84_v8 }
 0x10f   :  { %v109_v14 = vsel %vm108_vm10, %v293_v58, %v105_v11 }
 0x110   :  { %v89_v15 = vsel %vm88_vm12, %v295_v60, %v85_v13  ;;  %v113_v19 = vmul.f32 %v109_v14, %v336_v25 }
 0x111   :  { %v111_v21 = vmul.f32 %v89_v15, %v338_v26 }
 0x112   :  { %v120_v22 = vmul.f32 %v284_v9, %v113_v19 }
 0x113   :  { %v118_v23 = vmul.f32 %v284_v9, %v111_v21 }
 0x114   :  { %v127_v18 = vadd.f32 %v285_v16, %v120_v22 }
 0x115   :  { %v125_v28 = vadd.f32 %v285_v16, %v118_v23 }
 0x116   :  { %v129_v29 = vpack.c.bf16 %v127_v18, %v126_v24 }
 0x117   :  { %v128_v30 = vpack.c.bf16 %v125_v28, %v124_v27 }
 0x118   :  { %207 = vmatmul.bf16.vlgmr.msra.gmra.mxu1 %v129_v29 }
 0x119   :  { %202 = vmatmul.bf16.vlgmr.msra.gmra.mxu0 %v128_v30 }
 0x195   :  { %v208_v31 = vpop.f32.mrf.mxu1 }
 0x196   :  { %v203_v32 = vpop.f32.mrf.mxu0  ;;  %v215_v33 = vpack.c.bf16 %v208_v31, %v208_v31 }
 0x197   :  { %v213_v34 = vpack.c.bf16 %v203_v32, %v203_v32 }
 0x198   :  { %220 = vst.msk [vmem:[%s394_s4 + $0x8] sm:$0xf] %vm217_vm13, %v215_v33 }
 0x199   :  { %218 = vst.msk [vmem:[%s394_s4] sm:$0xf] %vm217_vm13, %v213_v34 }
 0x19d   :  { %v210_v25 = vpop.f32.mrf.mxu1 }
 0x19e   :  { %v205_v26 = vpop.f32.mrf.mxu0  ;;  %v216_v35 = vpack.c.bf16 %v210_v25, %v210_v25 }
 0x19f   :  { %v214_v36 = vpack.c.bf16 %v205_v26, %v205_v26 }
 0x1a0   :  { %221 = vst.msk [vmem:[%s394_s4 + $0xc] sm:$0xf] %vm217_vm13, %v216_v35 }
 0x1a1   :  { %219 = vst.msk [vmem:[%s394_s4 + $0x4] sm:$0xf] %vm217_vm13, %v214_v36 }

// kernel: _lambda_.25
= control target key start
LH: loop header
LB: loop body
LE: loop exit
PB: predicated region body
PF: predicated region fallthrough
CT: control target
= control target key end

     0   :  { %vm31_vm0 = vcmask 523264   ;;  %v330_v10 = vmov 64.0   ;;  %vm245_vm14 = vcmask 1043456   ;;  %vm246_vm15 = vcmask 523268   ;;  %s490_s0 = inlined_call_operand.vmem [shape: bf16[32,64], index: 0, kind: input, shape index: {}]   ;;  %s491_s1 = inlined_call_operand.vmem [shape: f32[1,64], index: 1, kind: input, shape index: {}]   ;;  %s492_s2 = inlined_call_operand.vmem [shape: f32[1,64], index: 2, kind: input, shape index: {}]   ;;  %s493_s3 = inlined_call_operand.vmem [shape: bf16[64,192], index: 3, kind: input, shape index: {}]   ;;  %s494_s4 = inlined_call_operand.vmem [shape: f32[1,192], index: 4, kind: input, shape index: {}]   ;;  %s495_s5 = inlined_call_operand.vmem [shape: bf16[32,192], index: 5, kind: output, shape index: {}]  }
   0x1   :  { %v308_v0 = vld [vmem:[%s490_s0 + $0x8] sm:$0xff]   ;;  %v301_v1 = vld [vmem:[%s490_s0] sm:$0xff]   ;;  %320 = vrcp.f32 %v330_v10  ;;  %v282_v37 = vld [vmem:[%s493_s3 + $0x30] sm:$0xf] }
   0x2   :  { %v306_v2 = vunpack.c.l.bf16 %v308_v0  ;;  %v302_v3 = vunpack.c.l.bf16 %v301_v1  ;;  %v307_v6 = vunpack.c.h.bf16 %v308_v0  ;;  %v303_v7 = vunpack.c.h.bf16 %v301_v1  ;;  %v299_v38 = vld [vmem:[%s493_s3 + $0x34] sm:$0xf0]  ;;  %v298_v39 = vld [vmem:[%s493_s3 + $0x34] sm:$0xf]  ;;  %v284_v41 = vld [vmem:[%s493_s3 + $0x38] sm:$0xf0] }
   0x3   :  { %v283_v40 = vor.u32 %v299_v38, %v282_v37  ;;  %v287_v42 = vor.u32 %v298_v39, %v284_v41  ;;  %v274_v43 = vld [vmem:[%s493_s3 + $0x20] sm:$0xf]  ;;  %v297_v44 = vld [vmem:[%s493_s3 + $0x24] sm:$0xf0]  ;;  %v296_v45 = vld [vmem:[%s493_s3 + $0x24] sm:$0xf] }
   0x4   :  { %v38_v4 = vsel %vm31_vm0, %v306_v2, 0.0  ;;  %v32_v5 = vsel %vm31_vm0, %v302_v3, 0.0  ;;  %v41_v8 = vsel %vm31_vm0, %v307_v6, 0.0  ;;  %v35_v9 = vsel %vm31_vm0, %v303_v7, 0.0  ;;  %v276_v47 = vld [vmem:[%s493_s3 + $0x28] sm:$0xf0] }
   0x5   :  { %39 = vadd.xlane.f32.xlu0 %v38_v4  ;;  %33 = vadd.xlane.f32.xlu1 %v32_v5  ;;  %v275_v46 = vor.u32 %v297_v44, %v274_v43  ;;  %v279_v48 = vor.u32 %v296_v45, %v276_v47  ;;  %v266_v49 = vld [vmem:[%s493_s3 + $0x10] sm:$0xf]  ;;  %v295_v50 = vld [vmem:[%s493_s3 + $0x14] sm:$0xf0]  ;;  %v294_v51 = vld [vmem:[%s493_s3 + $0x14] sm:$0xf] }
   0x6   :  { %207 = vmatpush.bf16.msra.mxu0 %v283_v40  ;;  %309 = vmatpush.bf16.msra.mxu2 %v283_v40  ;;  %v267_v52 = vor.u32 %v295_v50, %v266_v49  ;;  %v268_v53 = vld [vmem:[%s493_s3 + $0x18] sm:$0xf0]  ;;  %v258_v57 = vld [vmem:[%s493_s3] sm:$0xf]  ;;  %v293_v58 = vld [vmem:[%s493_s3 + $0x4] sm:$0xf0] }
   0x7   :  { %v321_v11 = vpop.eup %320  ;;  %226 = vmatpush.bf16.msra.mxu1 %v287_v42  ;;  %313 = vmatpush.bf16.msra.mxu3 %v287_v42  ;;  %v271_v56 = vor.u32 %v294_v51, %v268_v53  ;;  %v292_v59 = vld [vmem:[%s493_s3 + $0x4] sm:$0xf]  ;;  %v259_v62 = vor.u32 %v293_v58, %v258_v57  ;;  %v260_v63 = vld [vmem:[%s493_s3 + $0x8] sm:$0xf0]  ;;  %v318_v38 = vld [vmem:[%s491_s1] ss:$0 sm:$0xff] }
   0x8   :  { %v45_v12 = vmul.f32 64.0, %v321_v11  ;;  %vm49_vm1 = vweird.f32 %v321_v11  ;;  %v263_v0 = vor.u32 %v292_v59, %v260_v63 }
   0xa   :  { %v46_v13 = vsub.f32 1.0, %v45_v12  ;;  %208 = vmatpush.bf16.msra.mxu0 %v275_v46  ;;  %310 = vmatpush.bf16.msra.mxu2 %v275_v46 }
   0xb   :  { %227 = vmatpush.bf16.msra.mxu1 %v279_v48  ;;  %314 = vmatpush.bf16.msra.mxu3 %v279_v48 }
   0xc   :  { %v47_v14 = vmul.f32 %v321_v11, %v46_v13 }
   0xd   :  { %42 = vadd.xlane.f32.xlu0 %v41_v8  ;;  %36 = vadd.xlane.f32.xlu1 %v35_v9 }
   0xe   :  { %v48_v15 = vadd.f32 %v321_v11, %v47_v14  ;;  %209 = vmatpush.bf16.msra.mxu0 %v267_v52  ;;  %311 = vmatpush.bf16.msra.mxu2 %v267_v52 }
   0xf   :  { %228 = vmatpush.bf16.msra.mxu1 %v271_v56  ;;  %315 = vmatpush.bf16.msra.mxu3 %v271_v56 }
  0x10   :  { %v371_v16 = vsel %vm49_vm1, %v321_v11, %v48_v15  ;;  %vm466_vm1 = vmor %vm246_vm15, %vm245_vm14 }
  0x12   :  { %210 = vmatpush.bf16.msra.mxu0 %v259_v62  ;;  %312 = vmatpush.bf16.msra.mxu2 %v259_v62 }
  0x13   :  { %229 = vmatpush.bf16.msra.mxu1 %v263_v0  ;;  %316 = vmatpush.bf16.msra.mxu3 %v263_v0 }
  0x78   :  { %v40_v17 = vpop.xlane.xlu0 %39  ;;  %v34_v18 = vpop.xlane.xlu1 %33 }
  0x79   :  { %v53_v19 = vmul.f32 %v371_v16, %v40_v17  ;;  %v51_v20 = vmul.f32 %v371_v16, %v34_v18 }
  0x7b   :  { %v375_v21 = vsub.f32 %v306_v2, %v53_v19  ;;  %v377_v22 = vsub.f32 %v302_v3, %v51_v20 }
  0x7d   :  { %v61_v23 = vmul.f32 %v375_v21, %v375_v21  ;;  %v59_v24 = vmul.f32 %v377_v22, %v377_v22 }
  0x7f   :  { %v69_v25 = vsel %vm31_vm0, %v61_v23, 0.0  ;;  %v63_v26 = vsel %vm31_vm0, %v59_v24, 0.0 }
  0x80   :  { %70 = vadd.xlane.f32.xlu2 %v69_v25  ;;  %v43_v27 = vpop.xlane.xlu0 %42  ;;  %64 = vadd.xlane.f32.xlu0 %v63_v26  ;;  %v37_v28 = vpop.xlane.xlu1 %36 }
  0x81   :  { %v54_v29 = vmul.f32 %v371_v16, %v43_v27  ;;  %v52_v30 = vmul.f32 %v371_v16, %v37_v28 }
  0x83   :  { %v387_v31 = vsub.f32 %v307_v6, %v54_v29  ;;  %v389_v32 = vsub.f32 %v303_v7, %v52_v30 }
  0x85   :  { %v62_v33 = vmul.f32 %v387_v31, %v387_v31  ;;  %v60_v34 = vmul.f32 %v389_v32, %v389_v32 }
  0x87   :  { %v72_v35 = vsel %vm31_vm0, %v62_v33, 0.0  ;;  %v66_v36 = vsel %vm31_vm0, %v60_v34, 0.0 }
  0x88   :  { %73 = vadd.xlane.f32.xlu2 %v72_v35  ;;  %67 = vadd.xlane.f32.xlu1 %v66_v36 }
  0xf3   :  { %v71_v54 = vpop.xlane.xlu2 %70  ;;  %v65_v55 = vpop.xlane.xlu0 %64 }
  0xf4   :  { %v77_v60 = vmul.f32 %v71_v54, %v371_v16  ;;  %v75_v61 = vmul.f32 %v65_v55, %v371_v16 }
  0xf6   :  { %v81_v1 = vadd.f32 1e-05, %v77_v60  ;;  %v79_v2 = vadd.f32 1e-05, %v75_v61 }
  0xf8   :  { %322 = vrsqrt.f32 %v81_v1  ;;  %vm89_vm3 = vweird.f32 %v79_v2  ;;  %vm109_vm5 = vweird.f32 %v81_v1 }
  0xf9   :  { %324 = vrsqrt.f32 %v79_v2 }
  0xfb   :  { %v74_v3 = vpop.xlane.xlu2 %73  ;;  %v68_v4 = vpop.xlane.xlu1 %67 }
  0xfc   :  { %v78_v5 = vmul.f32 %v74_v3, %v371_v16  ;;  %v76_v6 = vmul.f32 %v68_v4, %v371_v16 }
  0xfe   :  { %v323_v7 = vpop.eup %322  ;;  %v82_v8 = vadd.f32 1e-05, %v78_v5  ;;  %v80_v9 = vadd.f32 1e-05, %v76_v6 }
  0xff   :  { %v325_v10 = vpop.eup %324  ;;  %v104_v11 = vmul.f32 %v323_v7, %v81_v1  ;;  %vm110_vm2 = vweird.f32 %v323_v7 }
 0x100   :  { %v84_v12 = vmul.f32 %v325_v10, %v79_v2  ;;  %326 = vrsqrt.f32 %v82_v8  ;;  %vm90_vm4 = vweird.f32 %v325_v10  ;;  %vm111_vm6 = vmor %vm109_vm5, %vm110_vm2  ;;  %vm99_vm9 = vweird.f32 %v80_v9 }
 0x101   :  { %v105_v13 = vmul.f32 %v323_v7, %v104_v11  ;;  %328 = vrsqrt.f32 %v80_v9  ;;  %vm91_vm7 = vmor %vm89_vm3, %vm90_vm4  ;;  %vm119_vm11 = vweird.f32 %v82_v8 }
 0x102   :  { %v85_v14 = vmul.f32 %v325_v10, %v84_v12 }
 0x103   :  { %v106_v15 = vmul.f32 0.5, %v105_v13 }
 0x104   :  { %v86_v17 = vmul.f32 0.5, %v85_v14 }
 0x105   :  { %v107_v18 = vsub.f32 1.5, %v106_v15 }
 0x106   :  { %v327_v19 = vpop.eup %326  ;;  %v87_v20 = vsub.f32 1.5, %v86_v17 }
 0x107   :  { %v329_v23 = vpop.eup %328  ;;  %v108_v24 = vmul.f32 %v323_v7, %v107_v18  ;;  %v114_v25 = vmul.f32 %v327_v19, %v82_v8  ;;  %vm120_vm8 = vweird.f32 %v327_v19 }
 0x108   :  { %v88_v16 = vmul.f32 %v325_v10, %v87_v20  ;;  %v94_v26 = vmul.f32 %v329_v23, %v80_v9  ;;  %vm100_vm10 = vweird.f32 %v329_v23  ;;  %vm121_vm12 = vmor %vm119_vm11, %vm120_vm8 }
 0x109   :  { %v115_v27 = vmul.f32 %v327_v19, %v114_v25  ;;  %v112_v29 = vsel %vm111_vm6, %v323_v7, %v108_v24  ;;  %vm101_vm13 = vmor %vm99_vm9, %vm100_vm10 }
 0x10a   :  { %v95_v28 = vmul.f32 %v329_v23, %v94_v26  ;;  %v92_v33 = vsel %vm91_vm7, %v325_v10, %v88_v16  ;;  %v125_v36 = vmul.f32 %v112_v29, %v375_v21  ;;  %v319_v21 = vld [vmem:[%s492_s2] ss:$0 sm:$0xff] }
 0x10b   :  { %v116_v30 = vmul.f32 0.5, %v115_v27  ;;  %v123_v39 = vmul.f32 %v92_v33, %v377_v22 }
 0x10c   :  { %v96_v34 = vmul.f32 0.5, %v95_v28  ;;  %v132_v45 = vmul.f32 %v318_v38, %v125_v36 }
 0x10d   :  { %v117_v35 = vsub.f32 1.5, %v116_v30  ;;  %v130_v47 = vmul.f32 %v318_v38, %v123_v39 }
 0x10e   :  { %v97_v37 = vsub.f32 1.5, %v96_v34  ;;  %v139_v22 = vadd.f32 %v319_v21, %v132_v45 }
 0x10f   :  { %v118_v40 = vmul.f32 %v327_v19, %v117_v35  ;;  %v137_v51 = vadd.f32 %v319_v21, %v130_v47 }
 0x110   :  { %v98_v41 = vmul.f32 %v329_v23, %v97_v37 }
 0x111   :  { %v122_v42 = vsel %vm121_vm12, %v327_v19, %v118_v40 }
 0x112   :  { %v126_v43 = vmul.f32 %v122_v42, %v387_v31  ;;  %v102_v44 = vsel %vm101_vm13, %v329_v23, %v98_v41  ;;  %v151_v31 = vld [vmem:[%s494_s4] sm:$0x3] }
 0x113   :  { %v124_v46 = vmul.f32 %v102_v44, %v389_v32  ;;  %v153_v32 = vperm.slane %v151_v31, 0  ;;  %v154_v55 = vperm.slane %v151_v31, 1 }
 0x114   :  { %v133_v48 = vmul.f32 %v318_v38, %v126_v43 }
 0x115   :  { %v131_v49 = vmul.f32 %v318_v38, %v124_v46 }
 0x116   :  { %v140_v50 = vadd.f32 %v319_v21, %v133_v48 }
 0x117   :  { %v138_v52 = vadd.f32 %v319_v21, %v131_v49 }
 0x118   :  { %v142_v53 = vpack.c.bf16 %v140_v50, %v139_v22 }
 0x119   :  { %v141_v54 = vpack.c.bf16 %v138_v52, %v137_v51 }
 0x11a   :  { %289 = vmatmul.msk.bf16.vlgmr.msra.gmra.mxu2 %vm31_vm0, %v142_v53  ;;  %291 = vmatmul.msk.bf16.vlgmr.msra.gmra.mxu3 %vm31_vm0, %v142_v53 }
 0x11b   :  { %288 = vmatmul.msk.bf16.vlgmr.msra.gmra.mxu0 %vm31_vm0, %v141_v54  ;;  %290 = vmatmul.msk.bf16.vlgmr.msra.gmra.mxu1 %vm31_vm0, %v141_v54 }
 0x198   :  { %v212_v56 = vpop.f32.mrf.mxu0  ;;  %v231_v57 = vpop.f32.mrf.mxu1 }
 0x199   :  { %v213_v58 = vadd.f32 %v212_v56, %v153_v32  ;;  %v232_v59 = vadd.f32 %v231_v57, %v154_v55 }
 0x19b   :  { %v241_v61 = vpack.c.bf16 %v232_v59, %v213_v58 }
 0x19d   :  { %248 = vst.msk [vmem:[%s495_s5] sm:$0xff] %vm466_vm1, %v241_v61  ;;  %v217_v62 = vpop.f32.mrf.mxu2  ;;  %v236_v63 = vpop.f32.mrf.mxu3 }
 0x19e   :  { %v218_v0 = vadd.f32 %v217_v62, %v153_v32  ;;  %v237_v1 = vadd.f32 %v236_v63, %v154_v55 }
 0x1a0   :  { %v243_v2 = vpack.c.bf16 %v237_v1, %v218_v0  ;;  %v214_v3 = vpop.f32.mrf.mxu0  ;;  %v233_v4 = vpop.f32.mrf.mxu1 }
 0x1a1   :  { %v215_v5 = vadd.f32 %v214_v3, %v153_v32  ;;  %v234_v6 = vadd.f32 %v233_v4, %v154_v55 }
 0x1a2   :  { %250 = vst.msk [vmem:[%s495_s5 + $0x10] sm:$0xff] %vm466_vm1, %v243_v2 }
 0x1a3   :  { %v242_v7 = vpack.c.bf16 %v234_v6, %v215_v5 }
 0x1a5   :  { %249 = vst.msk [vmem:[%s495_s5 + $0x8] sm:$0xff] %vm466_vm1, %v242_v7  ;;  %v219_v8 = vpop.f32.mrf.mxu2  ;;  %v238_v9 = vpop.f32.mrf.mxu3 }
 0x1a6   :  { %v220_v10 = vadd.f32 %v219_v8, %v153_v32  ;;  %v239_v11 = vadd.f32 %v238_v9, %v154_v55 }
 0x1a8   :  { %v244_v12 = vpack.c.bf16 %v239_v11, %v220_v10 }
 0x1aa   :  { %251 = vst.msk [vmem:[%s495_s5 + $0x18] sm:$0xff] %vm466_vm1, %v244_v12 }

// kernel: _lambda_.26
= control target key start
LH: loop header
LB: loop body
LE: loop exit
PB: predicated region body
PF: predicated region fallthrough
CT: control target
= control target key end

     0   :  { %s778_s15 = smov 0   ;;  %s892_s0 = inlined_call_operand.vmem [shape: bf16[2,16,192], index: 0, kind: input, shape index: {}]   ;;  %s893_s1 = inlined_call_operand.vmem [shape: f32[1,16,16], index: 1, kind: input, shape index: {}]   ;;  %s894_s2 = inlined_call_operand.vmem [shape: bf16[64,64], index: 2, kind: input, shape index: {}]   ;;  %s895_s3 = inlined_call_operand.vmem [shape: f32[1,64], index: 3, kind: input, shape index: {}]   ;;  %s896_s4 = inlined_call_operand.vmem [shape: bf16[2,16,64], index: 4, kind: output, shape index: {}]  }
   0x1 LB: > { %s623_s16 = sadd.s32 4294967295, %s744_s15   ;;  %p627_p0 = scmp.ge.s32.totalorder %s744_s15, 1  ;;  %s744_s15 = sphi %s778_s15, %s14_s15  }
   0x2   : > { %p162_p1 = scmp.lt.s32.totalorder %s744_s15, 3 }
   0x4   : > { %p163_p2 = pnand %p627_p0, %p162_p1 }
   0x5   : > { %p188_p3 = scmp.lt.s32.totalorder (!%p163_p2), %s623_s16, 1  ;;  %s746_s21 = smov (!%p163_p2), 64  }
   0x6   : > { %166 = sbr.rel (%p163_p2) target bundleno = 1363 (0x553), region = 36  ;;  %s747_s22 = smov (!%p163_p2), 112  }
   0x7   : > { %s748_s23 = smov (!%p163_p2), 16   ;;  %s749_s28 = smov (!%p163_p2), 48  }
   0x8   : > { %s750_s29 = smov (!%p163_p2), 32   ;;  %s751_s30 = smov (!%p163_p2), 96  }
   0x9   : > { %s752_s5 = smov (!%p163_p2), 80  }
   0xb   : > { %s898_s16 = smov (!%p188_p3, %s623_s16), 1  ;;  %vm210_vm0 = vcmask 130048   ;;  %v803_v5 = vld [vmem:[%s893_s1] sm:$0xff]  ;;  %v810_v9 = vld [vmem:[%s893_s1 + $0x8] sm:$0xff]  ;;  %vm502_vm1 = vcmask 261120   ;;  %vm505_vm2 = vcmask 392192  }
   0xc   : > { %s667_s17 = sshll.u32 %s898_s16, 4  ;;  %vm545_vm3 = vcmask 523264   ;;  %s668_s18 = sshll.u32 %s898_s16, 3  ;;  %vm565_vm4 = vcmask 519168  }
   0xd   : > { %s792_s20 = scalar_lea.vmem %s892_s0, %s667_s17 }
   0xe   : > { %v634_v0 = vld [vmem:[%s792_s20] sm:$0xf]  ;;  %v670_v1 = vld [vmem:[%s792_s20 + $0x4] sm:$0xf0]  ;;  %v669_v28 = vld [vmem:[%s792_s20 + $0x4] sm:$0xf] }
   0xf   : > { %v635_v2 = vor.u32 %v670_v1, %v634_v0  ;;  %v637_v29 = vld [vmem:[%s792_s20 + $0x8] sm:$0xf0] }
  0x10   : > { %v825_v30 = vor.u32 %v669_v28, %v637_v29 }
  0x11   : > { %208 = vrot.lane.b32.xlu0 %v635_v2, %s746_s21  ;;  %275 = vrot.lane.b32.xlu2 %v635_v2, %s747_s22  ;;  %s197_s21 = scalar_lea.vmem %s896_s4, %s668_s18 }
  0x12   : > { %268 = vmatpush.bf16.msra.mxu1 %v825_v30 }
  0x19   : > { %411 = vrot.lane.b32.xlu2 %v635_v2, %s748_s23 }
  0x6b   : > { %v276_v16 = vpop.permute.xlu2 %275 }
  0x73   : > { %v412_v22 = vpop.permute.xlu2 %411 }
  0x74   : > { %v417_v23 = vsel %vm210_vm0, %v412_v22, 0 }
  0x83   : > { %v209_v3 = vpop.permute.xlu0 %208 }
  0x84   : > { %v215_v4 = vsel %vm210_vm0, %v209_v3, 0 }
  0x85   : > { %224 = vmatpush.bf16.xpose.msra.mxu0 %v215_v4 }
  0x8c   : > { %636 = vmatmul.msk.bf16.vlgmr.msra.gmra.mxu0 %vm210_vm0, %v635_v2 }
  0x8d   : > { %426 = vmatpush.bf16.xpose.msrb.mxu0 %v417_v23 }
 0x109   : > { %v226_v6 = vpop.f32.mrf.mxu0 }
 0x10a   : > { %v227_v7 = vadd.f32 %v226_v6, %v803_v5 }
 0x10c   : > { %v231_v8 = vsel %vm210_vm0, %v227_v7, -inf }
 0x10d   : > { %232 = vmax.xlane.f32.xlu0 %v231_v8 }
 0x111   : > { %v228_v10 = vpop.f32.mrf.mxu0 }
 0x112   : > { %v229_v11 = vadd.f32 %v228_v10, %v810_v9 }
 0x114   : > { %v234_v12 = vsel %vm210_vm0, %v229_v11, -inf }
 0x115   : > { %235 = vmax.xlane.f32.xlu1 %v234_v12 }
 0x12e   : > { %277 = vrot.lane.b32.xlu1 %v635_v2, %s749_s28 }
 0x136   : > { %344 = vrot.lane.b32.xlu1 %v635_v2, %s750_s29 }
 0x13e   : > { %342 = vrot.lane.b32.xlu1 %v635_v2, %s751_s30 }
 0x180   : > { %v233_v13 = vpop.xlane.xlu0 %232 }
 0x181   : > { %v237_v14 = vsub.f32 %v227_v7, %v233_v13 }
 0x183   : > { %v239_v15 = vmul.f32 1.442695, %v237_v14 }
 0x185   : > { %706 = vpow2.f32 %v239_v15 }
 0x188   : > { %v236_v17 = vpop.xlane.xlu1 %235 }
 0x189   : > { %v238_v18 = vsub.f32 %v229_v11, %v236_v17 }
 0x18b   : > { %v707_v19 = vpop.eup %706  ;;  %v241_v20 = vmul.f32 1.442695, %v238_v18 }
 0x18c   : > { %v243_v21 = vsel %vm210_vm0, %v707_v19, 0.0 }
 0x18d   : > { %708 = vpow2.f32 %v241_v20  ;;  %244 = vadd.xlane.f32.xlu2 %v243_v21 }
 0x193   : > { %v709_v24 = vpop.eup %708 }
 0x194   : > { %v246_v25 = vsel %vm210_vm0, %v709_v24, 0.0 }
 0x195   : > { %247 = vadd.xlane.f32.xlu2 %v246_v25 }
 0x1a0   : > { %v278_v26 = vpop.permute.xlu1 %277 }
 0x1a1   : > { %v283_v27 = vsel %vm210_vm0, %v278_v26, 0 }
 0x1a2   : > { %292 = vmatpush.bf16.xpose.msra.mxu2 %v283_v27 }
 0x1a8   : > { %v345_v31 = vpop.permute.xlu1 %344 }
 0x1a9   : > { %642 = vmatmul.msk.bf16.vlgmr.msra.gmra.mxu2 %vm210_vm0, %v276_v16  ;;  %v350_v32 = vsel %vm210_vm0, %v345_v31, 0 }
 0x1aa   : > { %359 = vmatpush.bf16.xpose.msrb.mxu1 %v350_v32 }
 0x1ad   : > { %409 = vrot.lane.b32.xlu2 %v635_v2, %s752_s5 }
 0x1b0   : > { %v343_v41 = vpop.permute.xlu1 %342 }
 0x200   : > { %v245_v33 = vpop.xlane.xlu2 %244 }
 0x201   : > { %710 = vrcp.f32 %v245_v33 }
 0x207   : > { %v711_v35 = vpop.eup %710 }
 0x208   : > { %v248_v34 = vpop.xlane.xlu2 %247  ;;  %v251_v38 = vmul.f32 %v711_v35, %v707_v19 }
 0x209   : > { %712 = vrcp.f32 %v248_v34 }
 0x20f   : > { %v713_v36 = vpop.eup %712 }
 0x210   : > { %v410_v37 = vpop.permute.xlu2 %409  ;;  %v252_v39 = vmul.f32 %v713_v36, %v709_v24 }
 0x211   : > { %646 = vmatmul.msk.bf16.vlgmr.msrb.gmra.mxu0 %vm210_vm0, %v410_v37 }
 0x212   : > { %v253_v40 = vpack.c.bf16 %v252_v39, %v251_v38 }
 0x214   : > { %641 = vmatmul.msk.bf16.vlgmr.msra.gmra.mxu1 %vm210_vm0, %v253_v40 }
 0x224   : > { %644 = vmatmul.msk.bf16.vlgmr.msrb.gmra.mxu1 %vm210_vm0, %v343_v41 }
 0x22c   : > { %v294_v42 = vpop.f32.mrf.mxu2 }
 0x22d   : > { %v295_v43 = vadd.f32 %v294_v42, %v803_v5 }
 0x22f   : > { %v299_v44 = vsel %vm210_vm0, %v295_v43, -inf }
 0x230   : > { %300 = vmax.xlane.f32.xlu1 %v299_v44 }
 0x234   : > { %v296_v45 = vpop.f32.mrf.mxu2 }
 0x235   : > { %v297_v46 = vadd.f32 %v296_v45, %v810_v9 }
 0x237   : > { %v302_v47 = vsel %vm210_vm0, %v297_v46, -inf }
 0x238   : > { %303 = vmax.xlane.f32.xlu0 %v302_v47 }
 0x249   : > { %322 = vrot.lane.b32.xlu1 %v825_v30, %s747_s22 }
 0x28e   : > { %v428_v48 = vpop.f32.mrf.mxu0 }
 0x28f   : > { %v429_v49 = vadd.f32 %v428_v48, %v803_v5 }
 0x291   : > { %v839_v50 = vpop.f32.mrf.mxu1  ;;  %v433_v51 = vsel %vm210_vm0, %v429_v49, -inf }
 0x292   : > { %434 = vmax.xlane.f32.xlu0 %v433_v51 }
 0x296   : > { %v430_v52 = vpop.f32.mrf.mxu0 }
 0x297   : > { %v431_v53 = vadd.f32 %v430_v52, %v810_v9 }
 0x299   : > { %v843_v54 = vpop.f32.mrf.mxu1  ;;  %v436_v55 = vsel %vm210_vm0, %v431_v53, -inf }
 0x29a   : > { %437 = vmax.xlane.f32.xlu0 %v436_v55 }
 0x2a1   : > { %v361_v56 = vpop.f32.mrf.mxu1 }
 0x2a2   : > { %v362_v57 = vadd.f32 %v361_v56, %v803_v5 }
 0x2a3   : > { %v301_v58 = vpop.xlane.xlu1 %300 }
 0x2a4   : > { %v305_v59 = vsub.f32 %v295_v43, %v301_v58  ;;  %v366_v60 = vsel %vm210_vm0, %v362_v57, -inf }
 0x2a5   : > { %367 = vmax.xlane.f32.xlu2 %v366_v60 }
 0x2a6   : > { %v307_v61 = vmul.f32 1.442695, %v305_v59 }
 0x2a8   : > { %714 = vpow2.f32 %v307_v61 }
 0x2a9   : > { %v363_v2 = vpop.f32.mrf.mxu1 }
 0x2aa   : > { %v364_v4 = vadd.f32 %v363_v2, %v810_v9  ;;  %v671_v2 = vld [vmem:[%s894_s2] sm:$0xff] }
 0x2ab   : > { %v304_v62 = vpop.xlane.xlu0 %303 }
 0x2ac   : > { %v306_v0 = vsub.f32 %v297_v46, %v304_v62  ;;  %v369_v5 = vsel %vm210_vm0, %v364_v4, -inf }
 0x2ae   : > { %v715_v63 = vpop.eup %714  ;;  %v309_v3 = vmul.f32 1.442695, %v306_v0  ;;  %v673_v0 = vld [vmem:[%s894_s2 + $0x10] sm:$0xff] }
 0x2af   : > { %v311_v1 = vsel %vm210_vm0, %v715_v63, 0.0 }
 0x2b0   : > { %312 = vadd.xlane.f32.xlu0 %v311_v1  ;;  %716 = vpow2.f32 %v309_v3  ;;  %v672_v1 = vld [vmem:[%s894_s2 + $0x8] sm:$0xff] }
 0x2b6   : > { %v717_v6 = vpop.eup %716 }
 0x2b7   : > { %v314_v7 = vsel %vm210_vm0, %v717_v6, 0.0 }
 0x2b8   : > { %370 = vmax.xlane.f32.xlu0 %v369_v5 }
 0x2bb   : > { %v323_v18 = vpop.permute.xlu1 %322 }
 0x2bc   : > { %335 = vmatpush.bf16.msra.mxu3 %v323_v18 }
 0x2c0   : > { %315 = vadd.xlane.f32.xlu0 %v314_v7 }
 0x305   : > { %v435_v8 = vpop.xlane.xlu0 %434 }
 0x306   : > { %v439_v10 = vsub.f32 %v429_v49, %v435_v8 }
 0x308   : > { %v441_v11 = vmul.f32 1.442695, %v439_v10 }
 0x30a   : > { %718 = vpow2.f32 %v441_v11 }
 0x30d   : > { %v438_v12 = vpop.xlane.xlu0 %437 }
 0x30e   : > { %v440_v13 = vsub.f32 %v431_v53, %v438_v12 }
 0x310   : > { %v719_v14 = vpop.eup %718  ;;  %v443_v15 = vmul.f32 1.442695, %v440_v13 }
 0x311   : > { %v445_v16 = vsel %vm210_vm0, %v719_v14, 0.0 }
 0x312   : > { %720 = vpow2.f32 %v443_v15  ;;  %446 = vadd.xlane.f32.xlu2 %v445_v16 }
 0x318   : > { %v721_v9 = vpop.eup %720  ;;  %v368_v17 = vpop.xlane.xlu2 %367 }
 0x319   : > { %v372_v19 = vsub.f32 %v362_v57, %v368_v17  ;;  %v448_v20 = vsel %vm210_vm0, %v721_v9, 0.0 }
 0x31a   : > { %449 = vadd.xlane.f32.xlu0 %v448_v20 }
 0x31b   : > { %v374_v21 = vmul.f32 1.442695, %v372_v19  ;;  %v705_v19 = vld [vmem:[%s895_s3] ss:$0 sm:$0xff] }
 0x31d   : > { %722 = vpow2.f32 %v374_v21 }
 0x323   : > { %v723_v22 = vpop.eup %722  ;;  %v313_v23 = vpop.xlane.xlu0 %312 }
 0x324   : > { %v378_v24 = vsel %vm210_vm0, %v723_v22, 0.0 }
 0x325   : > { %379 = vadd.xlane.f32.xlu2 %v378_v24 }
 0x32b   : > { %v371_v25 = vpop.xlane.xlu0 %370 }
 0x32c   : > { %v373_v26 = vsub.f32 %v364_v4, %v371_v25 }
 0x32e   : > { %v376_v27 = vmul.f32 1.442695, %v373_v26 }
 0x330   : > { %724 = vpow2.f32 %v376_v27 }
 0x331   : > { %726 = vrcp.f32 %v313_v23 }
 0x333   : > { %v316_v28 = vpop.xlane.xlu0 %315 }
 0x334   : > { %728 = vrcp.f32 %v316_v28 }
 0x336   : > { %v725_v29 = vpop.eup %724 }
 0x337   : > { %v381_v31 = vsel %vm210_vm0, %v725_v29, 0.0  ;;  %v727_v32 = vpop.eup %726 }
 0x338   : > { %382 = vadd.xlane.f32.xlu0 %v381_v31  ;;  %v319_v34 = vmul.f32 %v727_v32, %v715_v63  ;;  %v674_v63 = vld [vmem:[%s894_s2 + $0x18] sm:$0xff] }
 0x339   : > { %553 = vmatpush.bf16.msra.mxu1 %v674_v63 }
 0x33a   : > { %v729_v33 = vpop.eup %728 }
 0x33b   : > { %v320_v35 = vmul.f32 %v729_v33, %v717_v6 }
 0x33d   : > { %v321_v36 = vpack.c.bf16 %v320_v35, %v319_v34  ;;  %389 = vrot.lane.b32.xlu2 %v825_v30, %s751_s30  ;;  %554 = vmatpush.bf16.msra.mxu1 %v673_v0 }
 0x33f   : > { %643 = vmatmul.msk.bf16.vlgmr.msra.gmra.mxu3 %vm210_vm0, %v321_v36 }
 0x341   : > { %555 = vmatpush.bf16.msra.mxu1 %v672_v1 }
 0x345   : > { %556 = vmatpush.bf16.msra.mxu1 %v671_v2 }
 0x34c   : > { %456 = vrot.lane.b32.xlu0 %v825_v30, %s752_s5 }
 0x385   : > { %v447_v37 = vpop.xlane.xlu2 %446 }
 0x38d   : > { %v450_v40 = vpop.xlane.xlu0 %449 }
 0x398   : > { %v380_v38 = vpop.xlane.xlu2 %379 }
 0x399   : > { %730 = vrcp.f32 %v380_v38 }
 0x39f   : > { %v731_v42 = vpop.eup %730 }
 0x3a0   : > { %v390_v39 = vpop.permute.xlu2 %389  ;;  %v386_v44 = vmul.f32 %v731_v42, %v723_v22 }
 0x3a1   : > { %402 = vmatpush.bf16.msrb.mxu3 %v390_v39 }
 0x3ab   : > { %v383_v41 = vpop.xlane.xlu0 %382 }
 0x3ac   : > { %732 = vrcp.f32 %v383_v41 }
 0x3ad   : > { %734 = vrcp.f32 %v450_v40 }
 0x3ae   : > { %736 = vrcp.f32 %v447_v37 }
 0x3b2   : > { %v733_v43 = vpop.eup %732 }
 0x3b3   : > { %v387_v45 = vmul.f32 %v733_v43, %v725_v29  ;;  %v735_v47 = vpop.eup %734 }
 0x3b4   : > { %v737_v48 = vpop.eup %736  ;;  %v454_v30 = vmul.f32 %v735_v47, %v721_v9 }
 0x3b5   : > { %v388_v46 = vpack.c.bf16 %v387_v45, %v386_v44  ;;  %v453_v49 = vmul.f32 %v737_v48, %v719_v14 }
 0x3b7   : > { %645 = vmatmul.msk.bf16.vlgmr.msrb.gmra.mxu3 %vm210_vm0, %v388_v46  ;;  %v455_v52 = vpack.c.bf16 %v454_v30, %v453_v49 }
 0x3be   : > { %v457_v51 = vpop.permute.xlu0 %456 }
 0x3bf   : > { %469 = vmatpush.bf16.msrb.mxu2 %v457_v51 }
 0x3c2   : > { %v337_v53 = vpop.f32.mrf.mxu3  ;;  %647 = vmatmul.msk.bf16.vlgmr.msrb.gmra.mxu2 %vm210_vm0, %v455_v52 }
 0x3ca   : > { %v339_v55 = vpop.f32.mrf.mxu3 }
 0x3cb   : > { %v690_v56 = vpack.i.bf16 %v339_v55, %v337_v53 }
 0x3cd   : > { %691 = vrot.lane.b32.xlu1 %v690_v56, %s748_s23 }
 0x43a   : > { %v404_v57 = vpop.f32.mrf.mxu3 }
 0x43f   : > { %v692_v3 = vpop.permute.xlu1 %691 }
 0x440   : > { %v694_v5 = vunpack.i.h.bf16 %v692_v3  ;;  %v693_v6 = vunpack.i.l.bf16 %v692_v3 }
 0x442   : > { %v406_v58 = vpop.f32.mrf.mxu3  ;;  %v501_v11 = vsel %vm210_vm0, %v843_v54, %v694_v5  ;;  %v500_v12 = vsel %vm210_vm0, %v839_v50, %v693_v6 }
 0x443   : > { %v695_v59 = vpack.i.bf16 %v406_v58, %v404_v57 }
 0x445   : > { %v471_v60 = vpop.f32.mrf.mxu2  ;;  %696 = vrot.lane.b32.xlu1 %v695_v59, %s750_s29 }
 0x44d   : > { %v473_v61 = vpop.f32.mrf.mxu2 }
 0x44e   : > { %v700_v62 = vpack.i.bf16 %v473_v61, %v471_v60 }
 0x450   : > { %701 = vrot.lane.b32.xlu1 %v700_v62, %s749_s28 }
 0x4b7   : > { %v697_v4 = vpop.permute.xlu1 %696 }
 0x4b8   : > { %v699_v7 = vunpack.i.h.bf16 %v697_v4  ;;  %v698_v8 = vunpack.i.l.bf16 %v697_v4 }
 0x4ba   : > { %v504_v15 = vsel %vm502_vm1, %v501_v11, %v699_v7  ;;  %v503_v16 = vsel %vm502_vm1, %v500_v12, %v698_v8 }
 0x4c2   : > { %v702_v10 = vpop.permute.xlu1 %701 }
 0x4c3   : > { %v704_v13 = vunpack.i.h.bf16 %v702_v10  ;;  %v703_v14 = vunpack.i.l.bf16 %v702_v10 }
 0x4c5   : > { %v506_v9 = vsel %vm505_vm2, %v503_v16, %v703_v14  ;;  %v507_v17 = vsel %vm505_vm2, %v504_v15, %v704_v13 }
 0x4c6   : > { %v508_v18 = vpack.c.bf16 %v507_v17, %v506_v9 }
 0x4c8   : > { %664 = vmatmul.msk.bf16.vlgmr.msra.gmra.mxu1 %vm545_vm3, %v508_v18 }
 0x545   : > { %v558_v20 = vpop.f32.mrf.mxu1 }
 0x546   : > { %v559_v21 = vadd.f32 %v705_v19, %v558_v20 }
 0x548   : > { %v563_v50 = vpack.c.bf16 %v559_v21, %v559_v21 }
 0x54a   : > { %566 = vst.msk [vmem:[%s197_s21] sm:$0xf] %vm565_vm4, %v563_v50 }
 0x54d   : > { %v560_v54 = vpop.f32.mrf.mxu1 }
 0x54e   : > { %v561_v22 = vadd.f32 %v705_v19, %v560_v54 }
 0x550   : > { %v564_v23 = vpack.c.bf16 %v561_v22, %v561_v22 }
 0x552   : > { %567 = vst.msk [vmem:[%s197_s21 + $0x4] sm:$0xf] %vm565_vm4, %v564_v23 }
 0x553 PF: > { %s14_s15 = sadd.s32 1, %s744_s15  }
 0x554   : > { %p11_p4 = scmp.ge.s32.totalorder %s14_s15, 4  }
 0x556   :  { %13 = sbr.rel (!%p11_p4) target bundleno = 1 (0x1), region = 66 }

// kernel: _lambda_.31
= control target key start
LH: loop header
LB: loop body
LE: loop exit
PB: predicated region body
PF: predicated region fallthrough
CT: control target
= control target key end

     0   :  { %vm32_vm0 = vcmask 523264   ;;  %s404_s0 = inlined_call_operand.vmem [shape: bf16[32,64], index: 0, kind: input, shape index: {}]   ;;  %s405_s1 = inlined_call_operand.vmem [shape: f32[1,64], index: 1, kind: input, shape index: {}]   ;;  %s406_s2 = inlined_call_operand.vmem [shape: f32[1,64], index: 2, kind: input, shape index: {}]   ;;  %s407_s3 = inlined_call_operand.vmem [shape: bf16[64,48], index: 3, kind: input, shape index: {}]   ;;  %s408_s4 = inlined_call_operand.vmem [shape: f32[1,48], index: 4, kind: input, shape index: {}]   ;;  %s409_s5 = inlined_call_operand.hbm [shape: f32[32,48], index: 5, kind: output, shape index: {}]  }
   0x1   :  { %v258_v0 = vld [vmem:[%s404_s0 + $0x8] sm:$0xff]   ;;  %v251_v1 = vld [vmem:[%s404_s0] sm:$0xff]  }
   0x2   :  { %v256_v2 = vunpack.c.l.bf16 %v258_v0  ;;  %v252_v3 = vunpack.c.l.bf16 %v251_v1 }
   0x3   :  { %10 = vsyncpa [#allocation3], 0  ;;  %v257_v6 = vunpack.c.h.bf16 %v258_v0  ;;  %v253_v7 = vunpack.c.h.bf16 %v251_v1  ;;  %v306_v10 = vmov 64.0   ;;  %v249_v37 = vld [vmem:[%s407_s3 + $0x18] sm:$0xff]  ;;  %v248_v38 = vld [vmem:[%s407_s3 + $0x10] sm:$0xff]  ;;  %vm205_vm14 = vcmask 392192  }
   0x4   :  { %v39_v4 = vsel %vm32_vm0, %v256_v2, 0.0  ;;  %v33_v5 = vsel %vm32_vm0, %v252_v3, 0.0  ;;  %270 = vrcp.f32 %v306_v10  ;;  %190 = vmatpush.bf16.msra.mxu0 %v249_v37  ;;  %259 = vmatpush.bf16.msra.mxu1 %v249_v37  ;;  %v247_v39 = vld [vmem:[%s407_s3 + $0x8] sm:$0xff]  ;;  %v246_v44 = vld [vmem:[%s407_s3] sm:$0xff]  ;;  %s216_s11 = sshll.u32 %s409_s5, 4  ;;  %s309_s12 = smov 8   ;;  %s217_s11 = int_to_ptr.hbm [resolvable:$true] %s216_s11 }
   0x5   :  { %40 = vadd.xlane.f32.xlu1 %v39_v4  ;;  %34 = vadd.xlane.f32.xlu0 %v33_v5  ;;  %v42_v8 = vsel %vm32_vm0, %v257_v6, 0.0  ;;  %v36_v9 = vsel %vm32_vm0, %v253_v7, 0.0 }
   0x8   :  { %191 = vmatpush.bf16.msra.mxu0 %v248_v38  ;;  %260 = vmatpush.bf16.msra.mxu1 %v248_v38 }
   0xa   :  { %v271_v11 = vpop.eup %270 }
   0xb   :  { %v46_v12 = vmul.f32 64.0, %v271_v11  ;;  %vm50_vm1 = vweird.f32 %v271_v11 }
   0xc   :  { %192 = vmatpush.bf16.msra.mxu0 %v247_v39  ;;  %261 = vmatpush.bf16.msra.mxu1 %v247_v39 }
   0xd   :  { %43 = vadd.xlane.f32.xlu1 %v42_v8  ;;  %37 = vadd.xlane.f32.xlu0 %v36_v9  ;;  %v47_v13 = vsub.f32 1.0, %v46_v12 }
   0xf   :  { %v48_v14 = vmul.f32 %v271_v11, %v47_v13 }
  0x10   :  { %193 = vmatpush.bf16.msra.mxu0 %v246_v44  ;;  %262 = vmatpush.bf16.msra.mxu1 %v246_v44 }
  0x11   :  { %v49_v15 = vadd.f32 %v271_v11, %v48_v14  ;;  %v267_v14 = vld [vmem:[%s405_s1] ss:$0 sm:$0xff] }
  0x13   :  { %v51_v16 = vsel %vm50_vm1, %v271_v11, %v49_v15 }
  0x78   :  { %v41_v17 = vpop.xlane.xlu1 %40  ;;  %v35_v18 = vpop.xlane.xlu0 %34 }
  0x79   :  { %v54_v19 = vmul.f32 %v51_v16, %v41_v17  ;;  %v52_v20 = vmul.f32 %v51_v16, %v35_v18 }
  0x7b   :  { %v350_v21 = vsub.f32 %v256_v2, %v54_v19  ;;  %v352_v22 = vsub.f32 %v252_v3, %v52_v20 }
  0x7d   :  { %v62_v23 = vmul.f32 %v350_v21, %v350_v21  ;;  %v60_v24 = vmul.f32 %v352_v22, %v352_v22 }
  0x7f   :  { %v70_v25 = vsel %vm32_vm0, %v62_v23, 0.0  ;;  %v64_v26 = vsel %vm32_vm0, %v60_v24, 0.0 }
  0x80   :  { %v44_v27 = vpop.xlane.xlu1 %43  ;;  %71 = vadd.xlane.f32.xlu0 %v70_v25  ;;  %65 = vadd.xlane.f32.xlu2 %v64_v26  ;;  %v38_v28 = vpop.xlane.xlu0 %37 }
  0x81   :  { %v55_v29 = vmul.f32 %v51_v16, %v44_v27  ;;  %v53_v30 = vmul.f32 %v51_v16, %v38_v28 }
  0x83   :  { %v360_v31 = vsub.f32 %v257_v6, %v55_v29  ;;  %v362_v32 = vsub.f32 %v253_v7, %v53_v30 }
  0x85   :  { %v63_v33 = vmul.f32 %v360_v31, %v360_v31  ;;  %v61_v34 = vmul.f32 %v362_v32, %v362_v32 }
  0x87   :  { %v73_v35 = vsel %vm32_vm0, %v63_v33, 0.0  ;;  %v67_v36 = vsel %vm32_vm0, %v61_v34, 0.0 }
  0x88   :  { %74 = vadd.xlane.f32.xlu1 %v73_v35  ;;  %68 = vadd.xlane.f32.xlu2 %v67_v36 }
  0xf3   :  { %v66_v40 = vpop.xlane.xlu2 %65  ;;  %v72_v41 = vpop.xlane.xlu0 %71 }
  0xf4   :  { %v76_v42 = vmul.f32 %v66_v40, %v51_v16  ;;  %v78_v43 = vmul.f32 %v72_v41, %v51_v16 }
  0xf6   :  { %v80_v45 = vadd.f32 1e-05, %v76_v42  ;;  %v82_v46 = vadd.f32 1e-05, %v78_v43 }
  0xf8   :  { %272 = vrsqrt.f32 %v80_v45  ;;  %vm110_vm4 = vweird.f32 %v82_v46  ;;  %vm90_vm5 = vweird.f32 %v80_v45 }
  0xf9   :  { %274 = vrsqrt.f32 %v82_v46 }
  0xfb   :  { %v75_v47 = vpop.xlane.xlu1 %74  ;;  %v69_v48 = vpop.xlane.xlu2 %68 }
  0xfc   :  { %v79_v49 = vmul.f32 %v75_v47, %v51_v16  ;;  %v77_v50 = vmul.f32 %v69_v48, %v51_v16 }
  0xfe   :  { %v273_v51 = vpop.eup %272  ;;  %v83_v52 = vadd.f32 1e-05, %v79_v49  ;;  %v81_v53 = vadd.f32 1e-05, %v77_v50 }
  0xff   :  { %v275_v54 = vpop.eup %274  ;;  %v85_v55 = vmul.f32 %v273_v51, %v80_v45  ;;  %vm91_vm3 = vweird.f32 %v273_v51 }
 0x100   :  { %v105_v56 = vmul.f32 %v275_v54, %v82_v46  ;;  %276 = vrsqrt.f32 %v83_v52  ;;  %vm111_vm2 = vweird.f32 %v275_v54  ;;  %vm92_vm7 = vmor %vm90_vm5, %vm91_vm3  ;;  %vm120_vm10 = vweird.f32 %v83_v52 }
 0x101   :  { %v86_v57 = vmul.f32 %v273_v51, %v85_v55  ;;  %278 = vrsqrt.f32 %v81_v53  ;;  %vm112_vm6 = vmor %vm110_vm4, %vm111_vm2  ;;  %vm100_vm12 = vweird.f32 %v81_v53 }
 0x102   :  { %v106_v58 = vmul.f32 %v275_v54, %v105_v56 }
 0x103   :  { %v87_v59 = vmul.f32 0.5, %v86_v57 }
 0x104   :  { %v107_v60 = vmul.f32 0.5, %v106_v58 }
 0x105   :  { %v88_v61 = vsub.f32 1.5, %v87_v59 }
 0x106   :  { %v277_v62 = vpop.eup %276  ;;  %v108_v63 = vsub.f32 1.5, %v107_v60 }
 0x107   :  { %v279_v0 = vpop.eup %278  ;;  %v115_v1 = vmul.f32 %v277_v62, %v83_v52  ;;  %v89_v2 = vmul.f32 %v273_v51, %v88_v61  ;;  %vm121_vm8 = vweird.f32 %v277_v62 }
 0x108   :  { %v109_v3 = vmul.f32 %v275_v54, %v108_v63  ;;  %v95_v4 = vmul.f32 %v279_v0, %v81_v53  ;;  %vm101_vm9 = vweird.f32 %v279_v0  ;;  %vm122_vm11 = vmor %vm120_vm10, %vm121_vm8 }
 0x109   :  { %v116_v5 = vmul.f32 %v277_v62, %v115_v1  ;;  %v93_v9 = vsel %vm92_vm7, %v273_v51, %v89_v2  ;;  %vm102_vm13 = vmor %vm100_vm12, %vm101_vm9 }
 0x10a   :  { %v96_v6 = vmul.f32 %v279_v0, %v95_v4  ;;  %v113_v7 = vsel %vm112_vm6, %v275_v54, %v109_v3  ;;  %v124_v15 = vmul.f32 %v93_v9, %v352_v22 }
 0x10b   :  { %v117_v8 = vmul.f32 0.5, %v116_v5  ;;  %v126_v12 = vmul.f32 %v113_v7, %v350_v21  ;;  %v268_v21 = vld [vmem:[%s406_s2] ss:$0 sm:$0xff]  ;;  %s307_s2 = smov [#allocation2]  }
 0x10c   :  { %v97_v10 = vmul.f32 0.5, %v96_v6  ;;  %v131_v25 = vmul.f32 %v267_v14, %v124_v15  ;;  %s214_s8 = sshll.u32 %s307_s2, 4  ;;  %s215_s8 = int_to_ptr.vmem [resolvable:$true] %s214_s8 }
 0x10d   :  { %v118_v11 = vsub.f32 1.5, %v117_v8  ;;  %v133_v23 = vmul.f32 %v267_v14, %v126_v12 }
 0x10e   :  { %v98_v13 = vsub.f32 1.5, %v97_v10  ;;  %v138_v29 = vadd.f32 %v268_v21, %v131_v25 }
 0x10f   :  { %v119_v16 = vmul.f32 %v277_v62, %v118_v11  ;;  %v140_v27 = vadd.f32 %v268_v21, %v133_v23 }
 0x110   :  { %v99_v17 = vmul.f32 %v279_v0, %v98_v13 }
 0x111   :  { %v123_v18 = vsel %vm122_vm11, %v277_v62, %v119_v16 }
 0x112   :  { %v127_v19 = vmul.f32 %v123_v18, %v360_v31  ;;  %v103_v20 = vsel %vm102_vm13, %v279_v0, %v99_v17  ;;  %v269_v31 = vld [vmem:[%s408_s4] ss:$0 sm:$0xff]  ;;  %s308_s4 = smov 128  }
 0x113   :  { %v125_v24 = vmul.f32 %v103_v20, %v362_v32 }
 0x114   :  { %v134_v26 = vmul.f32 %v267_v14, %v127_v19 }
 0x115   :  { %v132_v22 = vmul.f32 %v267_v14, %v125_v24 }
 0x116   :  { %v141_v28 = vadd.f32 %v268_v21, %v134_v26 }
 0x117   :  { %v139_v30 = vadd.f32 %v268_v21, %v132_v22 }
 0x118   :  { %v143_v33 = vpack.c.bf16 %v141_v28, %v140_v27 }
 0x119   :  { %v142_v34 = vpack.c.bf16 %v139_v30, %v138_v29 }
 0x11a   :  { %245 = vmatmul.msk.bf16.vlgmr.msra.gmra.mxu1 %vm32_vm0, %v143_v33 }
 0x11b   :  { %244 = vmatmul.msk.bf16.vlgmr.msra.gmra.mxu0 %vm32_vm0, %v142_v34 }
 0x197   :  { %v200_v35 = vpop.f32.mrf.mxu1 }
 0x198   :  { %v195_v32 = vpop.f32.mrf.mxu0  ;;  %v201_v36 = vadd.f32 %v269_v31, %v200_v35 }
 0x199   :  { %v196_v37 = vadd.f32 %v269_v31, %v195_v32 }
 0x19a   :  { %208 = vst.msk [vmem:[#allocation2 + $0x10] sm:$0xff] %vm205_vm14, %v201_v36 }
 0x19b   :  { %206 = vst.msk [vmem:[#allocation2] sm:$0xff] %vm205_vm14, %v196_v37 }
 0x19f   :  { %v202_v38 = vpop.f32.mrf.mxu1 }
 0x1a0   :  { %v197_v39 = vpop.f32.mrf.mxu0  ;;  %v203_v40 = vadd.f32 %v269_v31, %v202_v38 }
 0x1a1   :  { %v198_v41 = vadd.f32 %v269_v31, %v197_v39 }
 0x1a2   :  { %209 = vst.msk [vmem:[#allocation2 + $0x18] sm:$0xff] %vm205_vm14, %v203_v40 }
 0x1a3   :  { %207 = vst.msk [vmem:[#allocation2 + $0x8] sm:$0xff] %vm205_vm14, %v198_v41 }
 0x1a4   :  { %222 = dma.vmem_to_hbm [thread:$0]  %s215_s8, 512, %s217_s11, [#allocation3], %s308_s4, %s308_s4, %s309_s12  }
 0x1a5   :  { %304 = dma.done.wait [#allocation3], 512  }
 0x1a6   :  { %305 = vsyncadd [#allocation3], 4294966784 }
 0x1a7   :  { %227 = vsyncpa [#allocation3], 1 }

// kernel: _lambda_.27
= control target key start
LH: loop header
LB: loop body
LE: loop exit
PB: predicated region body
PF: predicated region fallthrough
CT: control target
= control target key end

     0   :  { %vm37_vm0 = vcmask 523264   ;;  %v673_v10 = vmov 64.0   ;;  %vm501_vm14 = vcmask 519168   ;;  %s913_s0 = inlined_call_operand.vmem [shape: bf16[32,64], index: 0, kind: input, shape index: {}]   ;;  %s914_s1 = inlined_call_operand.vmem [shape: f32[1,64], index: 1, kind: input, shape index: {}]   ;;  %s915_s2 = inlined_call_operand.vmem [shape: f32[1,64], index: 2, kind: input, shape index: {}]   ;;  %s916_s3 = inlined_call_operand.vmem [shape: bf16[64,256], index: 3, kind: input, shape index: {}]   ;;  %s917_s6 = inlined_call_operand.vmem [shape: f32[1,64], index: 6, kind: input, shape index: {}]   ;;  %s918_s5 = inlined_call_operand.vmem [shape: bf16[256,64], index: 5, kind: input, shape index: {}]   ;;  %s919_s4 = inlined_call_operand.vmem [shape: f32[1,256], index: 4, kind: input, shape index: {}]   ;;  %s920_s7 = inlined_call_operand.vmem [shape: bf16[32,64], index: 7, kind: output, shape index: {}]  }
   0x1   :  { %v642_v0 = vld [vmem:[%s913_s0 + $0x8] sm:$0xff]   ;;  %v635_v1 = vld [vmem:[%s913_s0] sm:$0xff]   ;;  %647 = vrcp.f32 %v673_v10  ;;  %v536_v37 = vld [vmem:[%s916_s3 + $0x30] sm:$0xf] }
   0x2   :  { %v720_v2 = vunpack.c.l.bf16 %v642_v0  ;;  %v722_v3 = vunpack.c.l.bf16 %v635_v1  ;;  %v728_v6 = vunpack.c.h.bf16 %v642_v0  ;;  %v730_v7 = vunpack.c.h.bf16 %v635_v1  ;;  %v617_v38 = vld [vmem:[%s916_s3 + $0x34] sm:$0xf0]  ;;  %v616_v39 = vld [vmem:[%s916_s3 + $0x34] sm:$0xf]  ;;  %v538_v41 = vld [vmem:[%s916_s3 + $0x38] sm:$0xf0] }
   0x3   :  { %v537_v40 = vor.u32 %v617_v38, %v536_v37  ;;  %v541_v42 = vor.u32 %v616_v39, %v538_v41  ;;  %v528_v43 = vld [vmem:[%s916_s3 + $0x20] sm:$0xf]  ;;  %v615_v44 = vld [vmem:[%s916_s3 + $0x24] sm:$0xf0]  ;;  %v614_v45 = vld [vmem:[%s916_s3 + $0x24] sm:$0xf] }
   0x4   :  { %v44_v4 = vsel %vm37_vm0, %v720_v2, 0.0  ;;  %v38_v5 = vsel %vm37_vm0, %v722_v3, 0.0  ;;  %v47_v8 = vsel %vm37_vm0, %v728_v6, 0.0  ;;  %v41_v9 = vsel %vm37_vm0, %v730_v7, 0.0  ;;  %v530_v47 = vld [vmem:[%s916_s3 + $0x28] sm:$0xf0] }
   0x5   :  { %45 = vadd.xlane.f32.xlu1 %v44_v4  ;;  %39 = vadd.xlane.f32.xlu0 %v38_v5  ;;  %v529_v46 = vor.u32 %v615_v44, %v528_v43  ;;  %v533_v48 = vor.u32 %v614_v45, %v530_v47  ;;  %v520_v49 = vld [vmem:[%s916_s3 + $0x10] sm:$0xf]  ;;  %v613_v50 = vld [vmem:[%s916_s3 + $0x14] sm:$0xf0]  ;;  %v612_v51 = vld [vmem:[%s916_s3 + $0x14] sm:$0xf] }
   0x6   :  { %213 = vmatpush.bf16.msra.mxu0 %v537_v40  ;;  %232 = vmatpush.bf16.msra.mxu1 %v541_v42  ;;  %v521_v52 = vor.u32 %v613_v50, %v520_v49  ;;  %v522_v53 = vld [vmem:[%s916_s3 + $0x18] sm:$0xf0]  ;;  %v512_v56 = vld [vmem:[%s916_s3] sm:$0xf]  ;;  %v611_v57 = vld [vmem:[%s916_s3 + $0x4] sm:$0xf0] }
   0x7   :  { %v648_v11 = vpop.eup %647  ;;  %v525_v55 = vor.u32 %v612_v51, %v522_v53  ;;  %v610_v58 = vld [vmem:[%s916_s3 + $0x4] sm:$0xf]  ;;  %v513_v61 = vor.u32 %v611_v57, %v512_v56  ;;  %v514_v62 = vld [vmem:[%s916_s3 + $0x8] sm:$0xf0]  ;;  %v644_v37 = vld [vmem:[%s914_s1] ss:$0 sm:$0xff] }
   0x8   :  { %v51_v12 = vmul.f32 64.0, %v648_v11  ;;  %vm55_vm1 = vweird.f32 %v648_v11  ;;  %v517_v63 = vor.u32 %v610_v58, %v514_v62  ;;  %v645_v44 = vld [vmem:[%s915_s2] ss:$0 sm:$0xff]  ;;  %v631_v62 = vld [vmem:[%s918_s5 + $0x68] sm:$0xff] }
   0xa   :  { %v52_v13 = vsub.f32 1.0, %v51_v12  ;;  %214 = vmatpush.bf16.msra.mxu0 %v529_v46  ;;  %233 = vmatpush.bf16.msra.mxu1 %v533_v48 }
   0xc   :  { %v53_v14 = vmul.f32 %v648_v11, %v52_v13 }
   0xd   :  { %48 = vadd.xlane.f32.xlu1 %v47_v8  ;;  %42 = vadd.xlane.f32.xlu0 %v41_v9 }
   0xe   :  { %v54_v15 = vadd.f32 %v648_v11, %v53_v14  ;;  %215 = vmatpush.bf16.msra.mxu0 %v521_v52  ;;  %234 = vmatpush.bf16.msra.mxu1 %v525_v55 }
  0x10   :  { %v736_v16 = vsel %vm55_vm1, %v648_v11, %v54_v15 }
  0x12   :  { %216 = vmatpush.bf16.msra.mxu0 %v513_v61  ;;  %235 = vmatpush.bf16.msra.mxu1 %v517_v63  ;;  %v623_v61 = vld [vmem:[%s918_s5 + $0x28] sm:$0xff]  ;;  %v622_v63 = vld [vmem:[%s918_s5 + $0x20] sm:$0xff] }
  0x78   :  { %v46_v17 = vpop.xlane.xlu1 %45  ;;  %v40_v18 = vpop.xlane.xlu0 %39 }
  0x79   :  { %v59_v19 = vmul.f32 %v736_v16, %v46_v17  ;;  %v57_v20 = vmul.f32 %v736_v16, %v40_v18 }
  0x7b   :  { %v741_v21 = vsub.f32 %v720_v2, %v59_v19  ;;  %v744_v22 = vsub.f32 %v722_v3, %v57_v20 }
  0x7d   :  { %v67_v23 = vmul.f32 %v741_v21, %v741_v21  ;;  %v65_v24 = vmul.f32 %v744_v22, %v744_v22 }
  0x7f   :  { %v75_v25 = vsel %vm37_vm0, %v67_v23, 0.0  ;;  %v69_v26 = vsel %vm37_vm0, %v65_v24, 0.0 }
  0x80   :  { %v49_v27 = vpop.xlane.xlu1 %48  ;;  %76 = vadd.xlane.f32.xlu0 %v75_v25  ;;  %70 = vadd.xlane.f32.xlu2 %v69_v26  ;;  %v43_v28 = vpop.xlane.xlu0 %42 }
  0x81   :  { %v60_v29 = vmul.f32 %v736_v16, %v49_v27  ;;  %v58_v30 = vmul.f32 %v736_v16, %v43_v28 }
  0x83   :  { %v755_v31 = vsub.f32 %v728_v6, %v60_v29  ;;  %v758_v32 = vsub.f32 %v730_v7, %v58_v30 }
  0x85   :  { %v68_v33 = vmul.f32 %v755_v31, %v755_v31  ;;  %v66_v34 = vmul.f32 %v758_v32, %v758_v32 }
  0x87   :  { %v78_v35 = vsel %vm37_vm0, %v68_v33, 0.0  ;;  %v72_v36 = vsel %vm37_vm0, %v66_v34, 0.0 }
  0x88   :  { %79 = vadd.xlane.f32.xlu1 %v78_v35  ;;  %73 = vadd.xlane.f32.xlu2 %v72_v36 }
  0xf3   :  { %v71_v54 = vpop.xlane.xlu2 %70  ;;  %v77_v60 = vpop.xlane.xlu0 %76 }
  0xf4   :  { %v81_v59 = vmul.f32 %v71_v54, %v736_v16  ;;  %v83_v1 = vmul.f32 %v77_v60, %v736_v16  ;;  %v633_v60 = vld [vmem:[%s918_s5 + $0x78] sm:$0xff] }
  0xf5   :  { %474 = vmatpush.bf16.msra.mxu3 %v633_v60 }
  0xf6   :  { %v85_v0 = vadd.f32 1e-05, %v81_v59  ;;  %v87_v4 = vadd.f32 1e-05, %v83_v1  ;;  %v625_v59 = vld [vmem:[%s918_s5 + $0x38] sm:$0xff] }
  0xf7   :  { %455 = vmatpush.bf16.msra.mxu2 %v625_v59  ;;  %v621_v1 = vld [vmem:[%s918_s5 + $0x18] sm:$0xff] }
  0xf8   :  { %649 = vrsqrt.f32 %v85_v0  ;;  %vm95_vm3 = vweird.f32 %v85_v0  ;;  %vm115_vm10 = vweird.f32 %v87_v4 }
  0xf9   :  { %651 = vrsqrt.f32 %v87_v4 }
  0xfb   :  { %v80_v5 = vpop.xlane.xlu1 %79  ;;  %v74_v8 = vpop.xlane.xlu2 %73 }
  0xfc   :  { %v84_v9 = vmul.f32 %v80_v5, %v736_v16  ;;  %v82_v10 = vmul.f32 %v74_v8, %v736_v16  ;;  %v620_v5 = vld [vmem:[%s918_s5 + $0x10] sm:$0xff] }
  0xfd   :  { %v628_v8 = vld [vmem:[%s918_s5 + $0x50] sm:$0xff] }
  0xfe   :  { %v650_v11 = vpop.eup %649  ;;  %v88_v12 = vadd.f32 1e-05, %v84_v9  ;;  %v86_v13 = vadd.f32 1e-05, %v82_v10  ;;  %v619_v9 = vld [vmem:[%s918_s5 + $0x8] sm:$0xff] }
  0xff   :  { %v90_v14 = vmul.f32 %v650_v11, %v85_v0  ;;  %v652_v18 = vpop.eup %651  ;;  %vm96_vm2 = vweird.f32 %v650_v11  ;;  %v630_v0 = vld [vmem:[%s918_s5 + $0x60] sm:$0xff]  ;;  %v627_v10 = vld [vmem:[%s918_s5 + $0x48] sm:$0xff] }
 0x100   :  { %653 = vrsqrt.f32 %v88_v12  ;;  %v110_v26 = vmul.f32 %v652_v18, %v87_v4  ;;  %vm97_vm4 = vmor %vm95_vm3, %vm96_vm2  ;;  %vm105_vm6 = vweird.f32 %v86_v13  ;;  %vm125_vm8 = vweird.f32 %v88_v12  ;;  %v629_v4 = vld [vmem:[%s918_s5 + $0x58] sm:$0xff] }
 0x101   :  { %v91_v15 = vmul.f32 %v650_v11, %v90_v14  ;;  %655 = vrsqrt.f32 %v86_v13  ;;  %vm116_vm11 = vweird.f32 %v652_v18 }
 0x102   :  { %v111_v30 = vmul.f32 %v652_v18, %v110_v26  ;;  %vm117_vm13 = vmor %vm115_vm10, %vm116_vm11 }
 0x103   :  { %v92_v17 = vmul.f32 0.5, %v91_v15 }
 0x104   :  { %v112_v38 = vmul.f32 0.5, %v111_v30 }
 0x105   :  { %v93_v19 = vsub.f32 1.5, %v92_v17 }
 0x106   :  { %v654_v20 = vpop.eup %653  ;;  %v113_v45 = vsub.f32 1.5, %v112_v38 }
 0x107   :  { %v656_v23 = vpop.eup %655  ;;  %v120_v24 = vmul.f32 %v654_v20, %v88_v12  ;;  %v94_v25 = vmul.f32 %v650_v11, %v93_v19  ;;  %vm126_vm9 = vweird.f32 %v654_v20  ;;  %v618_v12 = vld [vmem:[%s918_s5] sm:$0xff] }
 0x108   :  { %v100_v27 = vmul.f32 %v656_v23, %v86_v13  ;;  %vm106_vm5 = vweird.f32 %v656_v23  ;;  %vm127_vm12 = vmor %vm125_vm8, %vm126_vm9  ;;  %v114_v49 = vmul.f32 %v652_v18, %v113_v45  ;;  %v626_v13 = vld [vmem:[%s918_s5 + $0x40] sm:$0xff] }
 0x109   :  { %v121_v16 = vmul.f32 %v654_v20, %v120_v24  ;;  %v98_v29 = vsel %vm97_vm4, %v650_v11, %v94_v25  ;;  %vm107_vm7 = vmor %vm105_vm6, %vm106_vm5  ;;  %v157_v11 = vld [vmem:[%s919_s4] sm:$0x3] }
 0x10a   :  { %v101_v28 = vmul.f32 %v656_v23, %v100_v27  ;;  %v129_v36 = vmul.f32 %v98_v29, %v744_v22  ;;  %v159_v14 = vperm.slane %v157_v11, 0  ;;  %v160_v15 = vperm.slane %v157_v11, 1 }
 0x10b   :  { %v122_v34 = vmul.f32 0.5, %v121_v16 }
 0x10c   :  { %v102_v33 = vmul.f32 0.5, %v101_v28  ;;  %v136_v43 = vmul.f32 %v644_v37, %v129_v36 }
 0x10d   :  { %v123_v40 = vsub.f32 1.5, %v122_v34 }
 0x10e   :  { %v103_v35 = vsub.f32 1.5, %v102_v33  ;;  %v143_v47 = vadd.f32 %v645_v44, %v136_v43 }
 0x10f   :  { %v124_v46 = vmul.f32 %v654_v20, %v123_v40 }
 0x110   :  { %v104_v39 = vmul.f32 %v656_v23, %v103_v35 }
 0x111   :  { %v128_v51 = vsel %vm127_vm12, %v654_v20, %v124_v46 }
 0x112   :  { %v108_v41 = vsel %vm107_vm7, %v656_v23, %v104_v39  ;;  %v132_v52 = vmul.f32 %v128_v51, %v755_v31  ;;  %v632_v31 = vld [vmem:[%s918_s5 + $0x70] sm:$0xff] }
 0x113   :  { %v130_v42 = vmul.f32 %v108_v41, %v758_v32  ;;  %v118_v32 = vsel %vm117_vm13, %v652_v18, %v114_v49  ;;  %475 = vmatpush.bf16.msra.mxu3 %v632_v31 }
 0x114   :  { %v131_v53 = vmul.f32 %v118_v32, %v741_v21  ;;  %v139_v54 = vmul.f32 %v644_v37, %v132_v52  ;;  %v624_v21 = vld [vmem:[%s918_s5 + $0x30] sm:$0xff] }
 0x115   :  { %v137_v22 = vmul.f32 %v644_v37, %v130_v42  ;;  %456 = vmatpush.bf16.msra.mxu2 %v624_v21 }
 0x116   :  { %v138_v55 = vmul.f32 %v644_v37, %v131_v53  ;;  %v146_v56 = vadd.f32 %v645_v44, %v139_v54 }
 0x117   :  { %v144_v48 = vadd.f32 %v645_v44, %v137_v22  ;;  %476 = vmatpush.bf16.msra.mxu3 %v631_v62 }
 0x118   :  { %v145_v57 = vadd.f32 %v645_v44, %v138_v55 }
 0x119   :  { %v147_v50 = vpack.c.bf16 %v144_v48, %v143_v47  ;;  %457 = vmatpush.bf16.msra.mxu2 %v623_v61 }
 0x11a   :  { %v148_v58 = vpack.c.bf16 %v146_v56, %v145_v57 }
 0x11b   :  { %542 = vmatmul.msk.bf16.vlgmr.msra.gmra.mxu0 %vm37_vm0, %v147_v50  ;;  %544 = vmatmul.msk.bf16.vlgmr.msra.gmra.mxu1 %vm37_vm0, %v147_v50 }
 0x11c   :  { %477 = vmatpush.bf16.msra.mxu3 %v630_v0 }
 0x11d   :  { %458 = vmatpush.bf16.msra.mxu2 %v622_v63 }
 0x120   :  { %478 = vmatpush.bf16.msra.mxu3 %v629_v4 }
 0x121   :  { %459 = vmatpush.bf16.msra.mxu2 %v621_v1 }
 0x124   :  { %479 = vmatpush.bf16.msra.mxu3 %v628_v8 }
 0x125   :  { %460 = vmatpush.bf16.msra.mxu2 %v620_v5 }
 0x128   :  { %480 = vmatpush.bf16.msra.mxu3 %v627_v10 }
 0x129   :  { %461 = vmatpush.bf16.msra.mxu2 %v619_v9 }
 0x12b   :  { %543 = vmatmul.msk.bf16.gmra.mxu0 %vm37_vm0, %v148_v58  ;;  %545 = vmatmul.msk.bf16.gmra.mxu1 %vm37_vm0, %v148_v58 }
 0x12c   :  { %481 = vmatpush.bf16.msra.mxu3 %v626_v13 }
 0x12d   :  { %462 = vmatpush.bf16.msra.mxu2 %v618_v12 }
 0x198   :  { %v218_v17 = vpop.f32.mrf.mxu0  ;;  %v237_v18 = vpop.f32.mrf.mxu1 }
 0x199   :  { %v219_v19 = vadd.f32 %v218_v17, %v159_v14  ;;  %v238_v20 = vadd.f32 %v237_v18, %v160_v15 }
 0x19b   :  { %v255_v23 = vmul.f32 0.044715, %v219_v19  ;;  %v256_v24 = vmul.f32 0.044715, %v238_v20  ;;  %v247_v4 = vmul.f32 0.5, %v219_v19  ;;  %v248_v11 = vmul.f32 0.5, %v238_v20 }
 0x19d   :  { %v263_v25 = vmul.f32 %v255_v23, %v219_v19  ;;  %v264_v26 = vmul.f32 %v256_v24, %v238_v20 }
 0x19f   :  { %v271_v27 = vmul.f32 %v263_v25, %v219_v19  ;;  %v272_v16 = vmul.f32 %v264_v26, %v238_v20 }
 0x1a0   :  { %v220_v28 = vpop.f32.mrf.mxu0  ;;  %v239_v29 = vpop.f32.mrf.mxu1 }
 0x1a1   :  { %v221_v30 = vadd.f32 %v220_v28, %v159_v14  ;;  %v240_v33 = vadd.f32 %v239_v29, %v160_v15  ;;  %v279_v34 = vadd.f32 %v271_v27, %v219_v19  ;;  %v280_v35 = vadd.f32 %v272_v16, %v238_v20 }
 0x1a3   :  { %v257_v36 = vmul.f32 0.044715, %v221_v30  ;;  %v258_v37 = vmul.f32 0.044715, %v240_v33  ;;  %v287_v38 = vmul.f32 0.7978846, %v279_v34 }
 0x1a4   :  { %v288_v41 = vmul.f32 0.7978846, %v280_v35  ;;  %v249_v9 = vmul.f32 0.5, %v221_v30  ;;  %v250_v12 = vmul.f32 0.5, %v240_v33 }
 0x1a5   :  { %v265_v39 = vmul.f32 %v257_v36, %v221_v30  ;;  %v266_v40 = vmul.f32 %v258_v37, %v240_v33  ;;  %657 = vtanh.f32 %v287_v38 }
 0x1a6   :  { %659 = vtanh.f32 %v288_v41 }
 0x1a7   :  { %v273_v42 = vmul.f32 %v265_v39, %v221_v30  ;;  %v274_v43 = vmul.f32 %v266_v40, %v240_v33 }
 0x1a8   :  { %v223_v44 = vpop.f32.mrf.mxu0  ;;  %v242_v45 = vpop.f32.mrf.mxu1 }
 0x1a9   :  { %v224_v22 = vadd.f32 %v223_v44, %v159_v14  ;;  %v883_v46 = vadd.f32 %v242_v45, %v160_v15  ;;  %v281_v47 = vadd.f32 %v273_v42, %v221_v30  ;;  %v282_v48 = vadd.f32 %v274_v43, %v240_v33 }
 0x1ab   :  { %v259_v49 = vmul.f32 0.044715, %v224_v22  ;;  %v260_v50 = vmul.f32 0.044715, %v883_v46  ;;  %v289_v51 = vmul.f32 0.7978846, %v281_v47  ;;  %v658_v54 = vpop.eup %657 }
 0x1ac   :  { %v290_v32 = vmul.f32 0.7978846, %v282_v48  ;;  %v660_v57 = vpop.eup %659  ;;  %v303_v61 = vadd.f32 1.0, %v658_v54  ;;  %v251_v40 = vmul.f32 0.5, %v224_v22  ;;  %v252_v43 = vmul.f32 0.5, %v883_v46 }
 0x1ad   :  { %661 = vtanh.f32 %v289_v51  ;;  %v267_v52 = vmul.f32 %v259_v49, %v224_v22  ;;  %v268_v53 = vmul.f32 %v260_v50, %v883_v46  ;;  %v304_v5 = vadd.f32 1.0, %v660_v57 }
 0x1ae   :  { %663 = vtanh.f32 %v290_v32 }
 0x1af   :  { %v275_v55 = vmul.f32 %v267_v52, %v224_v22  ;;  %v276_v56 = vmul.f32 %v268_v53, %v883_v46  ;;  %v312_v25 = vmul.f32 %v304_v5, %v248_v11  ;;  %v646_v52 = vld [vmem:[%s917_s6] ss:$0 sm:$0xff] }
 0x1b0   :  { %v225_v58 = vpop.f32.mrf.mxu0  ;;  %v244_v59 = vpop.f32.mrf.mxu1 }
 0x1b1   :  { %v226_v60 = vadd.f32 %v225_v58, %v159_v14  ;;  %v245_v21 = vadd.f32 %v244_v59, %v160_v15  ;;  %v283_v31 = vadd.f32 %v275_v55, %v224_v22  ;;  %v284_v62 = vadd.f32 %v276_v56, %v883_v46 }
 0x1b2   :  { %v311_v14 = vmul.f32 %v303_v61, %v247_v4 }
 0x1b3   :  { %v662_v63 = vpop.eup %661  ;;  %v261_v0 = vmul.f32 0.044715, %v226_v60  ;;  %v262_v1 = vmul.f32 0.044715, %v245_v21  ;;  %v291_v18 = vmul.f32 0.7978846, %v283_v31 }
 0x1b4   :  { %v664_v8 = vpop.eup %663  ;;  %v305_v10 = vadd.f32 1.0, %v662_v63  ;;  %v292_v24 = vmul.f32 0.7978846, %v284_v62  ;;  %v253_v41 = vmul.f32 0.5, %v226_v60  ;;  %v254_v44 = vmul.f32 0.5, %v245_v21 }
 0x1b5   :  { %v306_v13 = vadd.f32 1.0, %v664_v8  ;;  %v269_v17 = vmul.f32 %v261_v0, %v226_v60  ;;  %v270_v23 = vmul.f32 %v262_v1, %v245_v21  ;;  %665 = vtanh.f32 %v291_v18 }
 0x1b6   :  { %v313_v15 = vmul.f32 %v305_v10, %v249_v9  ;;  %667 = vtanh.f32 %v292_v24 }
 0x1b7   :  { %v314_v26 = vmul.f32 %v306_v13, %v250_v12  ;;  %v277_v27 = vmul.f32 %v269_v17, %v226_v60  ;;  %v278_v16 = vmul.f32 %v270_v23, %v245_v21 }
 0x1b8   :  { %v319_v28 = vpack.c.bf16 %v313_v15, %v311_v14 }
 0x1b9   :  { %v320_v29 = vpack.c.bf16 %v314_v26, %v312_v25  ;;  %v285_v19 = vadd.f32 %v277_v27, %v226_v60  ;;  %v286_v34 = vadd.f32 %v278_v16, %v245_v21 }
 0x1ba   :  { %463 = vmatmul.bf16.vlgmr.msra.gmra.mxu2 %v319_v28 }
 0x1bb   :  { %482 = vmatmul.bf16.vlgmr.msra.gmra.mxu3 %v320_v29  ;;  %v293_v20 = vmul.f32 0.7978846, %v285_v19  ;;  %v294_v30 = vmul.f32 0.7978846, %v286_v34  ;;  %v666_v33 = vpop.eup %665 }
 0x1bc   :  { %v668_v35 = vpop.eup %667  ;;  %v307_v36 = vadd.f32 1.0, %v666_v33 }
 0x1bd   :  { %669 = vtanh.f32 %v293_v20  ;;  %v308_v38 = vadd.f32 1.0, %v668_v35 }
 0x1be   :  { %671 = vtanh.f32 %v294_v30  ;;  %v315_v47 = vmul.f32 %v307_v36, %v251_v40 }
 0x1bf   :  { %v316_v49 = vmul.f32 %v308_v38, %v252_v43 }
 0x1c3   :  { %v670_v37 = vpop.eup %669 }
 0x1c4   :  { %v672_v39 = vpop.eup %671  ;;  %v309_v42 = vadd.f32 1.0, %v670_v37 }
 0x1c5   :  { %v310_v45 = vadd.f32 1.0, %v672_v39 }
 0x1c6   :  { %v317_v48 = vmul.f32 %v309_v42, %v253_v41 }
 0x1c7   :  { %v318_v50 = vmul.f32 %v310_v45, %v254_v44 }
 0x1c8   :  { %v321_v51 = vpack.c.bf16 %v317_v48, %v315_v47 }
 0x1c9   :  { %v322_v32 = vpack.c.bf16 %v318_v50, %v316_v49 }
 0x1ca   :  { %468 = vmatmul.bf16.gmra.mxu2 %v321_v51 }
 0x1cb   :  { %487 = vmatmul.bf16.gmra.mxu3 %v322_v32 }
 0x23d   :  { %v464_v53 = vpop.f32.mrf.mxu2 }
 0x23e   :  { %v465_v22 = vadd.f32 %v646_v52, %v464_v53  ;;  %v483_v54 = vpop.f32.mrf.mxu3 }
 0x240   :  { %v484_v55 = vadd.f32 %v483_v54, %v465_v22 }
 0x242   :  { %v493_v46 = vadd.f32 %v722_v3, %v484_v55 }
 0x244   :  { %v497_v56 = vpack.c.bf16 %v493_v46, %v493_v46 }
 0x245   :  { %v466_v57 = vpop.f32.mrf.mxu2 }
 0x246   :  { %502 = vst.msk [vmem:[%s920_s7] sm:$0xf] %vm501_vm14, %v497_v56  ;;  %v467_v58 = vadd.f32 %v646_v52, %v466_v57  ;;  %v485_v59 = vpop.f32.mrf.mxu3 }
 0x248   :  { %v486_v60 = vadd.f32 %v485_v59, %v467_v58 }
 0x24a   :  { %v494_v21 = vadd.f32 %v730_v7, %v486_v60 }
 0x24c   :  { %v498_v31 = vpack.c.bf16 %v494_v21, %v494_v21 }
 0x24d   :  { %v469_v61 = vpop.f32.mrf.mxu2 }
 0x24e   :  { %503 = vst.msk [vmem:[%s920_s7 + $0x4] sm:$0xf] %vm501_vm14, %v498_v31  ;;  %v470_v3 = vadd.f32 %v646_v52, %v469_v61  ;;  %v488_v62 = vpop.f32.mrf.mxu3 }
 0x250   :  { %v489_v63 = vadd.f32 %v488_v62, %v470_v3 }
 0x252   :  { %v495_v0 = vadd.f32 %v720_v2, %v489_v63 }
 0x254   :  { %v499_v1 = vpack.c.bf16 %v495_v0, %v495_v0 }
 0x255   :  { %v471_v4 = vpop.f32.mrf.mxu2 }
 0x256   :  { %504 = vst.msk [vmem:[%s920_s7 + $0x8] sm:$0xf] %vm501_vm14, %v499_v1  ;;  %v472_v7 = vadd.f32 %v646_v52, %v471_v4  ;;  %v490_v5 = vpop.f32.mrf.mxu3 }
 0x258   :  { %v491_v8 = vadd.f32 %v490_v5, %v472_v7 }
 0x25a   :  { %v496_v9 = vadd.f32 %v728_v6, %v491_v8 }
 0x25c   :  { %v500_v10 = vpack.c.bf16 %v496_v9, %v496_v9 }
 0x25e   :  { %505 = vst.msk [vmem:[%s920_s7 + $0xc] sm:$0xf] %vm501_vm14, %v500_v10 }

</bundles_post_ra>
